<compile_context>
chip_gen: v6e
topology: v6e:2x2x1
jax: 0.10.0
libtpu: 0.0.40
codegen_flags: <defaults>
</compile_context>

<pallas_src>
import functools

import jax
import jax.numpy as jnp
from jax.experimental import pallas as pl
from jax.experimental.pallas import tpu as pltpu

LANE = 128


def _round_up(x, m):
    return ((x + m - 1) // m) * m


# ----------------------------------------------------------------------------
# Pallas kernel: one grid step = one batch element (whole image).
# ----------------------------------------------------------------------------
def _conv_bn_silu_kernel(x_ref, w_ref, b_ref, o_ref, xp_ref, *, k):
    """
    x_ref : (1, H, W, Cin)      f32 input (unpadded channels)
    w_ref : (k*k*Cp, Cop)       bf16 weights, BN scale folded, channel padded
    b_ref : (1, Cop)            f32 folded BN bias
    o_ref : (1, H, W, Cop)      f32 output (lane-dense channels)
    xp_ref: (H+2p, W+2p, Cp)    bf16 VMEM scratch: zero-padded input
    """
    pad = k // 2
    H = o_ref.shape[1]
    W = o_ref.shape[2]
    Cop = o_ref.shape[3]
    Cin = x_ref.shape[3]
    Hp, Wp, Cp = xp_ref.shape
    dt = xp_ref.dtype

    # -- Build the zero-padded bf16 input in VMEM ---------------------------
    # Clear only the regions the interior store below does not cover:
    # spatial halo rows/cols (all Cp channels) and the channel-padding tail
    # of the interior.  All slice starts/sizes are static Python ints.
    if pad > 0:
        xp_ref[pl.ds(0, pad), pl.ds(0, Wp), pl.ds(0, Cp)] = (
            jnp.zeros((pad, Wp, Cp), dt))
        xp_ref[pl.ds(pad + H, pad), pl.ds(0, Wp), pl.ds(0, Cp)] = (
            jnp.zeros((pad, Wp, Cp), dt))
        xp_ref[pl.ds(pad, H), pl.ds(0, pad), pl.ds(0, Cp)] = (
            jnp.zeros((H, pad, Cp), dt))
        xp_ref[pl.ds(pad, H), pl.ds(pad + W, pad), pl.ds(0, Cp)] = (
            jnp.zeros((H, pad, Cp), dt))
    if Cp > Cin:
        xp_ref[pl.ds(pad, H), pl.ds(pad, W), pl.ds(Cin, Cp - Cin)] = (
            jnp.zeros((H, W, Cp - Cin), dt))
    xp_ref[pl.ds(pad, H), pl.ds(pad, W), pl.ds(0, Cin)] = x_ref[0].astype(dt)

    # -- im2col: lane-dense patch matrix -> ONE MXU matmul, K = k*k*Cp -------
    cols = []
    for ky in range(k):
        for kx in range(k):
            cols.append(xp_ref[pl.ds(ky, H), pl.ds(kx, W), pl.ds(0, Cp)])
    patches = jnp.concatenate(cols, axis=-1).reshape(H * W, k * k * Cp)

    acc = jnp.dot(patches, w_ref[...], preferred_element_type=jnp.float32)

    # -- Folded BatchNorm bias + SiLU (f32 epilogue) -------------------------
    y = acc + b_ref[...]
    y = y * jax.nn.sigmoid(y)
    o_ref[...] = y.reshape(1, H, W, Cop).astype(o_ref.dtype)


def conv_bn_silu(x_nhwc, w_folded, bias, *, k):
    """x_nhwc: (N,H,W,Cin) f32.  w_folded: (k*k*Cp, Cop) bf16.  bias: (1,Cop) f32."""
    N, H, W, Cin = x_nhwc.shape
    KKCp, Cop = w_folded.shape
    Cp = KKCp // (k * k)
    pad = k // 2

    kernel = functools.partial(_conv_bn_silu_kernel, k=k)

    flops = 2 * N * H * W * KKCp * Cop
    transcendentals = N * H * W * Cop                       # one sigmoid / out elem
    bytes_accessed = (int(x_nhwc.size) * x_nhwc.dtype.itemsize
                      + int(w_folded.size) * w_folded.dtype.itemsize
                      + int(bias.size) * bias.dtype.itemsize
                      + N * H * W * Cop * x_nhwc.dtype.itemsize)

    return pl.pallas_call(
        kernel,
        out_shape=jax.ShapeDtypeStruct((N, H, W, Cop), x_nhwc.dtype),
        grid=(N,),
        in_specs=[
            pl.BlockSpec((1, H, W, Cin), lambda n: (n, 0, 0, 0)),
            pl.BlockSpec((KKCp, Cop), lambda n: (0, 0)),
            pl.BlockSpec((1, Cop), lambda n: (0, 0)),
        ],
        out_specs=pl.BlockSpec((1, H, W, Cop), lambda n: (n, 0, 0, 0)),
        scratch_shapes=[
            pltpu.VMEM((H + 2 * pad, W + 2 * pad, Cp), jnp.bfloat16),
        ],
        compiler_params=pltpu.CompilerParams(
            dimension_semantics=("parallel",)),
        cost_estimate=pl.CostEstimate(
            flops=flops,
            transcendentals=transcendentals,
            bytes_accessed=bytes_accessed),
    )(x_nhwc, w_folded, bias)


# ----------------------------------------------------------------------------
# Parameters (deterministic synthetic) and the Conv forward wrapper.
# ----------------------------------------------------------------------------
def init_conv_params(key, c1, c2, k=3):
    """Raw PyTorch-style parameters: Conv2d weight + BatchNorm2d (inference)."""
    ks = jax.random.split(key, 5)
    w = jax.random.normal(ks[0], (c2, c1, k, k), jnp.float32) * 0.1   # (Cout,Cin,kH,kW)
    gamma = 1.0 + 0.1 * jax.random.normal(ks[1], (c2,), jnp.float32)
    beta = 0.1 * jax.random.normal(ks[2], (c2,), jnp.float32)
    mean = 0.1 * jax.random.normal(ks[3], (c2,), jnp.float32)
    var = jnp.abs(jax.random.normal(ks[4], (c2,), jnp.float32)) * 0.1 + 1.0
    return dict(w=w, gamma=gamma, beta=beta, mean=mean, var=var, k=k,
                c1=c1, c2=c2)


def fold_and_pack(raw, eps=1e-5):
    """Fold BN into the conv weights (f32), pad channels to lane width, cast bf16."""
    c1, c2, k = raw["c1"], raw["c2"], raw["k"]
    scale = raw["gamma"] / jnp.sqrt(raw["var"] + eps)                 # (Cout,)
    bias = raw["beta"] - raw["mean"] * scale                          # (Cout,)

    w = jnp.transpose(raw["w"], (2, 3, 1, 0)) * scale                 # (kH,kW,Cin,Cout)

    cp = _round_up(c1, LANE)
    cop = _round_up(c2, LANE)
    w = jnp.pad(w, ((0, 0), (0, 0), (0, cp - c1), (0, cop - c2)))
    w = w.reshape(k * k * cp, cop).astype(jnp.bfloat16)
    bias = jnp.pad(bias, (0, cop - c2)).reshape(1, cop).astype(jnp.float32)
    return dict(w=w, b=bias, k=k, c2=c2)


def conv_forward(x_nchw, packed):
    """PyTorch Conv.forward: SiLU(BN(Conv2d(x))).  NCHW in / NCHW out."""
    x_nhwc = jnp.transpose(x_nchw, (0, 2, 3, 1))                      # NCHW -> NHWC
    y = conv_bn_silu(x_nhwc, packed["w"], packed["b"], k=packed["k"])
    y = y[..., : packed["c2"]]                                        # drop lane padding
    return jnp.transpose(y, (0, 3, 1, 2))                             # NHWC -> NCHW


def conv_forward_reference(x_nchw, raw, eps=1e-5):
    """Pure-JAX f32 reference (inference-mode BN), for a sanity check."""
    x_nhwc = jnp.transpose(x_nchw, (0, 2, 3, 1))
    w_hwio = jnp.transpose(raw["w"], (2, 3, 1, 0))
    y = jax.lax.conv_general_dilated(
        x_nhwc, w_hwio, window_strides=(1, 1), padding="SAME",
        dimension_numbers=("NHWC", "HWIO", "NHWC"))
    scale = raw["gamma"] / jnp.sqrt(raw["var"] + eps)
    bias = raw["beta"] - raw["mean"] * scale
    y = y * scale + bias
    y = y * jax.nn.sigmoid(y)
    return jnp.transpose(y, (0, 3, 1, 2))


if __name__ == "__main__":
    key = jax.random.PRNGKey(0)
    k_x, k_p = jax.random.split(key)

    # Small shapes consistent with the module: c1=4, c2=8, k=3, s=1.
    N, C1, H, W = 2, 4, 16, 16
    C2 = 8

    x = jax.random.normal(k_x, (N, C1, H, W), jnp.float32)
    raw = init_conv_params(k_p, C1, C2, k=3)
    packed = fold_and_pack(raw)

    out = conv_forward(x, packed)
    jax.block_until_ready(out)
    assert out.shape == (N, C2, H, W), out.shape

    ref = conv_forward_reference(x, raw)
    err = float(jnp.max(jnp.abs(out - ref)))
    assert err < 5e-2, f"max abs error vs reference: {err}"

    print("KERNEL_OK")
</pallas_src>

<mosaic_0001>
module attributes {stable_mosaic.version = 11 : i64} {
  func.func @_conv_bn_silu_kernel(%arg0: i32, %arg1: memref<1x16x16x4xf32, #tpu.memory_space<vmem>>, %arg2: memref<1152x128xbf16, #tpu.memory_space<vmem>>, %arg3: memref<1x128xf32, #tpu.memory_space<vmem>>, %arg4: memref<1x16x16x128xf32, #tpu.memory_space<vmem>>, %arg5: memref<18x18x128xbf16, #tpu.memory_space<vmem>>) attributes {dimension_semantics = [#tpu.dimension_semantics<parallel>], iteration_bounds = array<i64: 2>, scalar_prefetch = 0 : i64, scratch_operands = 1 : i64, tpu.core_type = #tpu.core_type<tc>, window_params = [{transform_indices = @transform_0, window_bounds = array<i64: 1, 16, 16, 4>}, {pipeline_mode = #tpu.pipeline_mode<synchronous>, transform_indices = @transform_1, window_bounds = array<i64: 1152, 128>}, {pipeline_mode = #tpu.pipeline_mode<synchronous>, transform_indices = @transform_2, window_bounds = array<i64: 1, 128>}, {transform_indices = @transform_3, window_bounds = array<i64: 1, 16, 16, 128>}]} {
    %cst = arith.constant 0.000000e+00 : bf16
    %0 = vector.broadcast %cst : bf16 to vector<1x18x128xbf16>
    %c0 = arith.constant 0 : index
    %c0_0 = arith.constant 0 : index
    %c0_1 = arith.constant 0 : index
    %1 = vector.load %arg5[%c0, %c0_0, %c0_1] : memref<18x18x128xbf16, #tpu.memory_space<vmem>>, vector<1x18x128xbf16>
    tpu.vector_store %arg5[%c0, %c0_0, %c0_1], %0 {strides = array<i32>} : memref<18x18x128xbf16, #tpu.memory_space<vmem>>, vector<1x18x128xbf16>,
    %cst_2 = arith.constant 0.000000e+00 : bf16
    %2 = vector.broadcast %cst_2 : bf16 to vector<1x18x128xbf16>
    %c17 = arith.constant 17 : index
    %c0_3 = arith.constant 0 : index
    %c0_4 = arith.constant 0 : index
    %3 = vector.load %arg5[%c17, %c0_3, %c0_4] : memref<18x18x128xbf16, #tpu.memory_space<vmem>>, vector<1x18x128xbf16>
    tpu.vector_store %arg5[%c17, %c0_3, %c0_4], %2 {strides = array<i32>} : memref<18x18x128xbf16, #tpu.memory_space<vmem>>, vector<1x18x128xbf16>,
    %cst_5 = arith.constant 0.000000e+00 : bf16
    %4 = vector.broadcast %cst_5 : bf16 to vector<16x1x128xbf16>
    %c1 = arith.constant 1 : index
    %c0_6 = arith.constant 0 : index
    %c0_7 = arith.constant 0 : index
    %5 = vector.load %arg5[%c1, %c0_6, %c0_7] : memref<18x18x128xbf16, #tpu.memory_space<vmem>>, vector<16x1x128xbf16>
    tpu.vector_store %arg5[%c1, %c0_6, %c0_7], %4 {strides = array<i32>} : memref<18x18x128xbf16, #tpu.memory_space<vmem>>, vector<16x1x128xbf16>,
    %cst_8 = arith.constant 0.000000e+00 : bf16
    %6 = vector.broadcast %cst_8 : bf16 to vector<16x1x128xbf16>
    %c1_9 = arith.constant 1 : index
    %c17_10 = arith.constant 17 : index
    %c0_11 = arith.constant 0 : index
    %7 = vector.load %arg5[%c1_9, %c17_10, %c0_11] : memref<18x18x128xbf16, #tpu.memory_space<vmem>>, vector<16x1x128xbf16>
    tpu.vector_store %arg5[%c1_9, %c17_10, %c0_11], %6 {strides = array<i32>} : memref<18x18x128xbf16, #tpu.memory_space<vmem>>, vector<16x1x128xbf16>,
    %cst_12 = arith.constant 0.000000e+00 : bf16
    %8 = vector.broadcast %cst_12 : bf16 to vector<16x16x124xbf16>
    %c1_13 = arith.constant 1 : index
    %c1_14 = arith.constant 1 : index
    %c4 = arith.constant 4 : index
    %9 = vector.load %arg5[%c1_13, %c1_14, %c4] : memref<18x18x128xbf16, #tpu.memory_space<vmem>>, vector<16x16x124xbf16>
    tpu.vector_store %arg5[%c1_13, %c1_14, %c4], %8 {strides = array<i32>} : memref<18x18x128xbf16, #tpu.memory_space<vmem>>, vector<16x16x124xbf16>,
    %c0_15 = arith.constant 0 : index
    %c0_16 = arith.constant 0 : index
    %c0_17 = arith.constant 0 : index
    %c0_18 = arith.constant 0 : index
    %10 = vector.load %arg1[%c0_15, %c0_16, %c0_17, %c0_18] : memref<1x16x16x4xf32, #tpu.memory_space<vmem>>, vector<1x16x16x4xf32>
    %11 = vector.shape_cast %10 : vector<1x16x16x4xf32> to vector<16x16x4xf32>
    %12 = arith.truncf %11 : vector<16x16x4xf32> to vector<16x16x4xbf16>
    %c1_19 = arith.constant 1 : index
    %c1_20 = arith.constant 1 : index
    %c0_21 = arith.constant 0 : index
    %13 = vector.load %arg5[%c1_19, %c1_20, %c0_21] : memref<18x18x128xbf16, #tpu.memory_space<vmem>>, vector<16x16x4xbf16>
    tpu.vector_store %arg5[%c1_19, %c1_20, %c0_21], %12 {strides = array<i32>} : memref<18x18x128xbf16, #tpu.memory_space<vmem>>, vector<16x16x4xbf16>,
    %c0_22 = arith.constant 0 : index
    %c0_23 = arith.constant 0 : index
    %c0_24 = arith.constant 0 : index
    %14 = vector.load %arg5[%c0_22, %c0_23, %c0_24] : memref<18x18x128xbf16, #tpu.memory_space<vmem>>, vector<16x16x128xbf16>
    %c0_25 = arith.constant 0 : index
    %c1_26 = arith.constant 1 : index
    %c0_27 = arith.constant 0 : index
    %15 = vector.load %arg5[%c0_25, %c1_26, %c0_27] : memref<18x18x128xbf16, #tpu.memory_space<vmem>>, vector<16x16x128xbf16>
    %c0_28 = arith.constant 0 : index
    %c2 = arith.constant 2 : index
    %c0_29 = arith.constant 0 : index
    %16 = vector.load %arg5[%c0_28, %c2, %c0_29] : memref<18x18x128xbf16, #tpu.memory_space<vmem>>, vector<16x16x128xbf16>
    %c1_30 = arith.constant 1 : index
    %c0_31 = arith.constant 0 : index
    %c0_32 = arith.constant 0 : index
    %17 = vector.load %arg5[%c1_30, %c0_31, %c0_32] : memref<18x18x128xbf16, #tpu.memory_space<vmem>>, vector<16x16x128xbf16>
    %c1_33 = arith.constant 1 : index
    %c1_34 = arith.constant 1 : index
    %c0_35 = arith.constant 0 : index
    %18 = vector.load %arg5[%c1_33, %c1_34, %c0_35] : memref<18x18x128xbf16, #tpu.memory_space<vmem>>, vector<16x16x128xbf16>
    %c1_36 = arith.constant 1 : index
    %c2_37 = arith.constant 2 : index
    %c0_38 = arith.constant 0 : index
    %19 = vector.load %arg5[%c1_36, %c2_37, %c0_38] : memref<18x18x128xbf16, #tpu.memory_space<vmem>>, vector<16x16x128xbf16>
    %c2_39 = arith.constant 2 : index
    %c0_40 = arith.constant 0 : index
    %c0_41 = arith.constant 0 : index
    %20 = vector.load %arg5[%c2_39, %c0_40, %c0_41] : memref<18x18x128xbf16, #tpu.memory_space<vmem>>, vector<16x16x128xbf16>
    %c2_42 = arith.constant 2 : index
    %c1_43 = arith.constant 1 : index
    %c0_44 = arith.constant 0 : index
    %21 = vector.load %arg5[%c2_42, %c1_43, %c0_44] : memref<18x18x128xbf16, #tpu.memory_space<vmem>>, vector<16x16x128xbf16>
    %c2_45 = arith.constant 2 : index
    %c2_46 = arith.constant 2 : index
    %c0_47 = arith.constant 0 : index
    %22 = vector.load %arg5[%c2_45, %c2_46, %c0_47] : memref<18x18x128xbf16, #tpu.memory_space<vmem>>, vector<16x16x128xbf16>
    %23 = tpu.concatenate %14, %15, %16, %17, %18, %19, %20, %21, %22 in 2 : vector<16x16x128xbf16>, vector<16x16x128xbf16>, vector<16x16x128xbf16>, vector<16x16x128xbf16>, vector<16x16x128xbf16>, vector<16x16x128xbf16>, vector<16x16x128xbf16>, vector<16x16x128xbf16>, vector<16x16x128xbf16> -> vector<16x16x1152xbf16>
    %24 = vector.shape_cast %23 : vector<16x16x1152xbf16> to vector<256x1152xbf16>
    %c0_48 = arith.constant 0 : index
    %c0_49 = arith.constant 0 : index
    %25 = vector.load %arg2[%c0_48, %c0_49] : memref<1152x128xbf16, #tpu.memory_space<vmem>>, vector<1152x128xbf16>
    %cst_50 = arith.constant dense<0.000000e+00> : vector<256x128xf32>
    %26 = tpu.matmul %24, %25, %cst_50 {dimension_numbers = #tpu.dot_dimension_numbers<[1], [0], [0], [1], [0, 0, 1, 1], [], []>} : vector<256x1152xbf16>, vector<1152x128xbf16>, vector<256x128xf32> -> vector<256x128xf32>
    %c0_51 = arith.constant 0 : index
    %c0_52 = arith.constant 0 : index
    %27 = vector.load %arg3[%c0_51, %c0_52] : memref<1x128xf32, #tpu.memory_space<vmem>>, vector<1x128xf32>
    %28 = vector.broadcast %27 : vector<1x128xf32> to vector<256x128xf32>
    %29 = arith.addf %26, %28 : vector<256x128xf32>
    %30 = arith.negf %29 : vector<256x128xf32>
    %31 = math.exp %30 : vector<256x128xf32>
    %cst_53 = arith.constant 1.000000e+00 : f32
    %32 = vector.broadcast %cst_53 : f32 to vector<256x128xf32>
    %33 = arith.addf %32, %31 : vector<256x128xf32>
    %34 = arith.divf %32, %33 : vector<256x128xf32>
    %35 = arith.mulf %29, %34 : vector<256x128xf32>
    %36 = vector.shape_cast %35 : vector<256x128xf32> to vector<1x16x16x128xf32>
    %c0_54 = arith.constant 0 : index
    %c0_55 = arith.constant 0 : index
    %c0_56 = arith.constant 0 : index
    %c0_57 = arith.constant 0 : index
    %37 = vector.load %arg4[%c0_54, %c0_55, %c0_56, %c0_57] : memref<1x16x16x128xf32, #tpu.memory_space<vmem>>, vector<1x16x16x128xf32>
    tpu.vector_store %arg4[%c0_54, %c0_55, %c0_56, %c0_57], %36 {strides = array<i32>} : memref<1x16x16x128xf32, #tpu.memory_space<vmem>>, vector<1x16x16x128xf32>,
    return
  }
  func.func @transform_0(%arg0: i32) -> (i32, i32, i32, i32) {
    %c0_i32 = arith.constant 0 : i32
    %c0_i32_0 = arith.constant 0 : i32
    %c0_i32_1 = arith.constant 0 : i32
    %c0_i32_2 = arith.constant 0 : i32
    return %arg0, %c0_i32, %c0_i32_0, %c0_i32_1 : i32, i32, i32, i32
  }
  func.func @transform_1(%arg0: i32) -> (i32, i32) {
    %c0_i32 = arith.constant 0 : i32
    %c0_i32_0 = arith.constant 0 : i32
    %c0_i32_1 = arith.constant 0 : i32
    return %c0_i32, %c0_i32_0 : i32, i32
  }
  func.func @transform_2(%arg0: i32) -> (i32, i32) {
    %c0_i32 = arith.constant 0 : i32
    %c0_i32_0 = arith.constant 0 : i32
    %c0_i32_1 = arith.constant 0 : i32
    return %c0_i32, %c0_i32_0 : i32, i32
  }
  func.func @transform_3(%arg0: i32) -> (i32, i32, i32, i32) {
    %c0_i32 = arith.constant 0 : i32
    %c0_i32_0 = arith.constant 0 : i32
    %c0_i32_1 = arith.constant 0 : i32
    %c0_i32_2 = arith.constant 0 : i32
    return %arg0, %c0_i32, %c0_i32_0, %c0_i32_1 : i32, i32, i32, i32
  }
}

</mosaic_0001>

<bundles_post_ra>
// kernel: tpu_custom_call.1
= control target key start
LH: loop header
LB: loop body
LE: loop exit
PB: predicated region body
PF: predicated region fallthrough
CT: control target
= control target key end

     0   :  { %8 = vsyncpa [#allocation4], 0  ;;  %s7650_s0 = inlined_call_operand.vmem [shape: f32[2,16,16,4], index: 0, kind: input, shape index: {}]   ;;  %s7651_s1 = inlined_call_operand.vmem [shape: bf16[1152,128], index: 1, kind: input, shape index: {}]   ;;  %s7652_s2 = inlined_call_operand.vmem [shape: f32[1,128], index: 2, kind: input, shape index: {}]   ;;  %s7653_s3 = inlined_call_operand.hbm [shape: f32[2,16,16,128], index: 3, kind: output, shape index: {}]  }
   0x1   :  { %10 = vsyncpa [#allocation4 + $0x1], 0  ;;  %s5600_s12 = smov 0   ;;  %s5602_s13 = smov 0  }
   0x2   :  { %s5604_s14 = smov 0   ;;  %s5606_s15 = smov 0  }
   0x3 LB: > { %s5621_s16 = sadd.s32 4294967295, %s5574_s15   ;;  %s4270_s17 = sadd.s32 4294967294, %s5574_s15   ;;  %s5574_s15 = sphi %s5606_s15, %s7717_s15   ;;  %s5570_s14 = sphi %s5604_s14, %s7716_s14   ;;  %s5566_s13 = sphi %s5602_s13, %s7715_s13   ;;  %s5562_s12 = sphi %s5600_s12, %s7714_s12  }
   0x4   : > { %s5625_s18 = sadd.s32 1, %s5574_s15   ;;  %s91_s19 = sadd.s32 1, %s5570_s14 }
   0x5   : > { %s88_s20 = ssub.s32 %s5574_s15, %s5625_s18  ;;  %p101_p0 = scmp.ne.s32.totalorder %s5570_s14, %s5566_s13 }
   0x6   : > { %p89_p1 = scmp.eq.s32.totalorder %s88_s20, 0  ;;  %p102_p2 = scmp.eq.s32.totalorder %s5621_s16, 1 }
   0x7   : > { %p107_p3 = scmp.ne.s32.totalorder %s5566_s13, %s5562_s12  ;;  %p108_p4 = scmp.eq.s32.totalorder %s4270_s17, 1 }
   0x8   : > { %s5636_s21 = scalar_select %p89_p1, %s5570_s14, %s91_s19  }
   0x9   : > { %p5638_p5 = por %p102_p2, %p101_p0  ;;  %p5642_p6 = por %p108_p4, %p107_p3 }
   0xa   : > { %p4273_p7 = scmp.ge.s32.totalorder %s5574_s15, 1  ;;  %p140_p8 = scmp.lt.s32.totalorder %s5574_s15, 3 }
   0xc   : > { %p141_p9 = pnand %p4273_p7, %p140_p8 }
   0xe   : > { %144 = sbr.rel (%p141_p9) target bundleno = 648 (0x288), region = 32 }
  0x13   : > { %v5175_v0 = vld [vmem:[%s7651_s1 + $0x78] sm:$0xff]   ;;  %v5576_v2 = vmov 0   ;;  %v5177_v3 = vld [vmem:[%s7651_s1 + $0x70] sm:$0xff]   ;;  %p164_p10 = scmp.lt.s32.totalorder %s5621_s16, 1  ;;  %v5179_v5 = vld [vmem:[%s7651_s1 + $0x68] sm:$0xff]   ;;  %vm279_vm0 = vcmask 1043488  }
  0x14   : > { %v5176_v1 = vld [vmem:[%s7651_s1 + $0x38] sm:$0xff]   ;;  %170 = vst [vmem:[#allocation2] sm:$0xf] %v5576_v2  ;;  %171 = vst [vmem:[#allocation2 + $0x4] sm:$0xf] %v5576_v2  ;;  %4597 = vmatprep.subr.bf16.mxu0 %v5175_v0  ;;  %5117 = vmatprep.subr.bf16.mxu1 %v5175_v0  ;;  %v5178_v4 = vld [vmem:[%s7651_s1 + $0x30] sm:$0xff]  }
  0x15   : > { %172 = vst [vmem:[#allocation2 + $0x8] sm:$0x1] %v5576_v2  ;;  %174 = vst [vmem:[#allocation2 + $0xcc] sm:$0xf] %v5576_v2  ;;  %4598 = vmatpush3.bf16.msra.mxu0 %v5176_v1  ;;  %5125 = vmatpush3.bf16.msra.mxu1 %v5176_v1  ;;  %v5180_v6 = vld [vmem:[%s7651_s1 + $0x28] sm:$0xff]   ;;  %s165_s9 = scalar_select %p164_p10, %s5621_s16, 1 }
  0x16   : > { %175 = vst [vmem:[#allocation2 + $0xd0] sm:$0xf] %v5576_v2  ;;  %176 = vst [vmem:[#allocation2 + $0xd4] sm:$0x1] %v5576_v2  ;;  %4599 = vmatprep.subr.bf16.mxu0 %v5177_v3  ;;  %5118 = vmatprep.subr.bf16.mxu1 %v5177_v3  ;;  %v5181_v7 = vld [vmem:[%s7651_s1 + $0x60] sm:$0xff]   ;;  %v5183_v9 = vld [vmem:[%s7651_s1 + $0x58] sm:$0xff]  }
  0x17   : > { %364 = vst.msk [vmem:[#allocation2 + $0x94] sm:$0xf] %vm279_vm0, %v5576_v2  ;;  %285 = vst.msk [vmem:[#allocation2 + $0x10] sm:$0xf] %vm279_vm0, %v5576_v2  ;;  %v5182_v8 = vld [vmem:[%s7651_s1 + $0x20] sm:$0xff]   ;;  %s4563_s20 = sshll.u32 %s165_s9, 8 }
  0x18   : > { %294 = vst.msk [vmem:[#allocation2 + $0x1c] sm:$0xf] %vm279_vm0, %v5576_v2  ;;  %301 = vst.msk [vmem:[#allocation2 + $0x28] sm:$0xf] %vm279_vm0, %v5576_v2  ;;  %v5184_v10 = vld [vmem:[%s7651_s1 + $0x18] sm:$0xff]   ;;  %s5701_s30 = scalar_lea.vmem %s7650_s0, %s4563_s20  ;;  %v5185_v11 = vld [vmem:[%s7651_s1 + $0x50] sm:$0xff]  }
  0x19   : > { %308 = vst.msk [vmem:[#allocation2 + $0x34] sm:$0xf] %vm279_vm0, %v5576_v2  ;;  %315 = vst.msk [vmem:[#allocation2 + $0x40] sm:$0xf] %vm279_vm0, %v5576_v2  ;;  %4600 = vmatpush3.bf16.msra.mxu0 %v5178_v4  ;;  %5126 = vmatpush3.bf16.msra.mxu1 %v5178_v4  ;;  %vm178_vm1 = vcmask 1040384   ;;  %vm286_vm2 = vcmask 1040416  }
  0x1a   : > { %322 = vst.msk [vmem:[#allocation2 + $0x4c] sm:$0xf] %vm279_vm0, %v5576_v2  ;;  %329 = vst.msk [vmem:[#allocation2 + $0x58] sm:$0xf] %vm279_vm0, %v5576_v2  ;;  %4601 = vmatprep.subr.bf16.mxu0 %v5179_v5  ;;  %5119 = vmatprep.subr.bf16.mxu1 %v5179_v5  ;;  %v418_v16 = vld [vmem:[%s5701_s30 + $0xb0] sm:$0xff]  ;;  %v5187_v25 = vld [vmem:[%s7651_s1 + $0x48] sm:$0xff]  }
  0x1b   : > { %336 = vst.msk [vmem:[#allocation2 + $0x64] sm:$0xf] %vm279_vm0, %v5576_v2  ;;  %343 = vst.msk [vmem:[#allocation2 + $0x70] sm:$0xf] %vm279_vm0, %v5576_v2  ;;  %v963_v12 = vld [vmem:[#allocation2] sm:$0xf]  ;;  %v5709_v18 = vpack.c.bf16 %v418_v16, %v418_v16 }
  0x1c   : > { %350 = vst.msk [vmem:[#allocation2 + $0x7c] sm:$0xf] %vm279_vm0, %v5576_v2  ;;  %357 = vst.msk [vmem:[#allocation2 + $0x88] sm:$0xf] %vm279_vm0, %v5576_v2  ;;  %v964_v13 = vld [vmem:[#allocation2 + $0x4] sm:$0xf] }
  0x1d   : > { %371 = vst.msk [vmem:[#allocation2 + $0xa0] sm:$0xf] %vm279_vm0, %v5576_v2  ;;  %378 = vst.msk [vmem:[#allocation2 + $0xac] sm:$0xf] %vm279_vm0, %v5576_v2  ;;  %4602 = vmatpush3.bf16.msra.mxu0 %v5180_v6  ;;  %5127 = vmatpush3.bf16.msra.mxu1 %v5180_v6  ;;  %v5706_v14 = vcombine.low %v963_v12, %v964_v13  ;;  %vm179_vm3 = vsmask.f32 256 }
  0x1e   : > { %385 = vst.msk [vmem:[#allocation2 + $0xb8] sm:$0xf] %vm279_vm0, %v5576_v2  ;;  %392 = vst.msk [vmem:[#allocation2 + $0xc4] sm:$0xf] %vm279_vm0, %v5576_v2  ;;  %4603 = vmatprep.subr.bf16.mxu0 %v5181_v7  ;;  %5120 = vmatprep.subr.bf16.mxu1 %v5181_v7  ;;  %v214_v17 = vld [vmem:[#allocation2 + $0x90] sm:$0x1] }
  0x1f   : > { %v5192_v15 = vld [vmem:[#allocation2 + $0x8] ss:$0 sps:$4 sm:$0x11]   ;;  %vm229_vm4 = vsmask.f32 7938  ;;  %v5186_v19 = vld [vmem:[%s7651_s1 + $0x10] sm:$0xff]   ;;  %vm5718_vm5 = vmand %vm178_vm1, %vm179_vm3 }
  0x20   : > { %v1302_v20 = vshrl.u32 %v5706_v14, 16  ;;  %v1304_v21 = vshll.u32 %v5706_v14, 16  ;;  %v1309_v22 = vshll.u32 %v5192_v15, 16  ;;  %v264_v24 = vld [vmem:[#allocation2 + $0x98] sm:$0x1]  ;;  %v215_v26 = vsel %vm5718_vm5, 0, %v214_v17  ;;  %vm5729_vm7 = vmand %vm178_vm1, %vm229_vm4 }
  0x21   : > { %4604 = vmatpush3.bf16.msra.mxu0 %v5182_v8  ;;  %5128 = vmatpush3.bf16.msra.mxu1 %v5182_v8  ;;  %vm1300_vm6 = vsmask.f32 7424  ;;  %v419_v28 = vld [vmem:[%s5701_s30 + $0xb8] sm:$0xff]  ;;  %v714_v29 = vshrl.u32 %v5709_v18, 16  ;;  %216 = vst [vmem:[#allocation2 + $0x90] sm:$0x1] %v215_v26  ;;  %vm5752_vm9 = vmand %vm279_vm0, %vm229_vm4 }
  0x22   : > { %4605 = vmatprep.subr.bf16.mxu0 %v5183_v9  ;;  %5121 = vmatprep.subr.bf16.mxu1 %v5183_v9  ;;  %v1306_v30 = vrot.slane %v1304_v21, 1  ;;  %v1311_v31 = vrot.slane %v1309_v22, 1  ;;  %v265_v32 = vsel %vm5729_vm7, 0, %v264_v24  ;;  %v4587_v33 = vpack.c.bf16 %v419_v28, %v419_v28  ;;  %v5188_v34 = vld [vmem:[%s7651_s1 + $0x8] sm:$0xff]   ;;  %v5189_v39 = vld [vmem:[%s7651_s1 + $0x40] sm:$0xff]   ;;  %v5195_v52 = vld [vmem:[%s7651_s1 + $0xf8] sm:$0xff]  }
  0x23   : > { %266 = vst [vmem:[#allocation2 + $0x98] sm:$0x1] %v265_v32  ;;  %v5740_v35 = vrot.slane %v714_v29, 7  ;;  %vm524_vm8 = vsmask.f32 4368  ;;  %v5190_v43 = vld [vmem:[%s7651_s1] sm:$0xff]   ;;  %vm5777_vm11 = vmand %vm286_vm2, %vm179_vm3 }
  0x24   : > { %v1307_v36 = vor.u32 %v1306_v30, %v1302_v20  ;;  %v722_v37 = vshrl.u32 %v4587_v33, 16  ;;  %v725_v38 = vshll.u32 %v4587_v33, 16  ;;  %v181_v41 = vld [vmem:[#allocation2 + $0xc] sm:$0x1]  ;;  %v231_v42 = vld [vmem:[#allocation2 + $0x14] sm:$0x1]  ;;  %vm5766_vm10 = vmor %vm179_vm3, %vm524_vm8 }
  0x25   : > { %4606 = vmatpush3.bf16.msra.mxu0 %v5184_v10  ;;  %5129 = vmatpush3.bf16.msra.mxu1 %v5184_v10  ;;  %v720_v40 = vrot.slane %v5740_v35, 4  ;;  %v182_v47 = vsel %vm5718_vm5, 0, %v181_v41  ;;  %v232_v48 = vsel %vm5729_vm7, 0, %v231_v42  ;;  %v396_v49 = vld [vmem:[%s5701_s30] sm:$0xff]  ;;  %v397_v50 = vld [vmem:[%s5701_s30 + $0x8] sm:$0xff]  ;;  %vm846_vm12 = vcmask 27648  }
  0x26   : > { %4607 = vmatprep.subr.bf16.mxu0 %v5185_v11  ;;  %5122 = vmatprep.subr.bf16.mxu1 %v5185_v11  ;;  %v1312_v44 = vsel %vm1300_vm6, %v1307_v36, %v1311_v31  ;;  %v5756_v46 = vrot.slane %v722_v37, 7  ;;  %183 = vst [vmem:[#allocation2 + $0xc] sm:$0x1] %v182_v47  ;;  %233 = vst [vmem:[#allocation2 + $0x14] sm:$0x1] %v232_v48  ;;  %v5773_v53 = vpack.c.bf16 %v396_v49, %v396_v49  ;;  %vm853_vm13 = vcmask 24576  }
  0x27   : > { %3165 = vmatprep.mubr.bf16.mxu0 %v1312_v44  ;;  %v4565_v54 = vpack.c.bf16 %v397_v50, %v397_v50  ;;  %v5200_v61 = vld [vmem:[%s7651_s1 + $0x178] sm:$0xff]   ;;  %v717_v0 = vshll.u32 %v5709_v18, 16  ;;  %v267_v10 = vld [vmem:[#allocation2 + $0xa4] sm:$0x1]  ;;  %v421_v12 = vld [vmem:[%s5701_s30 + $0xc8] sm:$0xff]  ;;  %vm1557_vm0 = vcmask 1046528  }
  0x28   : > { %v727_v56 = vor.u32 %v725_v38, %v5756_v46  ;;  %v361_v57 = vld [vmem:[#allocation2 + $0x90] sm:$0xf]  ;;  %v527_v58 = vshrl.u32 %v5773_v53, 16  ;;  %v5202_v5 = vld [vmem:[%s7651_s1 + $0x138] sm:$0xff]   ;;  %v729_v7 = vrot.slane %v5756_v46, 4  ;;  %v420_v11 = vld [vmem:[%s5701_s30 + $0xc0] sm:$0xff] }
  0x29   : > { %4608 = vmatpush3.bf16.msra.mxu0 %v5186_v19  ;;  %5130 = vmatpush3.bf16.msra.mxu1 %v5186_v19  ;;  %v535_v59 = vshrl.u32 %v4565_v54, 16  ;;  %v538_v60 = vshll.u32 %v4565_v54, 16  ;;  %v362_v62 = vsel %vm5752_vm9, 0, %v361_v57  ;;  %v217_v6 = vld [vmem:[#allocation2 + $0x9c] sm:$0x1]  ;;  %v268_v17 = vsel %vm5729_vm7, 0, %v267_v10  ;;  %vm5813_vm14 = vmand %vm846_vm12, %vm229_vm4 }
  0x2a   : > { %4609 = vmatprep.subr.bf16.mxu0 %v5187_v25  ;;  %5123 = vmatprep.subr.bf16.mxu1 %v5187_v25  ;;  %v365_v63 = vld [vmem:[#allocation2 + $0x98] sm:$0x1]  ;;  %v728_v1 = vsel %vm5766_vm10, %v720_v40, %v727_v56  ;;  %363 = vst [vmem:[#allocation2 + $0x90] sm:$0xf] %v362_v62  ;;  %v529_v3 = vrot.slane %v527_v58, 7  ;;  %v218_v16 = vsel %vm5718_vm5, 0, %v217_v6  ;;  %v5807_v18 = vpack.c.bf16 %v420_v11, %v420_v11  ;;  %vm5825_vm15 = vmand %vm853_vm13, %vm179_vm3 }
  0x2b   : > { %v366_v2 = vsel %vm5777_vm11, 0, %v365_v63  ;;  %931 = vst.msk [vmem:[#allocation2 + $0x94] sm:$0xf] %vm846_vm12, %v728_v1  ;;  %v5794_v4 = vrot.slane %v535_v59, 7  ;;  %v4589_v19 = vpack.c.bf16 %v421_v12, %v421_v12  ;;  %v719_v20 = vor.u32 %v717_v0, %v5740_v35  ;;  %219 = vst [vmem:[#allocation2 + $0x9c] sm:$0x1] %v218_v16 }
  0x2c   : > { %367 = vst [vmem:[#allocation2 + $0x98] sm:$0x1] %v366_v2  ;;  %v533_v8 = vrot.slane %v529_v3, 4  ;;  %269 = vst [vmem:[#allocation2 + $0xa4] sm:$0x1] %v268_v17  ;;  %v530_v26 = vshll.u32 %v5773_v53, 16 }
  0x2d   : > { %4610 = vmatpush3.bf16.msra.mxu0 %v5188_v34  ;;  %5131 = vmatpush3.bf16.msra.mxu1 %v5188_v34  ;;  %v540_v9 = vor.u32 %v538_v60, %v5794_v4  ;;  %v281_v13 = vld [vmem:[#allocation2 + $0xc] sm:$0xf]  ;;  %v288_v15 = vld [vmem:[#allocation2 + $0x14] sm:$0x1]  ;;  %v731_v28 = vshrl.u32 %v5807_v18, 16  ;;  %v739_v29 = vshrl.u32 %v4589_v19, 16 }
  0x2e   : > { %4611 = vmatprep.subr.bf16.mxu0 %v5189_v39  ;;  %5124 = vmatprep.subr.bf16.mxu1 %v5189_v39  ;;  %v282_v22 = vsel %vm5752_vm9, 0, %v281_v13  ;;  %v289_v24 = vsel %vm5777_vm11, 0, %v288_v15  ;;  %v742_v30 = vshll.u32 %v4589_v19, 16  ;;  %v184_v31 = vld [vmem:[#allocation2 + $0x18] sm:$0x1]  ;;  %v542_v33 = vrot.slane %v5794_v4, 4 }
  0x2f   : > { %v541_v25 = vsel %vm5766_vm10, %v533_v8, %v540_v9  ;;  %283 = vst [vmem:[#allocation2 + $0xc] sm:$0xf] %v282_v22  ;;  %290 = vst [vmem:[#allocation2 + $0x14] sm:$0x1] %v289_v24  ;;  %v733_v34 = vrot.slane %v731_v28, 7  ;;  %v5833_v35 = vrot.slane %v739_v29, 7  ;;  %v532_v42 = vor.u32 %v530_v26, %v529_v3 }
  0x30   : > { %852 = vst.msk [vmem:[#allocation2 + $0x10] sm:$0xf] %vm846_vm12, %v541_v25  ;;  %v185_v38 = vsel %vm5718_vm5, 0, %v184_v31  ;;  %v234_v39 = vld [vmem:[#allocation2 + $0x20] sm:$0x1]  ;;  %v398_v40 = vld [vmem:[%s5701_s30 + $0x10] sm:$0xff] }
  0x31   : > { %4612 = vmatpush3.bf16.msra.mxu0 %v5190_v43  ;;  %5132 = vmatpush3.bf16.msra.mxu1 %v5190_v43  ;;  %v928_v32 = vld [vmem:[#allocation2 + $0x90] sm:$0xf]  ;;  %v737_v43 = vrot.slane %v733_v34, 4  ;;  %v744_v44 = vor.u32 %v742_v30, %v5833_v35  ;;  %186 = vst [vmem:[#allocation2 + $0x18] sm:$0x1] %v185_v38  ;;  %v399_v46 = vld [vmem:[%s5701_s30 + $0x18] sm:$0xff]  ;;  %v5847_v49 = vpack.c.bf16 %v398_v40, %v398_v40 }
  0x32   : > { %4709 = vmatprep.subr.bf16.mxu1 %v5195_v52  ;;  %4821 = vmatprep.subr.bf16.mxu0 %v5200_v61  ;;  %v929_v36 = vsel %vm5813_vm14, %v719_v20, %v928_v32  ;;  %v734_v47 = vshll.u32 %v5807_v18, 16  ;;  %v235_v48 = vsel %vm5729_vm7, 0, %v234_v39  ;;  %v4567_v50 = vpack.c.bf16 %v399_v46, %v399_v46  ;;  %v368_v52 = vld [vmem:[#allocation2 + $0x9c] sm:$0xf]  ;;  %v988_v56 = vld [vmem:[#allocation2 + $0x94] sm:$0xf] }
  0x33   : > { %v932_v37 = vld [vmem:[#allocation2 + $0x98] sm:$0x1]  ;;  %930 = vst [vmem:[#allocation2 + $0x90] sm:$0xf] %v929_v36  ;;  %v372_v53 = vld [vmem:[#allocation2 + $0xa4] sm:$0x1]  ;;  %v745_v54 = vsel %vm5766_vm10, %v737_v43, %v744_v44 }
  0x34   : > { %3166 = vmatmul.mubr.bf16.vlgmr.msra.gmra.mxu0 %v5706_v14  ;;  %v933_v41 = vsel %vm5825_vm15, %v729_v7, %v932_v37  ;;  %236 = vst [vmem:[#allocation2 + $0x20] sm:$0x1] %v235_v48  ;;  %938 = vst.msk [vmem:[#allocation2 + $0xa0] sm:$0xf] %vm846_vm12, %v745_v54  ;;  %v369_v61 = vsel %vm5752_vm9, 0, %v368_v52  ;;  %v373_v62 = vsel %vm5777_vm11, 0, %v372_v53  ;;  %v736_v18 = vor.u32 %v734_v47, %v733_v34 }
  0x35   : > { %4822 = vmatpush3.bf16.msra.mxu0 %v5202_v5  ;;  %934 = vst [vmem:[#allocation2 + $0x98] sm:$0x1] %v933_v41  ;;  %v220_v63 = vld [vmem:[#allocation2 + $0xa8] sm:$0x1]  ;;  %v270_v0 = vld [vmem:[#allocation2 + $0xb0] sm:$0x1] }
  0x36   : > { %v848_v57 = vld [vmem:[#allocation2 + $0xc] sm:$0xf]  ;;  %v855_v58 = vld [vmem:[#allocation2 + $0x14] sm:$0x1]  ;;  %370 = vst [vmem:[#allocation2 + $0x9c] sm:$0xf] %v369_v61 }
  0x37   : > { %v849_v59 = vsel %vm5813_vm14, %v532_v42, %v848_v57  ;;  %v856_v60 = vsel %vm5825_vm15, %v542_v33, %v855_v58  ;;  %374 = vst [vmem:[#allocation2 + $0xa4] sm:$0x1] %v373_v62  ;;  %v746_v1 = vrot.slane %v5833_v35, 4  ;;  %v544_v2 = vshrl.u32 %v5847_v49, 16  ;;  %v422_v5 = vld [vmem:[%s5701_s30 + $0xd0] sm:$0xff]  ;;  %v423_v6 = vld [vmem:[%s5701_s30 + $0xd8] sm:$0xff] }
  0x38   : > { %850 = vst [vmem:[#allocation2 + $0xc] sm:$0xf] %v849_v59  ;;  %857 = vst [vmem:[#allocation2 + $0x14] sm:$0x1] %v856_v60  ;;  %v552_v3 = vshrl.u32 %v4567_v50, 16  ;;  %v555_v4 = vshll.u32 %v4567_v50, 16  ;;  %v5870_v13 = vpack.c.bf16 %v422_v5, %v422_v5  ;;  %v5872_v15 = vpack.c.bf16 %v423_v6, %v423_v6 }
  0x39   : > { %v221_v7 = vsel %vm5718_vm5, 0, %v220_v63  ;;  %v271_v8 = vsel %vm5729_vm7, 0, %v270_v0  ;;  %v291_v10 = vld [vmem:[#allocation2 + $0x18] sm:$0xf]  ;;  %v546_v11 = vrot.slane %v544_v2, 7  ;;  %v547_v22 = vshll.u32 %v5847_v49, 16 }
  0x3a   : > { %v987_v9 = vld [vmem:[#allocation2 + $0x90] sm:$0xf]  ;;  %v5868_v12 = vrot.slane %v552_v3, 7  ;;  %222 = vst [vmem:[#allocation2 + $0xa8] sm:$0x1] %v221_v7  ;;  %v292_v19 = vsel %vm5752_vm9, 0, %v291_v10 }
  0x3b   : > { %272 = vst [vmem:[#allocation2 + $0xb0] sm:$0x1] %v271_v8  ;;  %v4321_v16 = vcombine.low %v987_v9, %v988_v56  ;;  %293 = vst [vmem:[#allocation2 + $0x18] sm:$0xf] %v292_v19  ;;  %v295_v20 = vld [vmem:[#allocation2 + $0x20] sm:$0x1]  ;;  %v549_v46 = vor.u32 %v547_v22, %v546_v11 }
  0x3c   : > { %v5194_v17 = vld [vmem:[#allocation2 + $0x98] ss:$0 sps:$4 sm:$0x11]   ;;  %v550_v24 = vrot.slane %v546_v11, 4  ;;  %v557_v25 = vor.u32 %v555_v4, %v5868_v12  ;;  %v559_v26 = vrot.slane %v5868_v12, 4  ;;  %v5214_v28 = vld [vmem:[%s7651_s1 + $0x170] sm:$0xff]  }
  0x3d   : > { %v1446_v29 = vshrl.u32 %v4321_v16, 16  ;;  %v1448_v30 = vshll.u32 %v4321_v16, 16  ;;  %v1453_v31 = vshll.u32 %v5194_v17, 16  ;;  %v5882_v32 = vld [vmem:[#allocation2 + $0x10] sm:$0xf]  ;;  %v296_v33 = vsel %vm5777_vm11, 0, %v295_v20  ;;  %4823 = vmatprep.subr.bf16.mxu0 %v5214_v28 }
  0x3e   : > { %297 = vst [vmem:[#allocation2 + $0x20] sm:$0x1] %v296_v33  ;;  %v558_v34 = vsel %vm5766_vm10, %v550_v24, %v557_v25  ;;  %v748_v35 = vshrl.u32 %v5870_v13, 16  ;;  %v751_v36 = vshll.u32 %v5870_v13, 16  ;;  %v756_v37 = vshrl.u32 %v5872_v15, 16  ;;  %v5196_v41 = vld [vmem:[%s7651_s1 + $0xb8] sm:$0xff]  }
  0x3f   : > { %v1450_v38 = vrot.slane %v1448_v30, 1  ;;  %v1455_v39 = vrot.slane %v1453_v31, 1  ;;  %v965_v40 = vld [vmem:[#allocation2 + $0xc] sm:$0xf]  ;;  %861 = vst.msk [vmem:[#allocation2 + $0x1c] sm:$0xf] %vm846_vm12, %v558_v34 }
  0x40   : > { %v5896_v42 = vcombine.low %v965_v40, %v5882_v32  ;;  %v5898_v43 = vld [vmem:[#allocation2 + $0x14] ss:$0 sps:$4 sm:$0x11]   ;;  %v935_v44 = vld [vmem:[#allocation2 + $0x9c] sm:$0xf]  ;;  %v750_v47 = vrot.slane %v748_v35, 7 }
  0x41   : > { %v1451_v48 = vor.u32 %v1450_v38, %v1446_v29  ;;  %v5199_v49 = vld [vmem:[%s7651_s1 + $0xf0] sm:$0xff]   ;;  %v936_v50 = vsel %vm5813_vm14, %v736_v18, %v935_v44  ;;  %v939_v52 = vld [vmem:[#allocation2 + $0xa4] sm:$0x1]  ;;  %v375_v53 = vld [vmem:[#allocation2 + $0xa8] sm:$0xf]  ;;  %v1321_v58 = vshll.u32 %v5898_v43, 16 }
  0x42   : > { %v379_v54 = vld [vmem:[#allocation2 + $0xb0] sm:$0x1]  ;;  %v1314_v56 = vshrl.u32 %v5896_v42, 16  ;;  %v1316_v57 = vshll.u32 %v5896_v42, 16  ;;  %937 = vst [vmem:[#allocation2 + $0x9c] sm:$0xf] %v936_v50  ;;  %v940_v59 = vsel %vm5825_vm15, %v746_v1, %v939_v52  ;;  %v753_v28 = vor.u32 %v751_v36, %v750_v47 }
  0x43   : > { %v5216_v60 = vld [vmem:[%s7651_s1 + $0x130] sm:$0xff]   ;;  %v1456_v61 = vsel %vm1300_vm6, %v1451_v48, %v1455_v39  ;;  %941 = vst [vmem:[#allocation2 + $0xa4] sm:$0x1] %v940_v59  ;;  %v858_v62 = vld [vmem:[#allocation2 + $0x18] sm:$0xf]  ;;  %v376_v63 = vsel %vm5752_vm9, 0, %v375_v53 }
  0x44   : > { %v380_v0 = vsel %vm5777_vm11, 0, %v379_v54  ;;  %3261 = vmatprep.mubr.bf16.mxu1 %v1456_v61  ;;  %v1318_v2 = vrot.slane %v1316_v57, 1  ;;  %v1323_v3 = vrot.slane %v1321_v58, 1  ;;  %v5201_v1 = vld [vmem:[%s7651_s1 + $0xb0] sm:$0xff]   ;;  %v859_v4 = vsel %vm5813_vm14, %v549_v46, %v858_v62  ;;  %377 = vst [vmem:[#allocation2 + $0xa8] sm:$0xf] %v376_v63  ;;  %4824 = vmatpush3.bf16.msra.mxu0 %v5216_v60 }
  0x45   : > { %381 = vst [vmem:[#allocation2 + $0xb0] sm:$0x1] %v380_v0  ;;  %v754_v5 = vrot.slane %v750_v47, 4  ;;  %v400_v6 = vld [vmem:[%s5701_s30 + $0x20] sm:$0xff]  ;;  %3262 = vmatmul.mubr.bf16.vlgmr.msra.gmra.mxu1 %v4321_v16  ;;  %860 = vst [vmem:[#allocation2 + $0x18] sm:$0xf] %v859_v4 }
  0x46   : > { %v862_v7 = vld [vmem:[#allocation2 + $0x20] sm:$0x1]  ;;  %v758_v8 = vrot.slane %v756_v37, 7  ;;  %v759_v9 = vshll.u32 %v5872_v15, 16  ;;  %v5925_v10 = vpack.c.bf16 %v400_v6, %v400_v6  ;;  %4710 = vmatpush3.bf16.msra.mxu1 %v5196_v41  ;;  %v1319_v11 = vor.u32 %v1318_v2, %v1314_v56  ;;  %v187_v17 = vld [vmem:[#allocation2 + $0x24] sm:$0x1] }
  0x47   : > { %v990_v12 = vld [vmem:[#allocation2 + $0xa0] sm:$0xf]  ;;  %v863_v13 = vsel %vm5825_vm15, %v559_v26, %v862_v7  ;;  %4711 = vmatprep.subr.bf16.mxu1 %v5199_v49  ;;  %v5205_v16 = vld [vmem:[%s7651_s1 + $0xe8] sm:$0xff]   ;;  %v188_v19 = vsel %vm5718_vm5, 0, %v187_v17  ;;  %v5940_v26 = vld [vmem:[#allocation2 + $0x1c] sm:$0xf] }
  0x48   : > { %864 = vst [vmem:[#allocation2 + $0x20] sm:$0x1] %v863_v13  ;;  %v761_v18 = vor.u32 %v759_v9, %v758_v8  ;;  %v237_v15 = vld [vmem:[#allocation2 + $0x2c] sm:$0x1]  ;;  %v561_v22 = vshrl.u32 %v5925_v10, 16  ;;  %v1324_v24 = vsel %vm1300_vm6, %v1319_v11, %v1323_v3  ;;  %v5209_v33 = vld [vmem:[%s7651_s1 + $0xe0] sm:$0xff]  }
  0x49   : > { %v401_v20 = vld [vmem:[%s5701_s30 + $0x28] sm:$0xff]  ;;  %189 = vst [vmem:[#allocation2 + $0x24] sm:$0x1] %v188_v19  ;;  %v238_v29 = vsel %vm5729_vm7, 0, %v237_v15  ;;  %3173 = vmatprep.mubr.bf16.mxu0 %v1324_v24  ;;  %v989_v31 = vld [vmem:[#allocation2 + $0x9c] sm:$0xf] }
  0x4a   : > { %v5206_v25 = vld [vmem:[%s7651_s1 + $0xa8] sm:$0xff]   ;;  %v4569_v30 = vpack.c.bf16 %v401_v20, %v401_v20  ;;  %v762_v34 = vsel %vm5766_vm10, %v754_v5, %v761_v18  ;;  %v763_v35 = vrot.slane %v758_v8, 4  ;;  %239 = vst [vmem:[#allocation2 + $0x2c] sm:$0x1] %v238_v29  ;;  %v5949_v37 = vrot.slane %v561_v22, 7  ;;  %3174 = vmatmul.mubr.bf16.gmra.mxu0 %v5896_v42  ;;  %4712 = vmatpush3.bf16.msra.mxu1 %v5201_v1  ;;  %v5210_v42 = vld [vmem:[%s7651_s1 + $0xa0] sm:$0xff]  }
  0x4b   : > { %v4322_v36 = vcombine.low %v989_v31, %v990_v12  ;;  %v5204_v38 = vld [vmem:[#allocation2 + $0xa4] ss:$0 sps:$4 sm:$0x11]   ;;  %945 = vst.msk [vmem:[#allocation2 + $0xac] sm:$0xf] %vm846_vm12, %v762_v34  ;;  %4713 = vmatprep.subr.bf16.mxu1 %v5205_v16  ;;  %v5213_v56 = vld [vmem:[%s7651_s1 + $0xd8] sm:$0xff]  }
  0x4c   : > { %v569_v39 = vshrl.u32 %v4569_v30, 16  ;;  %v942_v40 = vld [vmem:[#allocation2 + $0xa8] sm:$0xf]  ;;  %v946_v41 = vld [vmem:[#allocation2 + $0xb0] sm:$0x1]  ;;  %v567_v44 = vrot.slane %v5949_v37, 4 }
  0x4d   : > { %v572_v46 = vshll.u32 %v4569_v30, 16  ;;  %v1458_v47 = vshrl.u32 %v4322_v36, 16  ;;  %v1460_v48 = vshll.u32 %v4322_v36, 16  ;;  %v1465_v49 = vshll.u32 %v5204_v38, 16  ;;  %v967_v50 = vld [vmem:[#allocation2 + $0x18] sm:$0xf] }
  0x4e   : > { %v943_v52 = vsel %vm5813_vm14, %v753_v28, %v942_v40  ;;  %v5960_v53 = vcombine.low %v967_v50, %v5940_v26  ;;  %v947_v54 = vsel %vm5825_vm15, %v763_v35, %v946_v41  ;;  %v5967_v57 = vrot.slane %v569_v39, 7  ;;  %v223_v58 = vld [vmem:[#allocation2 + $0xb4] sm:$0x1]  ;;  %v424_v59 = vld [vmem:[%s5701_s30 + $0xe0] sm:$0xff]  ;;  %4714 = vmatpush3.bf16.msra.mxu1 %v5206_v25  ;;  %v425_v63 = vld [vmem:[%s5701_s30 + $0xe8] sm:$0xff]  ;;  %s161_s10 = sand.u32 1, %s5566_s13  }
  0x4f   : > { %944 = vst [vmem:[#allocation2 + $0xa8] sm:$0xf] %v943_v52  ;;  %v1462_v60 = vrot.slane %v1460_v48, 1  ;;  %v1467_v61 = vrot.slane %v1465_v49, 1  ;;  %948 = vst [vmem:[#allocation2 + $0xb0] sm:$0x1] %v947_v54  ;;  %v5973_v0 = vpack.c.bf16 %v424_v59, %v424_v59  ;;  %4715 = vmatprep.subr.bf16.mxu1 %v5209_v33  ;;  %v4593_v12 = vpack.c.bf16 %v425_v63, %v425_v63 }
  0x50   : > { %v224_v62 = vsel %vm5718_vm5, 0, %v223_v58  ;;  %v5975_v2 = vld [vmem:[#allocation2 + $0x20] ss:$0 sps:$4 sm:$0x11]   ;;  %v1326_v3 = vshrl.u32 %v5960_v53, 16  ;;  %v1328_v1 = vshll.u32 %v5960_v53, 16  ;;  %v574_v5 = vor.u32 %v572_v46, %v5967_v57 }
  0x51   : > { %v564_v4 = vshll.u32 %v5925_v10, 16  ;;  %225 = vst [vmem:[#allocation2 + $0xb4] sm:$0x1] %v224_v62  ;;  %v1463_v6 = vor.u32 %v1462_v60, %v1458_v47  ;;  %v5215_v7 = vld [vmem:[%s7651_s1 + $0x98] sm:$0xff]   ;;  %v298_v8 = vld [vmem:[#allocation2 + $0x24] sm:$0xf] }
  0x52   : > { %v302_v9 = vld [vmem:[#allocation2 + $0x2c] sm:$0x1]  ;;  %v273_v11 = vld [vmem:[#allocation2 + $0xbc] sm:$0x1]  ;;  %v1330_v13 = vrot.slane %v1328_v1, 1  ;;  %v1333_v17 = vshll.u32 %v5975_v2, 16  ;;  %4716 = vmatpush3.bf16.msra.mxu1 %v5210_v42  ;;  %v575_v15 = vsel %vm5766_vm10, %v567_v44, %v574_v5 }
  0x53   : > { %v992_v16 = vld [vmem:[#allocation2 + $0xac] sm:$0xf]  ;;  %v299_v18 = vsel %vm5752_vm9, 0, %v298_v8  ;;  %v303_v10 = vsel %vm5777_vm11, 0, %v302_v9  ;;  %v1468_v19 = vsel %vm1300_vm6, %v1463_v6, %v1467_v61  ;;  %v274_v20 = vsel %vm5729_vm7, 0, %v273_v11  ;;  %4717 = vmatprep.subr.bf16.mxu1 %v5213_v56  ;;  %v5219_v29 = vld [vmem:[%s7651_s1 + $0xd0] sm:$0xff]  }
  0x54   : > { %300 = vst [vmem:[#allocation2 + $0x24] sm:$0xf] %v299_v18  ;;  %304 = vst [vmem:[#allocation2 + $0x2c] sm:$0x1] %v303_v10  ;;  %v765_v22 = vshrl.u32 %v5973_v0, 16  ;;  %3269 = vmatprep.mubr.bf16.mxu1 %v1468_v19  ;;  %v1331_v24 = vor.u32 %v1330_v13, %v1326_v3  ;;  %v1335_v25 = vrot.slane %v1333_v17, 1  ;;  %v566_v44 = vor.u32 %v564_v4, %v5949_v37 }
  0x55   : > { %v576_v28 = vrot.slane %v5967_v57, 4  ;;  %868 = vst.msk [vmem:[#allocation2 + $0x28] sm:$0xf] %vm846_vm12, %v575_v15  ;;  %275 = vst [vmem:[#allocation2 + $0xbc] sm:$0x1] %v274_v20  ;;  %v773_v30 = vshrl.u32 %v4593_v12, 16  ;;  %3270 = vmatmul.mubr.bf16.gmra.mxu1 %v4322_v36 }
  0x56   : > { %v991_v31 = vld [vmem:[#allocation2 + $0xa8] sm:$0xf]  ;;  %v5220_v33 = vld [vmem:[%s7651_s1 + $0x90] sm:$0xff]   ;;  %v767_v34 = vrot.slane %v765_v22, 7  ;;  %v776_v35 = vshll.u32 %v4593_v12, 16  ;;  %v1336_v38 = vsel %vm1300_vm6, %v1331_v24, %v1335_v25  ;;  %4718 = vmatpush3.bf16.msra.mxu1 %v5215_v7  ;;  %v768_v37 = vshll.u32 %v5973_v0, 16 }
  0x57   : > { %v4323_v39 = vcombine.low %v991_v31, %v992_v16  ;;  %v5212_v40 = vld [vmem:[#allocation2 + $0xb0] ss:$0 sps:$4 sm:$0x11]   ;;  %v6004_v41 = vrot.slane %v773_v30, 7  ;;  %3181 = vmatprep.mubr.bf16.mxu0 %v1336_v38  ;;  %v5223_v47 = vld [vmem:[%s7651_s1 + $0xc8] sm:$0xff]   ;;  %4719 = vmatprep.subr.bf16.mxu1 %v5219_v29  ;;  %v403_v59 = vld [vmem:[%s5701_s30 + $0x38] sm:$0xff] }
  0x58   : > { %v382_v46 = vld [vmem:[#allocation2 + $0xb4] sm:$0xf]  ;;  %v771_v36 = vrot.slane %v767_v34, 4  ;;  %v190_v48 = vld [vmem:[#allocation2 + $0x30] sm:$0x1]  ;;  %3182 = vmatmul.mubr.bf16.gmra.mxu0 %v5960_v53  ;;  %v1477_v42 = vshll.u32 %v5212_v40, 16  ;;  %v4571_v1 = vpack.c.bf16 %v403_v59, %v403_v59  ;;  %v770_v17 = vor.u32 %v768_v37, %v767_v34 }
  0x59   : > { %v1470_v49 = vshrl.u32 %v4323_v39, 16  ;;  %v1472_v50 = vshll.u32 %v4323_v39, 16  ;;  %v383_v52 = vsel %vm5752_vm9, 0, %v382_v46  ;;  %v240_v54 = vld [vmem:[#allocation2 + $0x38] sm:$0x1]  ;;  %v778_v56 = vor.u32 %v776_v35, %v6004_v41  ;;  %v402_v53 = vld [vmem:[%s5701_s30 + $0x30] sm:$0xff] }
  0x5a   : > { %384 = vst [vmem:[#allocation2 + $0xb4] sm:$0xf] %v383_v52  ;;  %v191_v57 = vsel %vm5718_vm5, 0, %v190_v48  ;;  %v241_v58 = vsel %vm5729_vm7, 0, %v240_v54  ;;  %v1479_v61 = vrot.slane %v1477_v42, 1  ;;  %v6021_v3 = vpack.c.bf16 %v402_v53, %v402_v53  ;;  %4720 = vmatpush3.bf16.msra.mxu1 %v5220_v33  ;;  %v5224_v7 = vld [vmem:[%s7651_s1 + $0x88] sm:$0xff]  }
  0x5b   : > { %v1474_v60 = vrot.slane %v1472_v50, 1  ;;  %v865_v62 = vld [vmem:[#allocation2 + $0x24] sm:$0xf]  ;;  %v869_v63 = vld [vmem:[#allocation2 + $0x2c] sm:$0x1]  ;;  %v779_v6 = vsel %vm5766_vm10, %v771_v36, %v778_v56  ;;  %4721 = vmatprep.subr.bf16.mxu1 %v5223_v47  ;;  %v586_v16 = vshrl.u32 %v4571_v1, 16 }
  0x5c   : > { %192 = vst [vmem:[#allocation2 + $0x30] sm:$0x1] %v191_v57  ;;  %242 = vst [vmem:[#allocation2 + $0x38] sm:$0x1] %v241_v58  ;;  %v866_v0 = vsel %vm5813_vm14, %v566_v44, %v865_v62  ;;  %v870_v4 = vsel %vm5825_vm15, %v576_v28, %v869_v63  ;;  %v386_v5 = vld [vmem:[#allocation2 + $0xbc] sm:$0x1] }
  0x5d   : > { %v1475_v8 = vor.u32 %v1474_v60, %v1470_v49  ;;  %867 = vst [vmem:[#allocation2 + $0x24] sm:$0xf] %v866_v0  ;;  %871 = vst [vmem:[#allocation2 + $0x2c] sm:$0x1] %v870_v4  ;;  %v387_v9 = vsel %vm5777_vm11, 0, %v386_v5  ;;  %v578_v11 = vshrl.u32 %v6021_v3, 16 }
  0x5e   : > { %952 = vst.msk [vmem:[#allocation2 + $0xb8] sm:$0xf] %vm846_vm12, %v779_v6  ;;  %v5227_v12 = vld [vmem:[%s7651_s1 + $0xc0] sm:$0xff]   ;;  %v5228_v13 = vld [vmem:[%s7651_s1 + $0x168] sm:$0xff]   ;;  %388 = vst [vmem:[#allocation2 + $0xbc] sm:$0x1] %v387_v9  ;;  %4722 = vmatpush3.bf16.msra.mxu1 %v5224_v7 }
  0x5f   : > { %v589_v18 = vshll.u32 %v4571_v1, 16  ;;  %v1480_v10 = vsel %vm1300_vm6, %v1475_v8, %v1479_v61  ;;  %v580_v19 = vrot.slane %v578_v11, 7  ;;  %4825 = vmatprep.subr.bf16.mxu0 %v5228_v13  ;;  %v5229_v15 = vld [vmem:[%s7651_s1 + $0x80] sm:$0xff]   ;;  %v588_v20 = vrot.slane %v586_v16, 7  ;;  %v5230_v22 = vld [vmem:[%s7651_s1 + $0x128] sm:$0xff]   ;;  %4723 = vmatprep.subr.bf16.mxu1 %v5227_v12  ;;  %v5233_v29 = vld [vmem:[%s7651_s1 + $0x1f8] sm:$0xff]  }
  0x60   : > { %3277 = vmatprep.mubr.bf16.mxu1 %v1480_v10  ;;  %v780_v24 = vrot.slane %v6004_v41, 4  ;;  %v6053_v30 = vld [vmem:[#allocation2 + $0x28] sm:$0xf]  ;;  %4826 = vmatpush3.bf16.msra.mxu0 %v5230_v22  ;;  %v581_v41 = vshll.u32 %v6021_v3, 16  ;;  %v404_v48 = vld [vmem:[%s5701_s30 + $0x40] sm:$0xff]  ;;  %s7429_s11 = sshll.u32 %s161_s10, 8 }
  0x61   : > { %3278 = vmatmul.mubr.bf16.gmra.mxu1 %v4323_v39  ;;  %v949_v25 = vld [vmem:[#allocation2 + $0xb4] sm:$0xf]  ;;  %v584_v28 = vrot.slane %v580_v19, 4  ;;  %v591_v35 = vor.u32 %v589_v18, %v588_v20  ;;  %v6071_v50 = vpack.c.bf16 %v404_v48, %v404_v48  ;;  %v405_v56 = vld [vmem:[%s5701_s30 + $0x48] sm:$0xff]  ;;  %v593_v58 = vrot.slane %v588_v20, 4  ;;  %v5239_v13 = vld [vmem:[%s7651_s1 + $0x160] sm:$0xff]  }
  0x62   : > { %v950_v31 = vsel %vm5813_vm14, %v770_v17, %v949_v25  ;;  %4724 = vmatpush3.bf16.msra.mxu1 %v5229_v15  ;;  %v583_v57 = vor.u32 %v581_v41, %v580_v19  ;;  %v4573_v53 = vpack.c.bf16 %v405_v56, %v405_v56  ;;  %v193_v62 = vld [vmem:[#allocation2 + $0x3c] sm:$0x1]  ;;  %v243_v63 = vld [vmem:[#allocation2 + $0x44] sm:$0x1]  ;;  %v1011_v10 = vld [vmem:[#allocation2] sm:$0xe]  ;;  %4827 = vmatprep.subr.bf16.mxu0 %v5239_v13 }
  0x63   : > { %v305_v33 = vld [vmem:[#allocation2 + $0x30] sm:$0xf]  ;;  %v309_v34 = vld [vmem:[#allocation2 + $0x38] sm:$0x1]  ;;  %951 = vst [vmem:[#allocation2 + $0xb4] sm:$0xf] %v950_v31  ;;  %v592_v44 = vsel %vm5766_vm10, %v584_v28, %v591_v35  ;;  %4933 = vmatprep.subr.bf16.mxu1 %v5233_v29 }
  0x64   : > { %v306_v38 = vsel %vm5752_vm9, 0, %v305_v33  ;;  %v310_v39 = vsel %vm5777_vm11, 0, %v309_v34  ;;  %v969_v40 = vld [vmem:[#allocation2 + $0x24] sm:$0xf]  ;;  %875 = vst.msk [vmem:[#allocation2 + $0x34] sm:$0xf] %vm846_vm12, %v592_v44 }
  0x65   : > { %307 = vst [vmem:[#allocation2 + $0x30] sm:$0xf] %v306_v38  ;;  %311 = vst [vmem:[#allocation2 + $0x38] sm:$0x1] %v310_v39  ;;  %v4312_v46 = vcombine.low %v969_v40, %v6053_v30  ;;  %v953_v47 = vld [vmem:[#allocation2 + $0xbc] sm:$0x1] }
  0x66   : > { %v6065_v36 = vld [vmem:[#allocation2 + $0x2c] ss:$0 sps:$4 sm:$0x11]   ;;  %v954_v49 = vsel %vm5825_vm15, %v780_v24, %v953_v47  ;;  %v994_v37 = vld [vmem:[#allocation2 + $0xb8] sm:$0xf]  ;;  %v595_v59 = vshrl.u32 %v6071_v50, 16 }
  0x67   : > { %v1338_v42 = vshrl.u32 %v4312_v46, 16  ;;  %v1340_v52 = vshll.u32 %v4312_v46, 16  ;;  %v1345_v54 = vshll.u32 %v6065_v36, 16  ;;  %955 = vst [vmem:[#allocation2 + $0xbc] sm:$0x1] %v954_v49  ;;  %v194_v1 = vsel %vm5718_vm5, 0, %v193_v62 }
  0x68   : > { %v244_v0 = vsel %vm5729_vm7, 0, %v243_v63  ;;  %v6080_v4 = vrot.slane %v595_v59, 7  ;;  %195 = vst [vmem:[#allocation2 + $0x3c] sm:$0x1] %v194_v1  ;;  %v603_v9 = vshrl.u32 %v4573_v53, 16  ;;  %v606_v25 = vshll.u32 %v4573_v53, 16 }
  0x69   : > { %v1342_v60 = vrot.slane %v1340_v52, 1  ;;  %v1347_v61 = vrot.slane %v1345_v54, 1  ;;  %245 = vst [vmem:[#allocation2 + $0x44] sm:$0x1] %v244_v0  ;;  %v1027_v20 = vld [vmem:[#allocation2 + $0xc] sm:$0xf] }
  0x6a   : > { %v993_v3 = vld [vmem:[#allocation2 + $0xb4] sm:$0xf]  ;;  %v601_v19 = vrot.slane %v6080_v4, 4  ;;  %v6091_v22 = vrot.slane %v603_v9, 7  ;;  %v6098_v34 = vld [vmem:[#allocation2 + $0x10] sm:$0xf] }
  0x6b   : > { %v1343_v5 = vor.u32 %v1342_v60, %v1338_v42  ;;  %v4324_v6 = vcombine.low %v993_v3, %v994_v37  ;;  %v6093_v28 = vld [vmem:[#allocation2 + $0x8] ss:$0 sps:$4 sm:$0x11]   ;;  %v6096_v33 = vld [vmem:[#allocation2 + $0x34] sm:$0xf]  ;;  %v598_v40 = vshll.u32 %v6071_v50, 16  ;;  %v6107_v42 = vcombine.low %v1027_v20, %v6098_v34 }
  0x6c   : > { %v872_v7 = vld [vmem:[#allocation2 + $0x30] sm:$0xf]  ;;  %v876_v8 = vld [vmem:[#allocation2 + $0x38] sm:$0x1]  ;;  %v1559_v29 = vrot.slane %v6093_v28, 1  ;;  %v608_v41 = vor.u32 %v606_v25, %v6091_v22  ;;  %v5240_v44 = vld [vmem:[%s7651_s1 + $0x120] sm:$0xff]  }
  0x6d   : > { %v873_v11 = vsel %vm5813_vm14, %v583_v57, %v872_v7  ;;  %v877_v12 = vsel %vm5825_vm15, %v593_v58, %v876_v8  ;;  %v1348_v17 = vsel %vm1300_vm6, %v1343_v5, %v1347_v61  ;;  %v1482_v16 = vshrl.u32 %v4324_v6, 16  ;;  %v5505_v38 = vld [vmem:[#allocation2 + $0x4] sm:$0xf]  ;;  %v406_v49 = vld [vmem:[%s5701_s30 + $0x50] sm:$0xff]  ;;  %v1012_v37 = vld [vmem:[#allocation2 + $0xc] sm:$0xe]  ;;  %4828 = vmatpush3.bf16.msra.mxu0 %v5240_v44 }
  0x6e   : > { %v1484_v18 = vshll.u32 %v4324_v6, 16  ;;  %874 = vst [vmem:[#allocation2 + $0x30] sm:$0xf] %v873_v11  ;;  %878 = vst [vmem:[#allocation2 + $0x38] sm:$0x1] %v877_v12  ;;  %3189 = vmatprep.mubr.bf16.mxu0 %v1348_v17  ;;  %v4341_v39 = vcombine.low %v1011_v10, %v5505_v38  ;;  %v609_v50 = vsel %vm5766_vm10, %v601_v19, %v608_v41  ;;  %v407_v57 = vld [vmem:[%s5701_s30 + $0x58] sm:$0xff] }
  0x6f   : > { %v5222_v15 = vld [vmem:[#allocation2 + $0xbc] ss:$0 sps:$4 sm:$0x11]   ;;  %3190 = vmatmul.mubr.bf16.gmra.mxu0 %v4312_v46  ;;  %v196_v56 = vld [vmem:[#allocation2 + $0x48] sm:$0x1]  ;;  %v6120_v60 = vpack.c.bf16 %v406_v49, %v406_v49  ;;  %v4575_v61 = vpack.c.bf16 %v407_v57, %v407_v57  ;;  %v600_v0 = vor.u32 %v598_v40, %v6080_v4  ;;  %v4342_v4 = vcombine.low %v1012_v37, %v5882_v32  ;;  %s7463_s17 = scalar_lea.vmem [#allocation3], %s7429_s11 }
  0x70   : > { %v1486_v24 = vrot.slane %v1484_v18, 1  ;;  %v1489_v31 = vshll.u32 %v5222_v15, 16  ;;  %v312_v47 = vld [vmem:[#allocation2 + $0x3c] sm:$0xf]  ;;  %v316_v48 = vld [vmem:[#allocation2 + $0x44] sm:$0x1] }
  0x71   : > { %v313_v52 = vsel %vm5752_vm9, 0, %v312_v47  ;;  %v317_v54 = vsel %vm5777_vm11, 0, %v316_v48  ;;  %882 = vst.msk [vmem:[#allocation2 + $0x40] sm:$0xf] %vm846_vm12, %v609_v50  ;;  %v197_v59 = vsel %vm5718_vm5, 0, %v196_v56  ;;  %v1558_v3 = vrot.slane %v4341_v39, 1 }
  0x72   : > { %v1487_v35 = vor.u32 %v1486_v24, %v1482_v16  ;;  %v1491_v46 = vrot.slane %v1489_v31, 1  ;;  %314 = vst [vmem:[#allocation2 + $0x3c] sm:$0xf] %v313_v52  ;;  %318 = vst [vmem:[#allocation2 + $0x44] sm:$0x1] %v317_v54  ;;  %v612_v8 = vshrl.u32 %v6120_v60, 16 }
  0x73   : > { %198 = vst [vmem:[#allocation2 + $0x48] sm:$0x1] %v197_v59  ;;  %v246_v1 = vld [vmem:[#allocation2 + $0x50] sm:$0x1]  ;;  %v1029_v5 = vld [vmem:[#allocation2 + $0x18] sm:$0xf] }
  0x74   : > { %v1492_v58 = vsel %vm1300_vm6, %v1487_v35, %v1491_v46  ;;  %v247_v7 = vsel %vm5729_vm7, 0, %v246_v1  ;;  %v620_v9 = vshrl.u32 %v4575_v61, 16  ;;  %v6131_v17 = vld [vmem:[#allocation2 + $0x1c] sm:$0xf]  ;;  %v623_v16 = vshll.u32 %v4575_v61, 16  ;;  %v5246_v50 = vld [vmem:[%s7651_s1 + $0x1b0] sm:$0xff]  }
  0x75   : > { %v971_v53 = vld [vmem:[#allocation2 + $0x30] sm:$0xf]  ;;  %3285 = vmatprep.mubr.bf16.mxu1 %v1492_v58  ;;  %v6123_v63 = vld [vmem:[#allocation2 + $0x38] ss:$0 sps:$4 sm:$0x11]   ;;  %v614_v18 = vrot.slane %v612_v8, 7  ;;  %v1560_v35 = vsel %vm1557_vm0, %v1558_v3, %v1559_v29  ;;  %v6149_v40 = vcombine.low %v1029_v5, %v6131_v17 }
  0x76   : > { %v4313_v62 = vcombine.low %v971_v53, %v6096_v33  ;;  %3286 = vmatmul.mubr.bf16.gmra.mxu1 %v4324_v6  ;;  %v1357_v13 = vshll.u32 %v6123_v63, 16  ;;  %248 = vst [vmem:[#allocation2 + $0x50] sm:$0x1] %v247_v7  ;;  %v610_v6 = vrot.slane %v6091_v22, 4  ;;  %v6135_v10 = vrot.slane %v620_v9, 7  ;;  %v5234_v20 = vld [vmem:[%s7651_s1 + $0x1b8] sm:$0xff]  }
  0x77   : > { %3326 = vmatprep.mubr.bf16.mxu1 %v6107_v42  ;;  %v1562_v24 = vrot.slane %v5898_v43, 1  ;;  %v618_v25 = vrot.slane %v614_v18, 4  ;;  %v5245_v22 = vld [vmem:[%s7651_s1 + $0x1f0] sm:$0xff]   ;;  %v1013_v41 = vld [vmem:[#allocation2 + $0x18] sm:$0xe]  ;;  %v1561_v46 = vrot.slane %v4342_v4, 1 }
  0x78   : > { %v1350_v11 = vshrl.u32 %v4313_v62, 16  ;;  %v1352_v12 = vshll.u32 %v4313_v62, 16  ;;  %v1359_v15 = vrot.slane %v1357_v13, 1  ;;  %v625_v31 = vor.u32 %v623_v16, %v6135_v10  ;;  %v199_v48 = vld [vmem:[#allocation2 + $0x54] sm:$0x1]  ;;  %v408_v29 = vld [vmem:[%s5701_s30 + $0x60] sm:$0xff] }
  0x79   : > { %v879_v38 = vld [vmem:[#allocation2 + $0x3c] sm:$0xf]  ;;  %v883_v39 = vld [vmem:[#allocation2 + $0x44] sm:$0x1]  ;;  %v615_v54 = vshll.u32 %v6120_v60, 16  ;;  %v200_v37 = vsel %vm5718_vm5, 0, %v199_v48  ;;  %v6173_v61 = vpack.c.bf16 %v408_v29, %v408_v29  ;;  %v4343_v7 = vcombine.low %v1013_v41, %v5940_v26 }
  0x7a   : > { %v1354_v19 = vrot.slane %v1352_v12, 1  ;;  %v880_v43 = vsel %vm5813_vm14, %v600_v0, %v879_v38  ;;  %v884_v44 = vsel %vm5825_vm15, %v610_v6, %v883_v39  ;;  %v319_v47 = vld [vmem:[#allocation2 + $0x48] sm:$0xf]  ;;  %v626_v28 = vsel %vm5766_vm10, %v618_v25, %v625_v31  ;;  %v249_v56 = vld [vmem:[#allocation2 + $0x5c] sm:$0x1]  ;;  %s4596_s19 = sshll.u32 %s5621_s16, 12 }
  0x7b   : > { %881 = vst [vmem:[#allocation2 + $0x3c] sm:$0xf] %v880_v43  ;;  %885 = vst [vmem:[#allocation2 + $0x44] sm:$0x1] %v884_v44  ;;  %v320_v52 = vsel %vm5752_vm9, 0, %v319_v47  ;;  %v409_v57 = vld [vmem:[%s5701_s30 + $0x68] sm:$0xff]  ;;  %v617_v12 = vor.u32 %v615_v54, %v614_v18  ;;  %v1563_v4 = vsel %vm1557_vm0, %v1561_v46, %v1562_v24  ;;  %s7601_s26 = scalar_lea.hbm %s7653_s3, %s4596_s19 }
  0x7c   : > { %v1355_v32 = vor.u32 %v1354_v19, %v1350_v11  ;;  %889 = vst.msk [vmem:[#allocation2 + $0x4c] sm:$0xf] %vm846_vm12, %v626_v28  ;;  %321 = vst [vmem:[#allocation2 + $0x48] sm:$0xf] %v320_v52  ;;  %v1031_v53 = vld [vmem:[#allocation2 + $0x24] sm:$0xf]  ;;  %v4577_v3 = vpack.c.bf16 %v409_v57, %v409_v57 }
  0x7d   : > { %v323_v58 = vld [vmem:[#allocation2 + $0x50] sm:$0x1]  ;;  %v6169_v59 = vld [vmem:[#allocation2 + $0x28] sm:$0xf]  ;;  %201 = vst [vmem:[#allocation2 + $0x54] sm:$0x1] %v200_v37 }
  0x7e   : > { %v1360_v49 = vsel %vm1300_vm6, %v1355_v32, %v1359_v15  ;;  %3327 = vmatmul.mubr.bf16.vlgmr.msra.gmra.mxu1 %v1560_v35  ;;  %v250_v60 = vsel %vm5729_vm7, 0, %v249_v56  ;;  %v5249_v1 = vld [vmem:[%s7651_s1 + $0x158] sm:$0xff]   ;;  %v324_v0 = vsel %vm5777_vm11, 0, %v323_v58  ;;  %v629_v8 = vshrl.u32 %v6173_v61, 16  ;;  %v6186_v11 = vld [vmem:[#allocation2 + $0x40] sm:$0xf] }
  0x7f   : > { %3197 = vmatprep.mubr.bf16.mxu0 %v1360_v49  ;;  %4934 = vmatpush3.bf16.msra.mxu1 %v5234_v20  ;;  %251 = vst [vmem:[#allocation2 + $0x5c] sm:$0x1] %v250_v60  ;;  %v5250_v5 = vld [vmem:[%s7651_s1 + $0x118] sm:$0xff]   ;;  %325 = vst [vmem:[#allocation2 + $0x50] sm:$0x1] %v324_v0  ;;  %v640_v9 = vshll.u32 %v4577_v3, 16  ;;  %v6192_v19 = vcombine.low %v1031_v53, %v6169_v59 }
  0x80   : > { %3198 = vmatmul.mubr.bf16.gmra.mxu0 %v4313_v62  ;;  %3334 = vmatprep.mubr.bf16.mxu1 %v6149_v40  ;;  %v637_v62 = vshrl.u32 %v4577_v3, 16  ;;  %v631_v13 = vrot.slane %v629_v8, 7  ;;  %v202_v6 = vld [vmem:[#allocation2 + $0x60] sm:$0x1]  ;;  %v1565_v26 = vrot.slane %v5975_v2, 1  ;;  %v410_v20 = vld [vmem:[%s5701_s30 + $0x70] sm:$0xff] }
  0x81   : > { %4935 = vmatprep.subr.bf16.mxu1 %v5245_v22  ;;  %4829 = vmatprep.subr.bf16.mxu0 %v5249_v1  ;;  %v203_v15 = vsel %vm5718_vm5, 0, %v202_v6  ;;  %v411_v25 = vld [vmem:[%s5701_s30 + $0x78] sm:$0xff]  ;;  %v627_v18 = vrot.slane %v6135_v10, 4  ;;  %v1564_v22 = vrot.slane %v4343_v7, 1  ;;  %v6204_v2 = vpack.c.bf16 %v410_v20, %v410_v20  ;;  %v1033_v46 = vld [vmem:[#allocation2 + $0x30] sm:$0xf] }
  0x82   : > { %v6188_v16 = vrot.slane %v637_v62, 7  ;;  %4830 = vmatpush3.bf16.msra.mxu0 %v5250_v5  ;;  %v973_v31 = vld [vmem:[#allocation2 + $0x3c] sm:$0xf]  ;;  %204 = vst [vmem:[#allocation2 + $0x60] sm:$0x1] %v203_v15  ;;  %v635_v39 = vrot.slane %v631_v13, 4  ;;  %v4579_v47 = vpack.c.bf16 %v411_v25, %v411_v25 }
  0x83   : > { %4936 = vmatpush3.bf16.msra.mxu1 %v5246_v50  ;;  %v4314_v24 = vcombine.low %v973_v31, %v6186_v11  ;;  %v6202_v35 = vld [vmem:[#allocation2 + $0x44] ss:$0 sps:$4 sm:$0x11]   ;;  %v886_v38 = vld [vmem:[#allocation2 + $0x48] sm:$0xf]  ;;  %v632_v37 = vshll.u32 %v6173_v61, 16  ;;  %v1566_v61 = vsel %vm1557_vm0, %v1564_v22, %v1565_v26 }
  0x84   : > { %v642_v32 = vor.u32 %v640_v9, %v6188_v16  ;;  %v887_v41 = vsel %vm5813_vm14, %v617_v12, %v886_v38  ;;  %v326_v43 = vld [vmem:[#allocation2 + $0x54] sm:$0xf]  ;;  %v252_v10 = vld [vmem:[#allocation2 + $0x68] sm:$0x1]  ;;  %v1369_v29 = vshll.u32 %v6202_v35, 16  ;;  %v646_v1 = vshrl.u32 %v6204_v2, 16 }
  0x85   : > { %v1362_v28 = vshrl.u32 %v4314_v24, 16  ;;  %v1364_v48 = vshll.u32 %v4314_v24, 16  ;;  %888 = vst [vmem:[#allocation2 + $0x48] sm:$0xf] %v887_v41  ;;  %v327_v52 = vsel %vm5752_vm9, 0, %v326_v43  ;;  %v253_v3 = vsel %vm5729_vm7, 0, %v252_v10 }
  0x86   : > { %3335 = vmatmul.mubr.bf16.gmra.mxu1 %v1563_v4  ;;  %v330_v44 = vld [vmem:[#allocation2 + $0x5c] sm:$0x1]  ;;  %v890_v49 = vld [vmem:[#allocation2 + $0x50] sm:$0x1]  ;;  %328 = vst [vmem:[#allocation2 + $0x54] sm:$0xf] %v327_v52  ;;  %v643_v56 = vsel %vm5766_vm10, %v635_v39, %v642_v32  ;;  %v634_v20 = vor.u32 %v632_v37, %v631_v13 }
  0x87   : > { %3342 = vmatprep.mubr.bf16.mxu1 %v6192_v19  ;;  %v891_v54 = vsel %vm5825_vm15, %v627_v18, %v890_v49  ;;  %v331_v50 = vsel %vm5777_vm11, 0, %v330_v44  ;;  %v6219_v57 = vld [vmem:[#allocation2 + $0x34] sm:$0xf]  ;;  %v1014_v58 = vld [vmem:[#allocation2 + $0x24] sm:$0xe]  ;;  %v1366_v53 = vrot.slane %v1364_v48, 1 }
  0x88   : > { %v1371_v60 = vrot.slane %v1369_v29, 1  ;;  %892 = vst [vmem:[#allocation2 + $0x50] sm:$0x1] %v891_v54  ;;  %332 = vst [vmem:[#allocation2 + $0x5c] sm:$0x1] %v331_v50  ;;  %v649_v5 = vshll.u32 %v6204_v2, 16  ;;  %v6233_v12 = vcombine.low %v1033_v46, %v6219_v57  ;;  %v4344_v6 = vcombine.low %v1014_v58, %v6053_v30 }
  0x89   : > { %896 = vst.msk [vmem:[#allocation2 + $0x58] sm:$0xf] %vm846_vm12, %v643_v56  ;;  %v6225_v0 = vld [vmem:[#allocation2 + $0x4c] sm:$0xf]  ;;  %254 = vst [vmem:[#allocation2 + $0x68] sm:$0x1] %v253_v3  ;;  %v1367_v9 = vor.u32 %v1366_v53, %v1362_v28 }
  0x8a   : > { %v654_v7 = vshrl.u32 %v4579_v47, 16  ;;  %v657_v8 = vshll.u32 %v4579_v47, 16  ;;  %v5257_v62 = vld [vmem:[%s7651_s1 + $0x150] sm:$0xff]   ;;  %v333_v4 = vld [vmem:[#allocation2 + $0x60] sm:$0xf]  ;;  %v648_v15 = vrot.slane %v646_v1, 7 }
  0x8b   : > { %v5258_v26 = vld [vmem:[%s7651_s1 + $0x1e8] sm:$0xff]   ;;  %v334_v25 = vsel %vm5752_vm9, 0, %v333_v4  ;;  %4831 = vmatprep.subr.bf16.mxu0 %v5257_v62  ;;  %v1372_v18 = vsel %vm1300_vm6, %v1367_v9, %v1371_v60  ;;  %v644_v22 = vrot.slane %v6188_v16, 4  ;;  %v1568_v32 = vrot.slane %v6065_v36, 1  ;;  %v1035_v39 = vld [vmem:[#allocation2 + $0x3c] sm:$0xf] }
  0x8c   : > { %v6241_v31 = vrot.slane %v654_v7, 7  ;;  %335 = vst [vmem:[#allocation2 + $0x60] sm:$0xf] %v334_v25  ;;  %v652_v30 = vrot.slane %v648_v15, 4  ;;  %4937 = vmatprep.subr.bf16.mxu1 %v5258_v26  ;;  %3205 = vmatprep.mubr.bf16.mxu0 %v1372_v18  ;;  %v975_v38 = vld [vmem:[#allocation2 + $0x48] sm:$0xf]  ;;  %v651_v47 = vor.u32 %v649_v5, %v648_v15 }
  0x8d   : > { %v6247_v2 = vld [vmem:[#allocation2 + $0x40] sm:$0xf]  ;;  %v1015_v41 = vld [vmem:[#allocation2 + $0x30] sm:$0xe]  ;;  %3206 = vmatmul.mubr.bf16.gmra.mxu0 %v4314_v24  ;;  %v4315_v43 = vcombine.low %v975_v38, %v6225_v0  ;;  %v893_v44 = vld [vmem:[#allocation2 + $0x54] sm:$0xf] }
  0x8e   : > { %3343 = vmatmul.mubr.bf16.gmra.mxu1 %v1566_v61  ;;  %v659_v13 = vor.u32 %v657_v8, %v6241_v31  ;;  %v1567_v16 = vrot.slane %v4344_v6, 1  ;;  %v5259_v36 = vld [vmem:[%s7651_s1 + $0x110] sm:$0xff]   ;;  %v894_v10 = vsel %vm5813_vm14, %v634_v20, %v893_v44  ;;  %v4345_v49 = vcombine.low %v1015_v41, %v6096_v33  ;;  %v5260_v56 = vld [vmem:[%s7651_s1 + $0x1a8] sm:$0xff]   ;;  %v412_v8 = vld [vmem:[%s5701_s30 + $0x80] sm:$0xff]  ;;  %s4208_s20 = sshll.u32 %s7463_s17, 4  ;;  %s7610_s16 = scalar_lea.sflag [#allocation4], %s161_s10  ;;  %s7603_s20 = int_to_ptr.vmem [resolvable:$true] %s4208_s20 }
  0x8f   : > { %3350 = vmatprep.mubr.bf16.mxu1 %v6233_v12  ;;  %v6254_v46 = vld [vmem:[#allocation2 + $0x50] ss:$0 sps:$4 sm:$0x11]   ;;  %v1374_v24 = vshrl.u32 %v4315_v43, 16  ;;  %v1376_v48 = vshll.u32 %v4315_v43, 16  ;;  %v1571_v52 = vrot.slane %v6123_v63, 1  ;;  %4832 = vmatpush3.bf16.msra.mxu0 %v5259_v36  ;;  %v6273_v63 = vcombine.low %v1035_v39, %v6247_v2 }
  0x90   : > { %v660_v28 = vsel %vm5766_vm10, %v652_v30, %v659_v13  ;;  %895 = vst [vmem:[#allocation2 + $0x54] sm:$0xf] %v894_v10  ;;  %v897_v29 = vld [vmem:[#allocation2 + $0x5c] sm:$0x1]  ;;  %v1381_v54 = vshll.u32 %v6254_v46, 16  ;;  %v1569_v53 = vsel %vm1557_vm0, %v1567_v16, %v1568_v32  ;;  %4938 = vmatpush3.bf16.msra.mxu1 %v5260_v56  ;;  %v1570_v6 = vrot.slane %v4345_v49, 1 }
  0x91   : > { %903 = vst.msk [vmem:[#allocation2 + $0x64] sm:$0xf] %vm846_vm12, %v660_v28  ;;  %v898_v50 = vsel %vm5825_vm15, %v644_v22, %v897_v29  ;;  %v337_v37 = vld [vmem:[#allocation2 + $0x68] sm:$0x1]  ;;  %v1378_v58 = vrot.slane %v1376_v48, 1  ;;  %v6283_v15 = vpack.c.bf16 %v412_v8, %v412_v8  ;;  %v661_v32 = vrot.slane %v6241_v31, 4 }
  0x92   : > { %899 = vst [vmem:[#allocation2 + $0x5c] sm:$0x1] %v898_v50  ;;  %v338_v33 = vsel %vm5777_vm11, 0, %v337_v37  ;;  %v205_v60 = vld [vmem:[#allocation2 + $0x6c] sm:$0x1]  ;;  %v1383_v1 = vrot.slane %v1381_v54, 1  ;;  %v1572_v54 = vsel %vm1557_vm0, %v1570_v6, %v1571_v52 }
  0x93   : > { %v255_v3 = vld [vmem:[#allocation2 + $0x74] sm:$0x1]  ;;  %339 = vst [vmem:[#allocation2 + $0x68] sm:$0x1] %v338_v33  ;;  %v900_v61 = vld [vmem:[#allocation2 + $0x60] sm:$0xf]  ;;  %v1379_v62 = vor.u32 %v1378_v58, %v1374_v24 }
  0x94   : > { %v206_v5 = vsel %vm5718_vm5, 0, %v205_v60  ;;  %v256_v7 = vsel %vm5729_vm7, 0, %v255_v3  ;;  %v901_v9 = vsel %vm5813_vm14, %v651_v47, %v900_v61  ;;  %v413_v4 = vld [vmem:[%s5701_s30 + $0x88] sm:$0xff]  ;;  %v6285_v26 = vld [vmem:[#allocation2 + $0x58] sm:$0xf]  ;;  %v663_v30 = vshrl.u32 %v6283_v15, 16 }
  0x95   : > { %207 = vst [vmem:[#allocation2 + $0x6c] sm:$0x1] %v206_v5  ;;  %257 = vst [vmem:[#allocation2 + $0x74] sm:$0x1] %v256_v7  ;;  %v4581_v20 = vpack.c.bf16 %v413_v4, %v413_v4  ;;  %v1037_v25 = vld [vmem:[#allocation2 + $0x48] sm:$0xf]  ;;  %v1384_v22 = vsel %vm1300_vm6, %v1379_v62, %v1383_v1 }
  0x96   : > { %3351 = vmatmul.mubr.bf16.gmra.mxu1 %v1569_v53  ;;  %902 = vst [vmem:[#allocation2 + $0x60] sm:$0xf] %v901_v9  ;;  %v208_v18 = vld [vmem:[#allocation2 + $0x78] sm:$0x1]  ;;  %v6291_v38 = vld [vmem:[#allocation2 + $0x4c] sm:$0xf]  ;;  %3213 = vmatprep.mubr.bf16.mxu0 %v1384_v22 }
  0x97   : > { %3358 = vmatprep.mubr.bf16.mxu1 %v6273_v63  ;;  %v1016_v13 = vld [vmem:[#allocation2 + $0x3c] sm:$0xe]  ;;  %v977_v39 = vld [vmem:[#allocation2 + $0x54] sm:$0xf]  ;;  %v671_v41 = vshrl.u32 %v4581_v20, 16  ;;  %v674_v44 = vshll.u32 %v4581_v20, 16  ;;  %3214 = vmatmul.mubr.bf16.gmra.mxu0 %v4315_v43  ;;  %v6310_v43 = vcombine.low %v1037_v25, %v6291_v38 }
  0x98   : > { %v1574_v16 = vrot.slane %v6202_v35, 1  ;;  %v414_v36 = vld [vmem:[%s5701_s30 + $0x90] sm:$0xff]  ;;  %v4316_v10 = vcombine.low %v977_v39, %v6285_v26  ;;  %v6296_v47 = vld [vmem:[#allocation2 + $0x64] sm:$0xf]  ;;  %v665_v31 = vrot.slane %v663_v30, 7  ;;  %v209_v28 = vsel %vm5718_vm5, 0, %v208_v18 }
  0x99   : > { %v258_v24 = vld [vmem:[#allocation2 + $0x80] sm:$0x1]  ;;  %v415_v48 = vld [vmem:[%s5701_s30 + $0x98] sm:$0xff]  ;;  %v5267_v29 = vld [vmem:[%s7651_s1 + $0x148] sm:$0xff]   ;;  %v6307_v50 = vrot.slane %v671_v41, 7  ;;  %v4346_v37 = vcombine.low %v1016_v13, %v6186_v11  ;;  %v6313_v60 = vpack.c.bf16 %v414_v36, %v414_v36  ;;  %v666_v4 = vshll.u32 %v6283_v15, 16 }
  0x9a   : > { %v6304_v49 = vld [vmem:[#allocation2 + $0x5c] ss:$0 sps:$4 sm:$0x11]   ;;  %210 = vst [vmem:[#allocation2 + $0x78] sm:$0x1] %v209_v28  ;;  %v1386_v56 = vshrl.u32 %v4316_v10, 16  ;;  %4833 = vmatprep.subr.bf16.mxu0 %v5267_v29  ;;  %v4583_v7 = vpack.c.bf16 %v415_v48, %v415_v48 }
  0x9b   : > { %v1388_v58 = vshll.u32 %v4316_v10, 16  ;;  %v904_v53 = vld [vmem:[#allocation2 + $0x68] sm:$0x1]  ;;  %v669_v33 = vrot.slane %v665_v31, 4  ;;  %v1393_v52 = vshll.u32 %v6304_v49, 16  ;;  %v676_v11 = vor.u32 %v674_v44, %v6307_v50  ;;  %s5577_s27 = smov [#allocation3]  }
  0x9c   : > { %v5268_v3 = vld [vmem:[%s7651_s1 + $0x108] sm:$0xff]   ;;  %v905_v1 = vsel %vm5825_vm15, %v661_v32, %v904_v53  ;;  %v344_v5 = vld [vmem:[#allocation2 + $0x74] sm:$0x1]  ;;  %v259_v22 = vsel %vm5729_vm7, 0, %v258_v24  ;;  %v1573_v15 = vrot.slane %v4346_v37, 1  ;;  %v680_v30 = vshrl.u32 %v6313_v60, 16 }
  0x9d   : > { %v340_v61 = vld [vmem:[#allocation2 + $0x6c] sm:$0xf]  ;;  %v1390_v8 = vrot.slane %v1388_v58, 1  ;;  %906 = vst [vmem:[#allocation2 + $0x68] sm:$0x1] %v905_v1  ;;  %v345_v6 = vsel %vm5777_vm11, 0, %v344_v5  ;;  %4834 = vmatpush3.bf16.msra.mxu0 %v5268_v3  ;;  %v677_v18 = vsel %vm5766_vm10, %v669_v33, %v676_v11  ;;  %v668_v58 = vor.u32 %v666_v4, %v665_v31 }
  0x9e   : > { %v979_v62 = vld [vmem:[#allocation2 + $0x60] sm:$0xf]  ;;  %v341_v9 = vsel %vm5752_vm9, 0, %v340_v61  ;;  %v1395_v20 = vrot.slane %v1393_v52, 1  ;;  %3359 = vmatmul.mubr.bf16.gmra.mxu1 %v1572_v54  ;;  %346 = vst [vmem:[#allocation2 + $0x74] sm:$0x1] %v345_v6 }
  0x9f   : > { %v6328_v25 = vcombine.low %v979_v62, %v6296_v47  ;;  %342 = vst [vmem:[#allocation2 + $0x6c] sm:$0xf] %v341_v9  ;;  %v1391_v32 = vor.u32 %v1390_v8, %v1386_v56  ;;  %910 = vst.msk [vmem:[#allocation2 + $0x70] sm:$0xf] %vm846_vm12, %v677_v18  ;;  %3366 = vmatprep.mubr.bf16.mxu1 %v6310_v43  ;;  %v1039_v13 = vld [vmem:[#allocation2 + $0x54] sm:$0xf] }
  0xa0   : > { %260 = vst [vmem:[#allocation2 + $0x80] sm:$0x1] %v259_v22  ;;  %v688_v41 = vshrl.u32 %v4583_v7, 16  ;;  %v691_v44 = vshll.u32 %v4583_v7, 16  ;;  %v6338_v36 = vld [vmem:[#allocation2 + $0x58] sm:$0xf] }
  0xa1   : > { %v1400_v39 = vshll.u32 %v6328_v25, 16  ;;  %v1396_v28 = vsel %vm1300_vm6, %v1391_v32, %v1395_v20  ;;  %v1398_v24 = vshrl.u32 %v6328_v25, 16  ;;  %v678_v48 = vrot.slane %v6307_v50, 4  ;;  %v347_v29 = vld [vmem:[#allocation2 + $0x78] sm:$0xf]  ;;  %v5271_v37 = vld [vmem:[%s7651_s1 + $0x1e0] sm:$0xff]  }
  0xa2   : > { %v682_v54 = vrot.slane %v680_v30, 7  ;;  %3221 = vmatprep.mubr.bf16.mxu0 %v1396_v28  ;;  %v348_v53 = vsel %vm5752_vm9, 0, %v347_v29  ;;  %v6348_v33 = vrot.slane %v688_v41, 7  ;;  %v5272_v3 = vld [vmem:[%s7651_s1 + $0x1a0] sm:$0xff]   ;;  %v1575_v50 = vsel %vm1557_vm0, %v1573_v15, %v1574_v16  ;;  %4939 = vmatprep.subr.bf16.mxu1 %v5271_v37  ;;  %v1017_v61 = vld [vmem:[#allocation2 + $0x48] sm:$0xe] }
  0xa3   : > { %v1402_v56 = vrot.slane %v1400_v39, 1  ;;  %3222 = vmatmul.mubr.bf16.gmra.mxu0 %v4316_v10  ;;  %349 = vst [vmem:[#allocation2 + $0x78] sm:$0xf] %v348_v53  ;;  %v683_v52 = vshll.u32 %v6313_v60, 16  ;;  %v6358_v31 = vcombine.low %v1039_v13, %v6338_v36  ;;  %v4347_v10 = vcombine.low %v1017_v61, %v6225_v0  ;;  %4940 = vmatpush3.bf16.msra.mxu1 %v5272_v3  ;;  %v416_v4 = vld [vmem:[%s5701_s30 + $0xa0] sm:$0xff]  ;;  %v417_v39 = vld [vmem:[%s5701_s30 + $0xa8] sm:$0xff] }
  0xa4   : > { %v686_v1 = vrot.slane %v682_v54, 4  ;;  %v6360_v5 = vld [vmem:[#allocation2 + $0x68] ss:$0 sps:$4 sm:$0x11]   ;;  %v693_v11 = vor.u32 %v691_v44, %v6348_v33  ;;  %v1577_v35 = vrot.slane %v6254_v46, 1  ;;  %v6377_v32 = vpack.c.bf16 %v416_v4, %v416_v4  ;;  %v5277_v41 = vld [vmem:[%s7651_s1 + $0x140] sm:$0xff]  }
  0xa5   : > { %v1403_v16 = vor.u32 %v1402_v56, %v1398_v24  ;;  %v911_v8 = vld [vmem:[#allocation2 + $0x74] sm:$0x1]  ;;  %v1405_v60 = vshll.u32 %v6360_v5, 16  ;;  %v685_v20 = vor.u32 %v683_v52, %v682_v54  ;;  %v1576_v18 = vrot.slane %v4347_v10, 1  ;;  %v211_v22 = vld [vmem:[#allocation2 + $0x84] sm:$0x1]  ;;  %4835 = vmatprep.subr.bf16.mxu0 %v5277_v41 }
  0xa6   : > { %v907_v7 = vld [vmem:[#allocation2 + $0x6c] sm:$0xf]  ;;  %v912_v9 = vsel %vm5825_vm15, %v678_v48, %v911_v8  ;;  %3367 = vmatmul.mubr.bf16.gmra.mxu1 %v1575_v50  ;;  %v694_v0 = vsel %vm5766_vm10, %v686_v1, %v693_v11  ;;  %v212_v30 = vsel %vm5718_vm5, 0, %v211_v22  ;;  %v4585_v28 = vpack.c.bf16 %v417_v39, %v417_v39  ;;  %v1041_v48 = vld [vmem:[#allocation2 + $0x60] sm:$0xf]  ;;  %s5518_s28 = sshll.u32 %s5577_s27, 4  ;;  %s5519_s28 = int_to_ptr.vmem [resolvable:$false] %s5518_s28 }
  0xa7   : > { %v908_v62 = vsel %vm5813_vm14, %v668_v58, %v907_v7  ;;  %v351_v6 = vld [vmem:[#allocation2 + $0x80] sm:$0x1]  ;;  %913 = vst [vmem:[#allocation2 + $0x74] sm:$0x1] %v912_v9  ;;  %917 = vst.msk [vmem:[#allocation2 + $0x7c] sm:$0xf] %vm846_vm12, %v694_v0  ;;  %3374 = vmatprep.mubr.bf16.mxu1 %v6358_v31  ;;  %v1578_v58 = vsel %vm1557_vm0, %v1576_v18, %v1577_v35  ;;  %p5521_p0 = scmp.lt.s32.totalorder %s7603_s20, %s5519_s28 }
  0xa8   : > { %909 = vst [vmem:[#allocation2 + $0x6c] sm:$0xf] %v908_v62  ;;  %v352_v46 = vsel %vm5777_vm11, 0, %v351_v6  ;;  %v1407_v15 = vrot.slane %v1405_v60, 1  ;;  %v261_v13 = vld [vmem:[#allocation2 + $0x8c] sm:$0x1] }
  0xa9   : > { %353 = vst [vmem:[#allocation2 + $0x80] sm:$0x1] %v352_v46  ;;  %213 = vst [vmem:[#allocation2 + $0x84] sm:$0x1] %v212_v30  ;;  %v262_v44 = vsel %vm5729_vm7, 0, %v261_v13  ;;  %v697_v24 = vshrl.u32 %v6377_v32, 16 }
  0xaa   : > { %v6388_v29 = vld [vmem:[#allocation2 + $0x64] sm:$0xf]  ;;  %v1408_v54 = vsel %vm1300_vm6, %v1403_v16, %v1407_v15  ;;  %v695_v37 = vrot.slane %v6348_v33, 4  ;;  %v914_v56 = vld [vmem:[#allocation2 + $0x78] sm:$0xf]  ;;  %v705_v52 = vshrl.u32 %v4585_v28, 16 }
  0xab   : > { %263 = vst [vmem:[#allocation2 + $0x8c] sm:$0x1] %v262_v44  ;;  %v6394_v53 = vcombine.low %v1041_v48, %v6388_v29  ;;  %3229 = vmatprep.mubr.bf16.mxu0 %v1408_v54  ;;  %v915_v3 = vsel %vm5813_vm14, %v685_v20, %v914_v56  ;;  %v699_v50 = vrot.slane %v697_v24, 7  ;;  %v708_v1 = vshll.u32 %v4585_v28, 16  ;;  %v5278_v61 = vld [vmem:[%s7651_s1 + $0x100] sm:$0xff]   ;;  %v5282_v46 = vld [vmem:[%s7651_s1 + $0x1d8] sm:$0xff]  }
  0xac   : > { %3230 = vmatmul.mubr.bf16.gmra.mxu0 %v6328_v25  ;;  %v6402_v33 = vld [vmem:[#allocation2 + $0x70] sm:$0xf]  ;;  %916 = vst [vmem:[#allocation2 + $0x78] sm:$0xf] %v915_v3  ;;  %v1018_v11 = vld [vmem:[#allocation2 + $0x54] sm:$0xe]  ;;  %4941 = vmatprep.subr.bf16.mxu1 %v5282_v46 }
  0xad   : > { %v6404_v10 = vrot.slane %v705_v52, 7  ;;  %v4348_v35 = vcombine.low %v1018_v11, %v6285_v26  ;;  %4836 = vmatpush3.bf16.msra.mxu0 %v5278_v61  ;;  %v703_v7 = vrot.slane %v699_v50, 4  ;;  %v1580_v6 = vrot.slane %v6304_v49, 1  ;;  %v6430_v54 = vld [vmem:[#allocation2 + $0x70] sm:$0xf]  ;;  %v5283_v3 = vld [vmem:[%s7651_s1 + $0x198] sm:$0xff]  }
  0xae   : > { %3375 = vmatmul.mubr.bf16.gmra.mxu1 %v1578_v58  ;;  %v6408_v60 = vld [vmem:[#allocation2 + $0x74] ss:$0 sps:$4 sm:$0x11]   ;;  %v6410_v9 = vld [vmem:[#allocation2 + $0x7c] sm:$0xf]  ;;  %v700_v13 = vshll.u32 %v6377_v32, 16 }
  0xaf   : > { %v981_v16 = vld [vmem:[#allocation2 + $0x6c] sm:$0xf]  ;;  %v710_v25 = vor.u32 %v708_v1, %v6404_v10  ;;  %3382 = vmatprep.mubr.bf16.mxu1 %v6394_v53  ;;  %v1579_v4 = vrot.slane %v4348_v35, 1  ;;  %v1417_v22 = vshll.u32 %v6408_v60, 16  ;;  %v1019_v58 = vld [vmem:[#allocation2 + $0x60] sm:$0xe]  ;;  %4942 = vmatpush3.bf16.msra.mxu1 %v5283_v3 }
  0xb0   : > { %v4318_v8 = vcombine.low %v981_v16, %v6402_v33  ;;  %v918_v62 = vld [vmem:[#allocation2 + $0x80] sm:$0x1]  ;;  %v354_v0 = vld [vmem:[#allocation2 + $0x84] sm:$0xf]  ;;  %v1043_v41 = vld [vmem:[#allocation2 + $0x6c] sm:$0xf]  ;;  %v702_v61 = vor.u32 %v700_v13, %v699_v50 }
  0xb1   : > { %v919_v26 = vsel %vm5825_vm15, %v695_v37, %v918_v62  ;;  %v355_v15 = vsel %vm5752_vm9, 0, %v354_v0  ;;  %v711_v39 = vsel %vm5766_vm10, %v703_v7, %v710_v25  ;;  %v1419_v28 = vrot.slane %v1417_v22, 1  ;;  %v6442_v11 = vld [vmem:[%s7651_s1 + $0x238] sm:$0xff]   ;;  %v5334_v45 = vld [vmem:[%s7651_s1 + $0x208] sm:$0xff]   ;;  %s5520_s29 = scalar_lea.vmem %s5519_s28, 8192 }
  0xb2   : > { %v1410_v20 = vshrl.u32 %v4318_v8, 16  ;;  %v1412_v18 = vshll.u32 %v4318_v8, 16  ;;  %920 = vst [vmem:[#allocation2 + $0x80] sm:$0x1] %v919_v26  ;;  %v358_v30 = vld [vmem:[#allocation2 + $0x8c] sm:$0x1]  ;;  %v1581_v48 = vsel %vm1557_vm0, %v1579_v4, %v1580_v6  ;;  %v6434_v56 = vcombine.low %v1043_v41, %v6430_v54  ;;  %5069 = vmatprep.subr.bf16.mxu0 %v6442_v11 }
  0xb3   : > { %356 = vst [vmem:[#allocation2 + $0x84] sm:$0xf] %v355_v15  ;;  %v359_v49 = vsel %vm5777_vm11, 0, %v358_v30  ;;  %v983_v24 = vld [vmem:[#allocation2 + $0x78] sm:$0xf]  ;;  %v712_v16 = vrot.slane %v6404_v10, 4  ;;  %v4349_v7 = vcombine.low %v1019_v58, %v6296_v47 }
  0xb4   : > { %v1414_v44 = vrot.slane %v1412_v18, 1  ;;  %360 = vst [vmem:[#allocation2 + $0x8c] sm:$0x1] %v359_v49  ;;  %924 = vst.msk [vmem:[#allocation2 + $0x88] sm:$0xf] %vm846_vm12, %v711_v39  ;;  %v4319_v37 = vcombine.low %v983_v24, %v6410_v9  ;;  %v1583_v62 = vrot.slane %v6360_v5, 1 }
  0xb5   : > { %v1582_v26 = vrot.slane %v4349_v7, 1  ;;  %v1045_v18 = vld [vmem:[#allocation2 + $0x78] sm:$0xf]  ;;  %v6458_v22 = vld [vmem:[#allocation2 + $0x7c] sm:$0xf]  ;;  %v5291_v30 = vld [vmem:[%s7651_s1 + $0x1d0] sm:$0xff]  }
  0xb6   : > { %v1415_v32 = vor.u32 %v1414_v44, %v1410_v20  ;;  %v1422_v52 = vshrl.u32 %v4319_v37, 16  ;;  %v1424_v1 = vshll.u32 %v4319_v37, 16  ;;  %3383 = vmatmul.mubr.bf16.gmra.mxu1 %v1581_v48  ;;  %v1020_v15 = vld [vmem:[#allocation2 + $0x6c] sm:$0xe]  ;;  %v1586_v44 = vrot.slane %v6408_v60, 1  ;;  %4943 = vmatprep.subr.bf16.mxu1 %v5291_v30 }
  0xb7   : > { %3390 = vmatprep.mubr.bf16.mxu1 %v6434_v56  ;;  %v1584_v5 = vsel %vm1557_vm0, %v1582_v26, %v1583_v62  ;;  %v4350_v13 = vcombine.low %v1020_v15, %v6402_v33  ;;  %v1075_v39 = vld [vmem:[#allocation2 + $0xc] sm:$0xe]  ;;  %v1021_v58 = vld [vmem:[#allocation2 + $0x78] sm:$0xe]  ;;  %v1769_v7 = vshll.u32 %v6107_v42, 16  ;;  %v1781_v30 = vshll.u32 %v6149_v40, 16 }
  0xb8   : > { %v1420_v35 = vsel %vm1300_vm6, %v1415_v32, %v1419_v28  ;;  %v1426_v50 = vrot.slane %v1424_v1, 1  ;;  %v5279_v28 = vld [vmem:[#allocation2 + $0x14] ss:$0 sps:$4 sm:$0x11]   ;;  %v4389_v33 = vcombine.low %v1075_v39, %v6098_v34  ;;  %v4351_v1 = vcombine.low %v1021_v58, %v6410_v9  ;;  %v6675_v27 = vld [vmem:[#allocation2 + $0x4c] sm:$0xf] }
  0xb9   : > { %3237 = vmatprep.mubr.bf16.mxu0 %v1420_v35  ;;  %v6449_v25 = vld [vmem:[#allocation2 + $0x80] ss:$0 sps:$4 sm:$0x11]   ;;  %v1585_v24 = vrot.slane %v4350_v13, 1  ;;  %v5292_v32 = vld [vmem:[%s7651_s1 + $0x190] sm:$0xff]   ;;  %v2023_v26 = vrot.slane %v5279_v28, 1 }
  0xba   : > { %3238 = vmatmul.mubr.bf16.gmra.mxu0 %v4318_v8  ;;  %v921_v6 = vld [vmem:[#allocation2 + $0x84] sm:$0xf]  ;;  %v1427_v0 = vor.u32 %v1426_v50, %v1422_v52  ;;  %v1429_v4 = vshll.u32 %v6449_v25, 16  ;;  %v6461_v8 = vcombine.low %v1045_v18, %v6458_v22  ;;  %4944 = vmatpush3.bf16.msra.mxu1 %v5292_v32  ;;  %v1588_v9 = vrot.slane %v4351_v1, 1 }
  0xbb   : > { %v922_v10 = vsel %vm5813_vm14, %v702_v61, %v921_v6  ;;  %v925_v46 = vld [vmem:[#allocation2 + $0x8c] sm:$0x1]  ;;  %v6468_v41 = vld [vmem:[#allocation2 + $0x88] sm:$0xf]  ;;  %v1587_v35 = vsel %vm1557_vm0, %v1585_v24, %v1586_v44  ;;  %v2022_v6 = vrot.slane %v4389_v33, 1  ;;  %v1771_v15 = vrot.slane %v1769_v7, 1 }
  0xbc   : > { %923 = vst [vmem:[#allocation2 + $0x84] sm:$0xf] %v922_v10  ;;  %v926_v47 = vsel %vm5825_vm15, %v712_v16, %v925_v46  ;;  %v1431_v20 = vrot.slane %v1429_v4, 1  ;;  %v6472_v48 = vld [vmem:[#allocation2 + $0x88] sm:$0xf]  ;;  %v1774_v13 = vshll.u32 %v5279_v28, 16 }
  0xbd   : > { %927 = vst [vmem:[#allocation2 + $0x8c] sm:$0x1] %v926_v47  ;;  %v1049_v46 = vld [vmem:[#allocation2 + $0x90] sm:$0xf]  ;;  %v6490_v47 = vld [vmem:[#allocation2 + $0x94] sm:$0xf] }
  0xbe   : > { %v1432_v49 = vsel %vm1300_vm6, %v1427_v0, %v1431_v20  ;;  %3391 = vmatmul.mubr.bf16.gmra.mxu1 %v1584_v5  ;;  %v1589_v0 = vrot.slane %v6449_v25, 1  ;;  %v1767_v5 = vshrl.u32 %v6107_v42, 16  ;;  %v2024_v25 = vsel %vm1557_vm0, %v2022_v6, %v2023_v26  ;;  %v5284_v44 = vld [vmem:[#allocation2 + $0x20] ss:$0 sps:$4 sm:$0x11]   ;;  %v5301_v42 = vld [vmem:[%s7651_s1 + $0x1c8] sm:$0xff]  }
  0xbf   : > { %3245 = vmatprep.mubr.bf16.mxu0 %v1432_v49  ;;  %3398 = vmatprep.mubr.bf16.mxu1 %v6461_v8  ;;  %v6499_v32 = vcombine.low %v1049_v46, %v6490_v47  ;;  %v1077_v28 = vld [vmem:[#allocation2 + $0x24] sm:$0xe]  ;;  %v2026_v1 = vrot.slane %v5284_v44, 1  ;;  %v1783_v7 = vrot.slane %v1781_v30, 1  ;;  %v6512_v6 = vld [vmem:[#allocation2 + $0xa0] sm:$0xf] }
  0xc0   : > { %v1590_v24 = vsel %vm1557_vm0, %v1588_v9, %v1589_v0  ;;  %4945 = vmatprep.subr.bf16.mxu1 %v5301_v42  ;;  %v1772_v33 = vor.u32 %v1771_v15, %v1767_v5  ;;  %v1793_v26 = vshll.u32 %v6192_v19, 16  ;;  %v5288_v0 = vld [vmem:[#allocation2 + $0x2c] ss:$0 sps:$4 sm:$0x11]   ;;  %v5310_v5 = vld [vmem:[%s7651_s1 + $0x1c0] sm:$0xff]  }
  0xc1   : > { %v5311_v42 = vld [vmem:[%s7651_s1 + $0x180] sm:$0xff]  }
  0xc2   : > { %3246 = vmatmul.mubr.bf16.gmra.mxu0 %v4319_v37  ;;  %v1076_v37 = vld [vmem:[#allocation2 + $0x18] sm:$0xe] }
  0xc3   : > { %v985_v3 = vld [vmem:[#allocation2 + $0x84] sm:$0xf]  ;;  %v4390_v49 = vcombine.low %v1076_v37, %v6131_v17  ;;  %v5302_v17 = vld [vmem:[%s7651_s1 + $0x188] sm:$0xff]   ;;  %v1786_v37 = vshll.u32 %v5284_v44, 16 }
  0xc4   : > { %v1047_v52 = vld [vmem:[#allocation2 + $0x84] sm:$0xf]  ;;  %v4320_v60 = vcombine.low %v985_v3, %v6468_v41  ;;  %v6480_v61 = vld [vmem:[#allocation2 + $0x8c] ss:$0 sps:$4 sm:$0x11]   ;;  %v1776_v3 = vrot.slane %v1774_v13, 1  ;;  %4946 = vmatpush3.bf16.msra.mxu1 %v5302_v17 }
  0xc5   : > { %v6484_v16 = vcombine.low %v1047_v52, %v6472_v48  ;;  %v1441_v34 = vshll.u32 %v6480_v61, 16  ;;  %v1022_v18 = vld [vmem:[#allocation2 + $0x84] sm:$0xe]  ;;  %v2025_v52 = vrot.slane %v4390_v49, 1  ;;  %v1788_v15 = vrot.slane %v1786_v37, 1  ;;  %4947 = vmatprep.subr.bf16.mxu1 %v5310_v5  ;;  %v426_v37 = vld [vmem:[%s5701_s30 + $0xf0] sm:$0xff] }
  0xc6   : > { %v1434_v62 = vshrl.u32 %v4320_v60, 16  ;;  %v1436_v50 = vshll.u32 %v4320_v60, 16  ;;  %3399 = vmatmul.mubr.bf16.gmra.mxu1 %v1587_v35  ;;  %v4352_v58 = vcombine.low %v1022_v18, %v6468_v41  ;;  %v1779_v35 = vshrl.u32 %v6149_v40, 16  ;;  %v5507_v44 = vld [vmem:[#allocation2 + $0x98] ss:$0 sps:$4 sm:$0x11]  }
  0xc7   : > { %v1443_v10 = vrot.slane %v1441_v34, 1  ;;  %3406 = vmatprep.mubr.bf16.mxu1 %v6484_v16  ;;  %v1051_v34 = vld [vmem:[#allocation2 + $0x9c] sm:$0xf]  ;;  %v1777_v9 = vsel %vm1300_vm6, %v1772_v33, %v1776_v3  ;;  %v2027_v40 = vsel %vm1557_vm0, %v2025_v52, %v2026_v1  ;;  %v1791_v49 = vshrl.u32 %v6192_v19, 16  ;;  %v5304_v19 = vld [vmem:[%s7651_s1 + $0x228] sm:$0xff]   ;;  %v5313_v1 = vld [vmem:[%s7651_s1 + $0x220] sm:$0xff]  }
  0xc8   : > { %v1438_v4 = vrot.slane %v1436_v50, 1  ;;  %v1591_v41 = vrot.slane %v4352_v58, 1  ;;  %v1023_v50 = vld [vmem:[#allocation2 + $0x90] sm:$0xe]  ;;  %v1784_v18 = vor.u32 %v1783_v7, %v1779_v35  ;;  %v2029_v13 = vrot.slane %v5288_v0, 1  ;;  %4948 = vmatpush3.bf16.msra.mxu1 %v5311_v42 }
  0xc9   : > { %v6536_v17 = vld [vmem:[#allocation2 + $0xac] sm:$0xf]  ;;  %v6540_v52 = vld [vmem:[#allocation2 + $0x38] ss:$0 sps:$4 sm:$0x11]  }
  0xca   : > { %v1439_v20 = vor.u32 %v1438_v4, %v1434_v62  ;;  %v1592_v62 = vrot.slane %v6480_v61, 1  ;;  %v5294_v4 = vld [vmem:[%s7651_s1 + $0x230] sm:$0xff]   ;;  %v1789_v3 = vsel %vm1300_vm6, %v1784_v18, %v1788_v15  ;;  %v226_v7 = vld [vmem:[#allocation2 + $0xc0] sm:$0x1]  ;;  %v5320_v15 = vld [vmem:[%s7651_s1 + $0x218] sm:$0xff]  }
  0xcb   : > { %v1055_v5 = vld [vmem:[#allocation2 + $0xb4] sm:$0xf] }
  0xcc   : > { %v1444_v39 = vsel %vm1300_vm6, %v1439_v20, %v1443_v10  ;;  %v5506_v10 = vld [vmem:[#allocation2 + $0x94] sm:$0xf]  ;;  %v1593_v61 = vsel %vm1557_vm0, %v1591_v41, %v1592_v62  ;;  %v1078_v20 = vld [vmem:[#allocation2 + $0x30] sm:$0xe] }
  0xcd   : > { %3253 = vmatprep.mubr.bf16.mxu0 %v1444_v39  ;;  %v4353_v46 = vcombine.low %v1023_v50, %v5506_v10  ;;  %v1795_v39 = vrot.slane %v1793_v26, 1  ;;  %v4392_v33 = vcombine.low %v1078_v20, %v6219_v57  ;;  %v5508_v57 = vld [vmem:[#allocation2 + $0xa0] sm:$0xf]  ;;  %v1805_v26 = vshll.u32 %v6233_v12, 16 }
  0xce   : > { %3254 = vmatmul.mubr.bf16.gmra.mxu0 %v4320_v60  ;;  %3407 = vmatmul.mubr.bf16.gmra.mxu1 %v1590_v24  ;;  %v4391_v60 = vcombine.low %v1077_v28, %v6169_v59  ;;  %v6522_v59 = vcombine.low %v1051_v34, %v6512_v6  ;;  %v1595_v24 = vrot.slane %v5507_v44, 1  ;;  %v1024_v28 = vld [vmem:[#allocation2 + $0x9c] sm:$0xe] }
  0xcf   : > { %3487 = vmatprep.mubr.bf16.mxu0 %v2024_v25  ;;  %3414 = vmatprep.mubr.bf16.mxu1 %v6499_v32  ;;  %v1798_v25 = vshll.u32 %v5288_v0, 16  ;;  %v1594_v58 = vrot.slane %v4353_v46, 1  ;;  %v4354_v50 = vcombine.low %v1024_v28, %v5508_v57  ;;  %v427_v34 = vld [vmem:[%s5701_s30 + $0xf8] sm:$0xff]  ;;  %v2031_v46 = vrot.slane %v4392_v33, 1  ;;  %s5514_s30 = scalar_lea.vmem %s7603_s20, 4096 }
  0xd0   : > { %v2028_v30 = vrot.slane %v4391_v60, 1  ;;  %v227_v60 = vsel %vm5718_vm5, 0, %v226_v7  ;;  %v4595_v0 = vpack.c.bf16 %v427_v34, %v427_v34  ;;  %v5298_v28 = vld [vmem:[#allocation2 + $0x44] ss:$0 sps:$4 sm:$0x11]   ;;  %p5515_p11 = scmp.ne.s32.totalorder %s7603_s20, %s5514_s30  ;;  %p5522_p1 = scmp.lt.s32.totalorder %s5520_s29, %s5514_s30 }
  0xd1   : > { %v1596_v41 = vsel %vm1557_vm0, %v1594_v58, %v1595_v24  ;;  %228 = vst [vmem:[#allocation2 + $0xc0] sm:$0x1] %v227_v60  ;;  %v1800_v10 = vrot.slane %v1798_v25, 1  ;;  %v1025_v25 = vld [vmem:[#allocation2 + $0xa8] sm:$0xe]  ;;  %v1803_v58 = vshrl.u32 %v6233_v12, 16 }
  0xd2   : > { %v2030_v35 = vsel %vm1557_vm0, %v2028_v30, %v2029_v13  ;;  %v790_v20 = vshrl.u32 %v4595_v0, 16  ;;  %v793_v18 = vshll.u32 %v4595_v0, 16  ;;  %v1597_v30 = vrot.slane %v4354_v50, 1  ;;  %v1092_v34 = vld [vmem:[#allocation2 + $0x18] sm:$0xf]  ;;  %p5516_p12 = pnand %p5515_p11, %p5638_p5  ;;  %p5523_p2 = por %p5522_p1, %p5521_p0 }
  0xd3   : > { %v1080_v0 = vld [vmem:[#allocation2 + $0x48] sm:$0xe] }
  0xd4   : > { %v6565_v24 = vrot.slane %v790_v20, 7  ;;  %p5517_p13 = pneg %p5516_p12 }
  0xd6   : > { %3488 = vmatmul.mubr.bf16.vlgmr.msra.gmra.mxu0 %v1777_v9  ;;  %3415 = vmatmul.mubr.bf16.gmra.mxu1 %v1593_v61  ;;  %v6555_v9 = vpack.c.bf16 %v426_v37, %v426_v37  ;;  %v2032_v61 = vrot.slane %v6540_v52, 1  ;;  %v795_v7 = vor.u32 %v793_v18, %v6565_v24  ;;  %v5327_v37 = vld [vmem:[%s7651_s1 + $0x210] sm:$0xff]   ;;  %p5524_p3 = pnand %p5523_p2, %p5517_p13 }
  0xd7   : > { %3495 = vmatprep.mubr.bf16.mxu0 %v2027_v40  ;;  %5070 = vmatpush3.bf16.msra.mxu0 %v6442_v11  ;;  %v1053_v11 = vld [vmem:[#allocation2 + $0xa8] sm:$0xf]  ;;  %v1079_v40 = vld [vmem:[#allocation2 + $0x3c] sm:$0xe] }
  0xd8   : > { %5071 = vmatprep.subr.bf16.mxu0 %v5294_v4  ;;  %3422 = vmatprep.mubr.bf16.mxu1 %v6522_v59  ;;  %v6549_v62 = vcombine.low %v1053_v11, %v6536_v17  ;;  %v782_v23 = vshrl.u32 %v6555_v9, 16  ;;  %v1810_v11 = vshll.u32 %v6540_v52, 16  ;;  %v4393_v33 = vcombine.low %v1079_v40, %v6247_v2  ;;  %v5510_v52 = vld [vmem:[#allocation2 + $0xac] sm:$0xf] }
  0xd9   : > { %v4355_v57 = vcombine.low %v1025_v25, %v5510_v52  ;;  %v1817_v2 = vshll.u32 %v6273_v63, 16 }
  0xda   : > { %v784_v44 = vrot.slane %v782_v23, 7 }
  0xdb   : > { %5072 = vmatpush3.bf16.msra.mxu0 %v5294_v4  ;;  %v1796_v4 = vor.u32 %v1795_v39, %v1791_v49  ;;  %v5509_v49 = vld [vmem:[#allocation2 + $0xa4] ss:$0 sps:$4 sm:$0x11]   ;;  %v6563_v39 = vld [vmem:[#allocation2 + $0xb8] sm:$0xf]  ;;  %v1600_v51 = vrot.slane %v4355_v57, 1 }
  0xdc   : > { %5073 = vmatprep.subr.bf16.mxu0 %v5304_v19  ;;  %v1598_v13 = vrot.slane %v5509_v49, 1  ;;  %v6578_v12 = vcombine.low %v1055_v5, %v6563_v39  ;;  %v5511_v5 = vld [vmem:[#allocation2 + $0xb0] ss:$0 sps:$4 sm:$0x11]   ;;  %v1819_v18 = vrot.slane %v1817_v2, 1  ;;  %v1822_v49 = vshll.u32 %v5298_v28, 16 }
  0xdd   : > { %v1801_v42 = vsel %vm1300_vm6, %v1796_v4, %v1800_v10  ;;  %v1812_v4 = vrot.slane %v1810_v11, 1  ;;  %v785_v10 = vshll.u32 %v6555_v9, 16  ;;  %v1601_v23 = vrot.slane %v5511_v5, 1  ;;  %v5341_v11 = vld [vmem:[%s7651_s1 + $0x200] sm:$0xff]   ;;  %v1081_v57 = vld [vmem:[#allocation2 + $0x54] sm:$0xe] }
  0xde   : > { %3496 = vmatmul.mubr.bf16.gmra.mxu0 %v1789_v3  ;;  %3423 = vmatmul.mubr.bf16.gmra.mxu1 %v1596_v41  ;;  %v2033_v3 = vsel %vm1557_vm0, %v2031_v46, %v2032_v61  ;;  %v1599_v41 = vsel %vm1557_vm0, %v1597_v30, %v1598_v13  ;;  %v2034_v46 = vrot.slane %v4393_v33, 1  ;;  %v2035_v61 = vrot.slane %v5298_v28, 1  ;;  %v5303_v13 = vld [vmem:[#allocation2 + $0x50] ss:$0 sps:$4 sm:$0x11]  }
  0xdf   : > { %3503 = vmatprep.mubr.bf16.mxu0 %v2030_v35  ;;  %5074 = vmatpush3.bf16.msra.mxu0 %v5304_v19  ;;  %v1807_v19 = vrot.slane %v1805_v26, 1  ;;  %v788_v35 = vrot.slane %v784_v44, 4  ;;  %v6585_v26 = vld [vmem:[#allocation2 + $0x1c] sm:$0xf]  ;;  %v1815_v9 = vshrl.u32 %v6273_v63, 16  ;;  %v787_v25 = vor.u32 %v785_v10, %v784_v44 }
  0xe0   : > { %5075 = vmatprep.subr.bf16.mxu0 %v5313_v1  ;;  %3430 = vmatprep.mubr.bf16.mxu1 %v6549_v62  ;;  %v6594_v20 = vcombine.low %v1092_v34, %v6585_v26  ;;  %v1829_v63 = vshll.u32 %v6310_v43, 16  ;;  %v4395_v10 = vcombine.low %v1081_v57, %v6338_v36 }
  0xe1   : > { %v796_v60 = vsel %vm5766_vm10, %v788_v35, %v795_v7  ;;  %v1808_v40 = vor.u32 %v1807_v19, %v1803_v58  ;;  %v1026_v58 = vld [vmem:[#allocation2 + $0xb4] sm:$0xe]  ;;  %v6600_v19 = vld [vmem:[#allocation2 + $0x20] ss:$0 sps:$4 sm:$0x11]   ;;  %v1820_v28 = vor.u32 %v1819_v18, %v1815_v9  ;;  %v1824_v7 = vrot.slane %v1822_v49, 1 }
  0xe2   : > { %959 = vst.msk [vmem:[#allocation2 + $0xc4] sm:$0xf] %vm846_vm12, %v796_v60  ;;  %v2233_v33 = vshll.u32 %v6594_v20, 16  ;;  %v6608_v35 = vld [vmem:[#allocation2 + $0x28] sm:$0xf]  ;;  %v2231_v60 = vshrl.u32 %v6594_v20, 16 }
  0xe3   : > { %5076 = vmatpush3.bf16.msra.mxu0 %v5313_v1  ;;  %v389_v1 = vld [vmem:[#allocation2 + $0xc0] sm:$0xf]  ;;  %v1813_v30 = vsel %vm1300_vm6, %v1808_v40, %v1812_v4  ;;  %v1827_v4 = vshrl.u32 %v6310_v43, 16  ;;  %v1831_v21 = vrot.slane %v1829_v63, 1 }
  0xe4   : > { %5077 = vmatprep.subr.bf16.mxu0 %v5320_v15  ;;  %v390_v50 = vsel %vm5752_vm9, 0, %v389_v1  ;;  %v5512_v1 = vld [vmem:[#allocation2 + $0xb8] sm:$0xf]  ;;  %v2235_v34 = vrot.slane %v2233_v33, 1 }
  0xe5   : > { %391 = vst [vmem:[#allocation2 + $0xc0] sm:$0xf] %v390_v50  ;;  %v4356_v2 = vcombine.low %v1026_v58, %v5512_v1  ;;  %v2238_v50 = vshll.u32 %v6600_v19, 16  ;;  %v5513_v9 = vld [vmem:[#allocation2 + $0xbc] ss:$0 sps:$4 sm:$0x11]  }
  0xe6   : > { %3504 = vmatmul.mubr.bf16.gmra.mxu0 %v1801_v42  ;;  %3431 = vmatmul.mubr.bf16.gmra.mxu1 %v1599_v41  ;;  %v2036_v42 = vsel %vm1557_vm0, %v2034_v46, %v2035_v61  ;;  %v2038_v41 = vrot.slane %v5303_v13, 1  ;;  %v1825_v46 = vsel %vm1300_vm6, %v1820_v28, %v1824_v7  ;;  %v1604_v18 = vrot.slane %v5513_v9, 1  ;;  %v6629_v58 = vld [vmem:[#allocation2 + $0x34] sm:$0xf] }
  0xe7   : > { %3511 = vmatprep.mubr.bf16.mxu0 %v2033_v3  ;;  %5078 = vmatpush3.bf16.msra.mxu0 %v5320_v15  ;;  %v4394_v15 = vcombine.low %v1080_v0, %v6291_v38  ;;  %v1602_v38 = vsel %vm1557_vm0, %v1600_v51, %v1601_v23  ;;  %v1094_v3 = vld [vmem:[#allocation2 + $0x24] sm:$0xf]  ;;  %v5307_v51 = vld [vmem:[#allocation2 + $0x5c] ss:$0 sps:$4 sm:$0x11]   ;;  %v1603_v23 = vrot.slane %v4356_v2, 1  ;;  %v2236_v43 = vor.u32 %v2235_v34, %v2231_v60 }
  0xe8   : > { %5079 = vmatprep.subr.bf16.mxu0 %v5327_v37  ;;  %3438 = vmatprep.mubr.bf16.mxu1 %v6578_v12  ;;  %v6615_v0 = vcombine.low %v1094_v3, %v6608_v35  ;;  %v2041_v28 = vrot.slane %v5307_v51, 1  ;;  %v1083_v2 = vld [vmem:[#allocation2 + $0x6c] sm:$0xe]  ;;  %v1853_v9 = vshll.u32 %v6394_v53, 16 }
  0xe9   : > { %v6623_v49 = vld [vmem:[#allocation2 + $0xc4] sm:$0xf]  ;;  %v1605_v3 = vsel %vm1557_vm0, %v1603_v23, %v1604_v18  ;;  %v6648_v23 = vld [vmem:[#allocation2 + $0x38] ss:$0 sps:$4 sm:$0x11]  }
  0xea   : > { %v2245_v36 = vshll.u32 %v6615_v0, 16  ;;  %v2243_v7 = vshrl.u32 %v6615_v0, 16 }
  0xeb   : > { %5080 = vmatpush3.bf16.msra.mxu0 %v5327_v37  ;;  %v2037_v37 = vrot.slane %v4394_v15, 1  ;;  %v2240_v15 = vrot.slane %v2238_v50, 1  ;;  %v1839_v50 = vshrl.u32 %v6358_v31, 16 }
  0xec   : > { %5081 = vmatprep.subr.bf16.mxu0 %v5334_v45  ;;  %v956_v44 = vld [vmem:[#allocation2 + $0xc0] sm:$0xf] }
  0xed   : > { %v957_v52 = vsel %vm5813_vm14, %v787_v25, %v956_v44  ;;  %v2039_v61 = vsel %vm1557_vm0, %v2037_v37, %v2038_v41  ;;  %v6625_v25 = vld [vmem:[#allocation2 + $0x2c] ss:$0 sps:$4 sm:$0x11]   ;;  %v1082_v37 = vld [vmem:[#allocation2 + $0x60] sm:$0xe]  ;;  %v2241_v41 = vsel %vm1300_vm6, %v2236_v43, %v2240_v15 }
  0xee   : > { %3512 = vmatmul.mubr.bf16.gmra.mxu0 %v1813_v30  ;;  %3439 = vmatmul.mubr.bf16.gmra.mxu1 %v1602_v38  ;;  %958 = vst [vmem:[#allocation2 + $0xc0] sm:$0xf] %v957_v52  ;;  %v2040_v38 = vrot.slane %v4395_v10, 1  ;;  %v2247_v52 = vrot.slane %v2245_v36, 1  ;;  %v2250_v57 = vshll.u32 %v6625_v25, 16 }
  0xef   : > { %3519 = vmatprep.mubr.bf16.mxu0 %v2036_v42  ;;  %5082 = vmatpush3.bf16.msra.mxu0 %v5334_v45  ;;  %v1834_v45 = vshll.u32 %v5303_v13, 16  ;;  %v1841_v42 = vshll.u32 %v6358_v31, 16  ;;  %v1096_v13 = vld [vmem:[#allocation2 + $0x30] sm:$0xf] }
  0xf0   : > { %5083 = vmatprep.subr.bf16.mxu0 %v5341_v11  ;;  %v6639_v1 = vcombine.low %v1096_v13, %v6629_v58  ;;  %v2042_v10 = vsel %vm1557_vm0, %v2040_v38, %v2041_v28  ;;  %v1855_v28 = vrot.slane %v1853_v9, 1 }
  0xf1   : > { %v1836_v63 = vrot.slane %v1834_v45, 1  ;;  %v1843_v60 = vrot.slane %v1841_v42, 1  ;;  %v2248_v45 = vor.u32 %v2247_v52, %v2243_v7  ;;  %v1851_v42 = vshrl.u32 %v6394_v53, 16  ;;  %v276_v7 = vld [vmem:[#allocation2 + $0xc8] sm:$0x1] }
  0xf2   : > { %v2257_v31 = vshll.u32 %v6639_v1, 16  ;;  %v2255_v38 = vshrl.u32 %v6639_v1, 16  ;;  %v277_v52 = vsel %vm5729_vm7, 0, %v276_v7 }
  0xf3   : > { %5084 = vmatpush3.bf16.msra.mxu0 %v5341_v11  ;;  %v1832_v11 = vor.u32 %v1831_v21, %v1827_v4  ;;  %v5312_v4 = vld [vmem:[#allocation2 + $0x68] ss:$0 sps:$4 sm:$0x11]   ;;  %v4396_v21 = vcombine.low %v1082_v37, %v6388_v29  ;;  %v1844_v18 = vor.u32 %v1843_v60, %v1839_v50  ;;  %278 = vst [vmem:[#allocation2 + $0xc8] sm:$0x1] %v277_v52 }
  0xf4   : > { %v4613_v40 = vpop.f32.mrf.mxu0  ;;  %v2044_v36 = vrot.slane %v5312_v4, 1  ;;  %v1858_v13 = vshll.u32 %v5312_v4, 16  ;;  %v1100_v4 = vld [vmem:[#allocation2 + $0x48] sm:$0xf] }
  0xf5   : > { %v1057_v33 = vld [vmem:[#allocation2 + $0xc0] sm:$0xf]  ;;  %v1837_v34 = vsel %vm1300_vm6, %v1832_v11, %v1836_v63  ;;  %v2043_v43 = vrot.slane %v4396_v21, 1  ;;  %v6657_v11 = vld [vmem:[#allocation2 + $0x78] sm:$0xe] }
  0xf6   : > { %v4614_v5 = vpop.f32.mrf.mxu0  ;;  %3520 = vmatmul.mubr.bf16.gmra.mxu0 %v1825_v46  ;;  %v6632_v44 = vcombine.low %v1057_v33, %v6623_v49  ;;  %v1098_v46 = vld [vmem:[#allocation2 + $0x3c] sm:$0xf]  ;;  %v2259_v33 = vrot.slane %v2257_v31, 1  ;;  %v1860_v50 = vrot.slane %v1858_v13, 1 }
  0xf7   : > { %v6621_v30 = vadd.f32 %v4614_v5, %v4613_v40  ;;  %3527 = vmatprep.mubr.bf16.mxu0 %v2039_v61  ;;  %v1846_v40 = vshll.u32 %v5307_v51, 16  ;;  %v6646_v61 = vld [vmem:[#allocation2 + $0x40] sm:$0xf]  ;;  %v2252_v5 = vrot.slane %v2250_v57, 1  ;;  %v4397_v51 = vcombine.low %v1083_v2, %v6430_v54 }
  0xf8   : > { %3446 = vmatprep.mubr.bf16.mxu1 %v6632_v44  ;;  %v6654_v15 = vcombine.low %v1098_v46, %v6646_v61  ;;  %v2262_v54 = vshll.u32 %v6648_v23, 16  ;;  %v1865_v57 = vshll.u32 %v6434_v56, 16  ;;  %v2045_v2 = vsel %vm1557_vm0, %v2043_v43, %v2044_v36  ;;  %v6671_v21 = vpop.f32.mrf.mxu0  ;;  %v1140_v46 = vld [vmem:[#allocation2 + $0x18] sm:$0xe]  ;;  %v1141_v36 = vld [vmem:[#allocation2 + $0x24] sm:$0xe] }
  0xf9   : > { %3447 = vmatmul.mubr.bf16.gmra.mxu1 %v1605_v3  ;;  %v1848_v29 = vrot.slane %v1846_v40, 1  ;;  %v2253_v63 = vsel %vm1300_vm6, %v2248_v45, %v2252_v5  ;;  %v5316_v3 = vld [vmem:[#allocation2 + $0x74] ss:$0 sps:$4 sm:$0x11]   ;;  %v2046_v60 = vrot.slane %v4397_v51, 1  ;;  %v1877_v51 = vshll.u32 %v6461_v8, 16 }
  0xfa   : > { %3648 = vmatprep.mubr.bf16.mxu1 %v2241_v41  ;;  %v6664_v41 = vld [vmem:[#allocation2 + $0x44] ss:$0 sps:$4 sm:$0x11]   ;;  %v2269_v53 = vshll.u32 %v6654_v15, 16  ;;  %v2264_v40 = vrot.slane %v2262_v54, 1  ;;  %v2047_v45 = vrot.slane %v5316_v3, 1  ;;  %v4437_v43 = vcombine.low %v1140_v46, %v6585_v26 }
  0xfb   : > { %v1849_v37 = vsel %vm1300_vm6, %v1844_v18, %v1848_v29  ;;  %v2267_v5 = vshrl.u32 %v6654_v15, 16  ;;  %v2274_v9 = vshll.u32 %v6664_v41, 16  ;;  %v1863_v18 = vshrl.u32 %v6434_v56, 16 }
  0xfc   : > { %v2271_v31 = vrot.slane %v2269_v53, 1  ;;  %v1870_v13 = vshll.u32 %v5316_v3, 16  ;;  %v2490_v56 = vrot.slane %v6625_v25, 1  ;;  %v2486_v26 = vrot.slane %v4437_v43, 1  ;;  %v1085_v43 = vld [vmem:[#allocation2 + $0x84] sm:$0xe] }
  0xfd   : > { %v2048_v7 = vsel %vm1557_vm0, %v2046_v60, %v2047_v45  ;;  %v6696_v53 = vld [vmem:[#allocation2 + $0x50] ss:$0 sps:$4 sm:$0x11]   ;;  %v1102_v45 = vld [vmem:[#allocation2 + $0x54] sm:$0xf] }
  0xfe   : > { %3528 = vmatmul.mubr.bf16.gmra.mxu0 %v1837_v34  ;;  %v2260_v34 = vor.u32 %v2259_v33, %v2255_v38  ;;  %v6687_v38 = vcombine.low %v1100_v4, %v6675_v27  ;;  %v6689_v33 = vpop.f32.mrf.mxu0  ;;  %v2272_v3 = vor.u32 %v2271_v31, %v2267_v5  ;;  %v1872_v4 = vrot.slane %v1870_v13, 1  ;;  %v1103_v31 = vld [vmem:[#allocation2 + $0x58] sm:$0xf] }
  0xff   : > { %3535 = vmatprep.mubr.bf16.mxu0 %v2042_v10  ;;  %v1856_v10 = vor.u32 %v1855_v28, %v1851_v42  ;;  %v1867_v42 = vrot.slane %v1865_v57, 1  ;;  %v393_v57 = vld [vmem:[#allocation2 + $0xc8] sm:$0x1]  ;;  %v2493_v5 = vrot.slane %v6648_v23, 1 }
 0x101   : > { %3649 = vmatmul.mubr.bf16.vlgmr.msra.gmra.mxu1 %v6594_v20  ;;  %v4398_v20 = vcombine.low %v6657_v11, %v6458_v22  ;;  %v2487_v22 = vrot.slane %v6600_v19, 1  ;;  %v6683_v11 = vld [vmem:[#allocation2 + $0x80] ss:$0 sps:$4 sm:$0x11]   ;;  %v1861_v54 = vsel %vm1300_vm6, %v1856_v10, %v1860_v50  ;;  %v4438_v19 = vcombine.low %v1141_v36, %v6608_v35 }
 0x102   : > { %3656 = vmatprep.mubr.bf16.mxu1 %v2253_v63  ;;  %v2265_v63 = vsel %vm1300_vm6, %v2260_v34, %v2264_v40  ;;  %v797_v50 = vrot.slane %v6565_v24, 4  ;;  %v394_v34 = vsel %vm5777_vm11, 0, %v393_v57  ;;  %v1868_v40 = vor.u32 %v1867_v42, %v1863_v18 }
 0x103   : > { %v6704_v35 = vsel %vm1557_vm0, %v2486_v26, %v2487_v22  ;;  %v2489_v60 = vrot.slane %v4438_v19, 1  ;;  %v2281_v10 = vshll.u32 %v6687_v38, 16  ;;  %395 = vst [vmem:[#allocation2 + $0xc8] sm:$0x1] %v394_v34  ;;  %v2496_v18 = vrot.slane %v6664_v41, 1 }
 0x104   : > { %v2049_v22 = vrot.slane %v4398_v20, 1  ;;  %v2050_v36 = vrot.slane %v6683_v11, 1  ;;  %v2286_v41 = vshll.u32 %v6696_v53, 16  ;;  %v6722_v26 = vcombine.low %v1102_v45, %v1103_v31  ;;  %v1145_v19 = vld [vmem:[#allocation2 + $0x54] sm:$0xe] }
 0x105   : > { %v4685_v29 = vpop.f32.mrf.mxu1  ;;  %v6709_v55 = vsel %vm1557_vm0, %v2489_v60, %v2490_v56  ;;  %v1873_v34 = vsel %vm1300_vm6, %v1868_v40, %v1872_v4  ;;  %v1879_v60 = vrot.slane %v1877_v51, 1  ;;  %v2499_v45 = vrot.slane %v6696_v53, 1 }
 0x106   : > { %3536 = vmatmul.mubr.bf16.gmra.mxu0 %v1849_v37  ;;  %v2276_v37 = vrot.slane %v2274_v9, 1  ;;  %v2293_v40 = vshll.u32 %v6722_v26, 16 }
 0x107   : > { %3543 = vmatprep.mubr.bf16.mxu0 %v2045_v2  ;;  %v4686_v28 = vpop.f32.mrf.mxu1  ;;  %v1142_v2 = vld [vmem:[#allocation2 + $0x30] sm:$0xe] }
 0x108   : > { %v6698_v52 = vadd.f32 %v4686_v28, %v4685_v29  ;;  %v4439_v9 = vcombine.low %v1142_v2, %v6629_v58  ;;  %v2277_v42 = vsel %vm1300_vm6, %v2272_v3, %v2276_v37  ;;  %v1875_v3 = vshrl.u32 %v6461_v8, 16  ;;  %v5336_v37 = vld [vmem:[#allocation2 + $0x5c] ss:$0 sps:$4 sm:$0x11]  }
 0x109   : > { %3657 = vmatmul.mubr.bf16.gmra.mxu1 %v6615_v0  ;;  %v4688_v25 = vpop.f32.mrf.mxu1  ;;  %v1143_v0 = vld [vmem:[#allocation2 + $0x3c] sm:$0xe] }
 0x10a   : > { %3664 = vmatprep.mubr.bf16.mxu1 %v2265_v63  ;;  %v4619_v46 = vpop.f32.mrf.mxu0  ;;  %v4440_v29 = vcombine.low %v1143_v0, %v6646_v61  ;;  %v1144_v63 = vld [vmem:[#allocation2 + $0x48] sm:$0xe]  ;;  %v2492_v58 = vrot.slane %v4439_v9, 1  ;;  %v2283_v61 = vrot.slane %v2281_v10, 1  ;;  %v2051_v10 = vsel %vm1557_vm0, %v2049_v22, %v2050_v36 }
 0x10b   : > { %v4689_v24 = vpop.f32.mrf.mxu1  ;;  %v4441_v20 = vcombine.low %v1144_v63, %v6675_v27  ;;  %v1882_v27 = vshll.u32 %v6683_v11, 16  ;;  %v5323_v0 = vld [vmem:[#allocation2 + $0x8c] ss:$0 sps:$4 sm:$0x11]   ;;  %v6747_v11 = vld [vmem:[#allocation2 + $0x64] sm:$0xf] }
 0x10c   : > { %v4620_v23 = vpop.f32.mrf.mxu0  ;;  %v6716_v13 = vadd.f32 %v4689_v24, %v4688_v25  ;;  %v2495_v28 = vrot.slane %v4440_v29, 1  ;;  %v6730_v2 = vsel %vm1557_vm0, %v2492_v58, %v2493_v5  ;;  %v4442_v5 = vcombine.low %v1145_v19, %v1103_v31 }
 0x10d   : > { %v6719_v56 = vadd.f32 %v4620_v23, %v4619_v46  ;;  %v960_v46 = vld [vmem:[#allocation2 + $0xc8] sm:$0x1]  ;;  %v2502_v24 = vrot.slane %v5336_v37, 1  ;;  %v2288_v29 = vrot.slane %v2286_v41, 1  ;;  %v1889_v31 = vshll.u32 %v6484_v16, 16 }
 0x10e   : > { %3544 = vmatmul.mubr.bf16.gmra.mxu0 %v1861_v54  ;;  %v2279_v54 = vshrl.u32 %v6687_v38, 16  ;;  %v6727_v57 = vpop.f32.mrf.mxu0  ;;  %v6733_v25 = vsel %vm1557_vm0, %v2495_v28, %v2496_v18  ;;  %v961_v8 = vsel %vm5825_vm15, %v797_v50, %v960_v46  ;;  %v2501_v53 = vrot.slane %v4442_v5, 1  ;;  %v1086_v23 = vld [vmem:[#allocation2 + $0x90] sm:$0xe] }
 0x10f   : > { %3551 = vmatprep.mubr.bf16.mxu0 %v2048_v7  ;;  %v4399_v7 = vcombine.low %v1085_v43, %v6472_v48  ;;  %v2498_v48 = vrot.slane %v4441_v20, 1  ;;  %962 = vst [vmem:[#allocation2 + $0xc8] sm:$0x1] %v961_v8  ;;  %v1880_v18 = vor.u32 %v1879_v60, %v1875_v3  ;;  %v1884_v43 = vrot.slane %v1882_v27, 1 }
 0x110   : > { %v2284_v9 = vor.u32 %v2283_v61, %v2279_v54  ;;  %v6745_v51 = vpop.f32.mrf.mxu0  ;;  %v2053_v14 = vrot.slane %v5323_v0, 1  ;;  %v2298_v50 = vshll.u32 %v5336_v37, 16  ;;  %v2291_v54 = vshrl.u32 %v6722_v26, 16 }
 0x111   : > { %3665 = vmatmul.mubr.bf16.gmra.mxu1 %v6639_v1  ;;  %v1104_v1 = vld [vmem:[#allocation2 + $0x60] sm:$0xf]  ;;  %v6750_v4 = vsel %vm1557_vm0, %v2498_v48, %v2499_v45  ;;  %v2052_v36 = vrot.slane %v4399_v7, 1  ;;  %v2295_v58 = vrot.slane %v2293_v40, 1  ;;  %v1885_v19 = vsel %vm1300_vm6, %v1880_v18, %v1884_v43  ;;  %v1087_v18 = vld [vmem:[#allocation2 + $0x9c] sm:$0xe] }
 0x112   : > { %3672 = vmatprep.mubr.bf16.mxu1 %v2277_v42  ;;  %v6754_v42 = vsel %vm1557_vm0, %v2501_v53, %v2502_v24  ;;  %v2289_v63 = vsel %vm1300_vm6, %v2284_v9, %v2288_v29  ;;  %v6759_v61 = vcombine.low %v1104_v1, %v6747_v11  ;;  %v1887_v7 = vshrl.u32 %v6484_v16, 16  ;;  %v5326_v48 = vld [vmem:[#allocation2 + $0x98] ss:$0 sps:$4 sm:$0x11]   ;;  %v6775_v29 = vld [vmem:[#allocation2 + $0x70] sm:$0xf] }
 0x113   : > { %v1891_v3 = vrot.slane %v1889_v31, 1  ;;  %v1894_v37 = vshll.u32 %v5323_v0, 16  ;;  %v4400_v60 = vcombine.low %v1086_v23, %v6490_v47  ;;  %v2054_v27 = vsel %vm1557_vm0, %v2052_v36, %v2053_v14  ;;  %v6770_v9 = vld [vmem:[#allocation2 + $0x68] ss:$0 sps:$4 sm:$0x11]  }
 0x114   : > { %v2296_v45 = vor.u32 %v2295_v58, %v2291_v54  ;;  %v2305_v16 = vshll.u32 %v6759_v61, 16  ;;  %v1901_v47 = vshll.u32 %v6499_v32, 16  ;;  %v2056_v53 = vrot.slane %v5326_v48, 1 }
 0x115   : > { %v4691_v22 = vpop.f32.mrf.mxu1  ;;  %v1892_v40 = vor.u32 %v1891_v3, %v1887_v7  ;;  %v1896_v8 = vrot.slane %v1894_v37, 1  ;;  %v2055_v1 = vrot.slane %v4400_v60, 1  ;;  %v2303_v31 = vshrl.u32 %v6759_v61, 16  ;;  %v6789_v3 = vld [vmem:[#allocation2 + $0x74] ss:$0 sps:$4 sm:$0x11]  }
 0x116   : > { %3552 = vmatmul.mubr.bf16.gmra.mxu0 %v1873_v34  ;;  %v2310_v36 = vshll.u32 %v6770_v9, 16  ;;  %v1903_v54 = vrot.slane %v1901_v47, 1  ;;  %v1906_v58 = vshll.u32 %v5326_v48, 16  ;;  %v1108_v48 = vld [vmem:[#allocation2 + $0x78] sm:$0xf] }
 0x117   : > { %3559 = vmatprep.mubr.bf16.mxu0 %v2051_v10  ;;  %v4692_v28 = vpop.f32.mrf.mxu1  ;;  %v2300_v10 = vrot.slane %v2298_v50, 1  ;;  %v1897_v23 = vsel %vm1300_vm6, %v1892_v40, %v1896_v8  ;;  %v2322_v40 = vshll.u32 %v6789_v3, 16  ;;  %v1088_v8 = vld [vmem:[#allocation2 + $0xa8] sm:$0xe] }
 0x118   : > { %v6761_v41 = vadd.f32 %v4692_v28, %v4691_v22  ;;  %v4625_v20 = vpop.f32.mrf.mxu0  ;;  %v2307_v22 = vrot.slane %v2305_v16, 1  ;;  %v4401_v28 = vcombine.low %v1087_v18, %v6512_v6  ;;  %v1913_v6 = vshll.u32 %v6522_v59, 16 }
 0x119   : > { %3673 = vmatmul.mubr.bf16.gmra.mxu1 %v6654_v15  ;;  %v4694_v34 = vpop.f32.mrf.mxu1  ;;  %v1106_v15 = vld [vmem:[#allocation2 + $0x6c] sm:$0xf]  ;;  %v2301_v43 = vsel %vm1300_vm6, %v2296_v45, %v2300_v10  ;;  %v6794_v10 = vld [vmem:[#allocation2 + $0x7c] sm:$0xf] }
 0x11a   : > { %3680 = vmatprep.mubr.bf16.mxu1 %v2289_v63  ;;  %v4626_v46 = vpop.f32.mrf.mxu0  ;;  %v6782_v14 = vcombine.low %v1106_v15, %v6775_v29  ;;  %v1899_v63 = vshrl.u32 %v6499_v32, 16  ;;  %v2308_v37 = vor.u32 %v2307_v22, %v2303_v31  ;;  %v2058_v45 = vrot.slane %v4401_v28, 1 }
 0x11b   : > { %v6768_v5 = vadd.f32 %v4626_v46, %v4625_v20  ;;  %v4695_v24 = vpop.f32.mrf.mxu1  ;;  %v2057_v20 = vsel %vm1557_vm0, %v2055_v1, %v2056_v53  ;;  %v1908_v46 = vrot.slane %v1906_v58, 1  ;;  %v6805_v18 = vcombine.low %v1108_v48, %v6794_v10 }
 0x11c   : > { %v6773_v0 = vadd.f32 %v4695_v24, %v4694_v34  ;;  %v2312_v34 = vrot.slane %v2310_v36, 1  ;;  %v6797_v16 = vpop.f32.mrf.mxu0  ;;  %v2315_v47 = vshrl.u32 %v6782_v14, 16  ;;  %v1911_v22 = vshrl.u32 %v6522_v59, 16  ;;  %v1110_v59 = vld [vmem:[#allocation2 + $0x84] sm:$0xf] }
 0x11d   : > { %v1915_v36 = vrot.slane %v1913_v6, 1  ;;  %v2327_v6 = vshrl.u32 %v6805_v18, 16 }
 0x11e   : > { %3560 = vmatmul.mubr.bf16.gmra.mxu0 %v1885_v19  ;;  %v5330_v19 = vld [vmem:[#allocation2 + $0xa4] ss:$0 sps:$4 sm:$0x11]   ;;  %v2313_v1 = vsel %vm1300_vm6, %v2308_v37, %v2312_v34  ;;  %v6812_v58 = vpop.f32.mrf.mxu0  ;;  %v2329_v37 = vshll.u32 %v6805_v18, 16  ;;  %v6817_v34 = vld [vmem:[#allocation2 + $0x88] sm:$0xf] }
 0x11f   : > { %3567 = vmatprep.mubr.bf16.mxu0 %v2054_v27  ;;  %v2317_v27 = vshll.u32 %v6782_v14, 16  ;;  %v2059_v24 = vrot.slane %v5330_v19, 1 }
 0x121   : > { %v4697_v50 = vpop.f32.mrf.mxu1  ;;  %3681 = vmatmul.mubr.bf16.gmra.mxu1 %v6687_v38  ;;  %v1904_v38 = vor.u32 %v1903_v54, %v1899_v63  ;;  %v2319_v31 = vrot.slane %v2317_v27, 1  ;;  %v2060_v63 = vsel %vm1557_vm0, %v2058_v45, %v2059_v24  ;;  %v5333_v54 = vld [vmem:[#allocation2 + $0xb0] ss:$0 sps:$4 sm:$0x11]   ;;  %v2331_v45 = vrot.slane %v2329_v37, 1 }
 0x122   : > { %3688 = vmatprep.mubr.bf16.mxu1 %v2301_v43 }
 0x123   : > { %v4698_v7 = vpop.f32.mrf.mxu1  ;;  %v1909_v43 = vsel %vm1300_vm6, %v1904_v38, %v1908_v46  ;;  %v2320_v28 = vor.u32 %v2319_v31, %v2315_v47  ;;  %v1089_v38 = vld [vmem:[#allocation2 + $0xb4] sm:$0xe]  ;;  %v1923_v47 = vshrl.u32 %v6549_v62, 16  ;;  %v1930_v31 = vshll.u32 %v5333_v54, 16 }
 0x124   : > { %v6791_v60 = vadd.f32 %v4698_v7, %v4697_v50  ;;  %v1918_v50 = vshll.u32 %v5330_v19, 16  ;;  %v6814_v7 = vld [vmem:[#allocation2 + $0x80] ss:$0 sps:$4 sm:$0x11]  }
 0x125   : > { %v4700_v32 = vpop.f32.mrf.mxu1  ;;  %v2334_v24 = vshll.u32 %v6814_v7, 16 }
 0x126   : > { %3568 = vmatmul.mubr.bf16.gmra.mxu0 %v1897_v23  ;;  %v4402_v23 = vcombine.low %v1088_v8, %v6536_v17  ;;  %v1916_v17 = vor.u32 %v1915_v36, %v1911_v22  ;;  %v1920_v19 = vrot.slane %v1918_v50, 1  ;;  %v4403_v22 = vcombine.low %v1089_v38, %v6563_v39  ;;  %v5337_v50 = vld [vmem:[#allocation2 + $0xbc] ss:$0 sps:$4 sm:$0x11]  }
 0x127   : > { %3575 = vmatprep.mubr.bf16.mxu0 %v2057_v20  ;;  %v4701_v15 = vpop.f32.mrf.mxu1  ;;  %v2324_v20 = vrot.slane %v2322_v40, 1 }
 0x128   : > { %v6802_v53 = vadd.f32 %v4701_v15, %v4700_v32  ;;  %v2061_v27 = vrot.slane %v4402_v23, 1  ;;  %v2062_v32 = vrot.slane %v5333_v54, 1  ;;  %v6824_v15 = vcombine.low %v1110_v59, %v6817_v34  ;;  %v1112_v54 = vld [vmem:[#allocation2 + $0x90] sm:$0xf]  ;;  %v6836_v59 = vld [vmem:[#allocation2 + $0x94] sm:$0xf] }
 0x129   : > { %3689 = vmatmul.mubr.bf16.gmra.mxu1 %v6722_v26  ;;  %v1925_v26 = vshll.u32 %v6549_v62, 16  ;;  %v2325_v46 = vsel %vm1300_vm6, %v2320_v28, %v2324_v20  ;;  %v1921_v8 = vsel %vm1300_vm6, %v1916_v17, %v1920_v19  ;;  %v2332_v28 = vor.u32 %v2331_v45, %v2327_v6  ;;  %v1090_v6 = vld [vmem:[#allocation2 + $0xc0] sm:$0xe] }
 0x12a   : > { %7670 = vst [vmem:[#allocation6_spill] sm:$0xff] %v6802_v53  ;;  %3696 = vmatprep.mubr.bf16.mxu1 %v2313_v1  ;;  %v2063_v36 = vsel %vm1557_vm0, %v2061_v27, %v2062_v32  ;;  %v2336_v62 = vrot.slane %v2334_v24, 1  ;;  %v2341_v20 = vshll.u32 %v6824_v15, 16  ;;  %v2064_v27 = vrot.slane %v4403_v22, 1 }
 0x12b   : > { %v1927_v1 = vrot.slane %v1925_v26, 1  ;;  %v1932_v26 = vrot.slane %v1930_v31, 1  ;;  %v2065_v32 = vrot.slane %v5337_v50, 1  ;;  %v2339_v45 = vshrl.u32 %v6824_v15, 16 }
 0x12c   : > { %v2343_v24 = vrot.slane %v2341_v20, 1  ;;  %v1942_v22 = vshll.u32 %v5337_v50, 16  ;;  %v6854_v20 = vld [vmem:[#allocation2 + $0x98] ss:$0 sps:$4 sm:$0x11]  }
 0x12d   : > { %v1928_v39 = vor.u32 %v1927_v1, %v1923_v47  ;;  %v1935_v1 = vshrl.u32 %v6578_v12, 16  ;;  %v1114_v50 = vld [vmem:[#allocation2 + $0x9c] sm:$0xf] }
 0x12e   : > { %3576 = vmatmul.mubr.bf16.gmra.mxu0 %v1909_v43 }
 0x12f   : > { %3583 = vmatprep.mubr.bf16.mxu0 %v2060_v63  ;;  %v4631_v48 = vpop.f32.mrf.mxu0  ;;  %v6833_v63 = vld [vmem:[#allocation2 + $0x8c] ss:$0 sps:$4 sm:$0x11]   ;;  %v1933_v47 = vsel %vm1300_vm6, %v1928_v39, %v1932_v26  ;;  %v1944_v26 = vrot.slane %v1942_v22, 1  ;;  %v4618_v22 = vadd.f32 %v6689_v33, %v6671_v21 }
 0x130   : > { %v6885_v21 = vld [vmem:[#allocation2 + $0xa4] ss:$0 sps:$4 sm:$0x11]  }
 0x131   : > { %v4632_v40 = vpop.f32.mrf.mxu0  ;;  %3697 = vmatmul.mubr.bf16.gmra.mxu1 %v6759_v61  ;;  %v1937_v61 = vshll.u32 %v6578_v12, 16 }
 0x132   : > { %v6829_v43 = vadd.f32 %v4632_v40, %v4631_v48  ;;  %3704 = vmatprep.mubr.bf16.mxu1 %v2325_v46  ;;  %v2346_v48 = vshll.u32 %v6833_v63, 16  ;;  %v2337_v46 = vsel %vm1300_vm6, %v2332_v28, %v2336_v62  ;;  %v6845_v40 = vcombine.low %v1112_v54, %v6836_v59  ;;  %v5340_v62 = vld [vmem:[#allocation2 + $0xc8] ss:$0 sps:$4 sm:$0x11]  }
 0x133   : > { %v4634_v23 = vpop.f32.mrf.mxu0  ;;  %v1939_v31 = vrot.slane %v1937_v61, 1  ;;  %v2066_v28 = vsel %vm1557_vm0, %v2064_v27, %v2065_v32  ;;  %v2344_v54 = vor.u32 %v2343_v24, %v2339_v45  ;;  %v6859_v61 = vld [vmem:[#allocation2 + $0xa0] sm:$0xf] }
 0x134   : > { %v2353_v39 = vshll.u32 %v6845_v40, 16 }
 0x135   : > { %v4635_v37 = vpop.f32.mrf.mxu0 }
 0x136   : > { %3584 = vmatmul.mubr.bf16.gmra.mxu0 %v1921_v8  ;;  %v4703_v17 = vpop.f32.mrf.mxu1  ;;  %v6839_v19 = vadd.f32 %v4635_v37, %v4634_v23  ;;  %v4404_v23 = vcombine.low %v1090_v6, %v6623_v49  ;;  %v1940_v49 = vor.u32 %v1939_v31, %v1935_v1  ;;  %v2068_v6 = vrot.slane %v5340_v62, 1 }
 0x137   : > { %3591 = vmatprep.mubr.bf16.mxu0 %v2063_v36  ;;  %v6871_v1 = vcombine.low %v1114_v50, %v6859_v61 }
 0x138   : > { %v4704_v38 = vpop.f32.mrf.mxu1  ;;  %v2067_v32 = vrot.slane %v4404_v23, 1  ;;  %v1947_v23 = vshrl.u32 %v6632_v44, 16 }
 0x139   : > { %v6847_v8 = vadd.f32 %v4704_v38, %v4703_v17  ;;  %3705 = vmatmul.mubr.bf16.gmra.mxu1 %v6782_v14  ;;  %v2348_v17 = vrot.slane %v2346_v48, 1  ;;  %v1949_v14 = vshll.u32 %v6632_v44, 16  ;;  %v6866_v48 = vld [vmem:[%s7652_s2] ss:$0 sm:$0xff] }
 0x13a   : > { %v4706_v36 = vpop.f32.mrf.mxu1  ;;  %3712 = vmatprep.mubr.bf16.mxu1 %v2337_v46  ;;  %v2358_v46 = vshll.u32 %v6854_v20, 16  ;;  %v3168_v31 = vadd.f32 %v6621_v30, %v6866_v48  ;;  %v2069_v50 = vsel %vm1557_vm0, %v2067_v32, %v2068_v6 }
 0x13b   : > { %7671 = vst [vmem:[#allocation7_spill] sm:$0xff] %v6847_v8  ;;  %v2349_v24 = vsel %vm1300_vm6, %v2344_v54, %v2348_v17  ;;  %v1951_v8 = vrot.slane %v1949_v14, 1  ;;  %v1954_v54 = vshll.u32 %v5340_v62, 16  ;;  %v3171_v62 = vadd.f32 %v4618_v22, %v6866_v48 }
 0x13c   : > { %v4707_v37 = vpop.f32.mrf.mxu1 }
 0x13d   : > { %v6857_v12 = vadd.f32 %v4707_v37, %v4706_v36  ;;  %v2355_v36 = vrot.slane %v2353_v39, 1  ;;  %v1952_v32 = vor.u32 %v1951_v8, %v1947_v23  ;;  %v1956_v6 = vrot.slane %v1954_v54, 1 }
 0x13e   : > { %3592 = vmatmul.mubr.bf16.gmra.mxu0 %v1933_v47  ;;  %v4725_v27 = vpop.f32.mrf.mxu1  ;;  %v2351_v47 = vshrl.u32 %v6845_v40, 16  ;;  %v3176_v8 = vadd.f32 %v6719_v56, %v6866_v48 }
 0x13f   : > { %7672 = vst [vmem:[#allocation8_spill] sm:$0xff] %v6857_v12  ;;  %3599 = vmatprep.mubr.bf16.mxu0 %v2066_v28  ;;  %v1945_v12 = vsel %vm1300_vm6, %v1940_v49, %v1944_v26  ;;  %v2365_v49 = vshll.u32 %v6871_v1, 16 }
 0x140   : > { %v4637_v38 = vpop.f32.mrf.mxu0  ;;  %v4726_v45 = vpop.f32.mrf.mxu1  ;;  %v2356_v33 = vor.u32 %v2355_v36, %v2351_v47 }
 0x141   : > { %v4727_v37 = vadd.f32 %v4726_v45, %v4725_v27  ;;  %3713 = vmatmul.mubr.bf16.gmra.mxu1 %v6805_v18  ;;  %v2360_v27 = vrot.slane %v2358_v46, 1  ;;  %v1116_v18 = vld [vmem:[#allocation2 + $0xa8] sm:$0xf]  ;;  %v2370_v46 = vshll.u32 %v6885_v21, 16  ;;  %v2367_v22 = vrot.slane %v2365_v49, 1 }
 0x142   : > { %v4638_v28 = vpop.f32.mrf.mxu0  ;;  %v4728_v39 = vpop.f32.mrf.mxu1  ;;  %3720 = vmatprep.mubr.bf16.mxu1 %v2349_v24 }
 0x143   : > { %v6879_v17 = vadd.f32 %v4638_v28, %v4637_v38  ;;  %v6883_v30 = vadd.f32 %v4727_v37, %v3168_v31  ;;  %v6889_v38 = vld [vmem:[#allocation2 + $0xac] sm:$0xf]  ;;  %v2361_v36 = vsel %vm1300_vm6, %v2356_v33, %v2360_v27  ;;  %v1957_v37 = vsel %vm1300_vm6, %v1952_v32, %v1956_v6  ;;  %v6909_v27 = vld [vmem:[#allocation2 + $0xb0] ss:$0 sps:$4 sm:$0x11]  }
 0x144   : > { %v4640_v53 = vpop.f32.mrf.mxu0  ;;  %v4729_v44 = vpop.f32.mrf.mxu1  ;;  %v6899_v28 = vcombine.low %v1116_v18, %v6889_v38  ;;  %v2372_v33 = vrot.slane %v2370_v46, 1  ;;  %v2382_v46 = vshll.u32 %v6909_v27, 16 }
 0x145   : > { %v4730_v26 = vadd.f32 %v4729_v44, %v4728_v39 }
 0x146   : > { %3600 = vmatmul.mubr.bf16.gmra.mxu0 %v1945_v12  ;;  %v4641_v14 = vpop.f32.mrf.mxu0  ;;  %v4731_v24 = vpop.f32.mrf.mxu1  ;;  %v2363_v12 = vshrl.u32 %v6871_v1, 16  ;;  %v2377_v49 = vshll.u32 %v6899_v28, 16  ;;  %v2375_v18 = vshrl.u32 %v6899_v28, 16 }
 0x147   : > { %3607 = vmatprep.mubr.bf16.mxu0 %v2069_v50  ;;  %v6891_v45 = vadd.f32 %v4641_v14, %v4640_v53  ;;  %v6893_v31 = vadd.f32 %v4730_v26, %v3171_v62  ;;  %v4624_v53 = vadd.f32 %v6745_v51, %v6727_v57  ;;  %v1118_v51 = vld [vmem:[#allocation2 + $0xb4] sm:$0xf]  ;;  %v6913_v62 = vld [vmem:[#allocation2 + $0xb8] sm:$0xf] }
 0x148   : > { %v4732_v47 = vpop.f32.mrf.mxu1  ;;  %v2368_v44 = vor.u32 %v2367_v22, %v2363_v12 }
 0x149   : > { %v4733_v23 = vadd.f32 %v4732_v47, %v4731_v24  ;;  %3721 = vmatmul.mubr.bf16.gmra.mxu1 %v6824_v15  ;;  %v3179_v56 = vadd.f32 %v4624_v53, %v6866_v48  ;;  %v2379_v24 = vrot.slane %v2377_v49, 1  ;;  %v6922_v47 = vcombine.low %v1118_v51, %v6913_v62 }
 0x14a   : > { %v4734_v54 = vpop.f32.mrf.mxu1  ;;  %3728 = vmatprep.mubr.bf16.mxu1 %v2361_v36  ;;  %v2373_v6 = vsel %vm1300_vm6, %v2368_v44, %v2372_v33  ;;  %v3184_v36 = vadd.f32 %v6768_v5, %v6866_v48  ;;  %v2384_v33 = vrot.slane %v2382_v46, 1 }
 0x14b   : > { %v6907_v39 = vadd.f32 %v4733_v23, %v3176_v8  ;;  %v2380_v44 = vor.u32 %v2379_v24, %v2375_v18  ;;  %v2389_v5 = vshll.u32 %v6922_v47, 16 }
 0x14c   : > { %v4735_v50 = vpop.f32.mrf.mxu1 }
 0x14d   : > { %v4736_v57 = vadd.f32 %v4735_v50, %v4734_v54  ;;  %v4643_v14 = vpop.f32.mrf.mxu0  ;;  %v6933_v54 = vld [vmem:[#allocation2 + $0xbc] ss:$0 sps:$4 sm:$0x11]   ;;  %v2391_v24 = vrot.slane %v2389_v5, 1 }
 0x14e   : > { %3608 = vmatmul.mubr.bf16.gmra.mxu0 %v1957_v37  ;;  %v4737_v15 = vpop.f32.mrf.mxu1  ;;  %v2394_v18 = vshll.u32 %v6933_v54, 16 }
 0x14f   : > { %5085 = vmatprep.mubr.bf16.mxu0 %v6704_v35  ;;  %v6916_v26 = vadd.f32 %v4736_v57, %v3179_v56  ;;  %v4630_v35 = vadd.f32 %v6812_v58, %v6797_v16  ;;  %v4644_v12 = vpop.f32.mrf.mxu0  ;;  %v1120_v56 = vld [vmem:[#allocation2 + $0xc0] sm:$0xf] }
 0x150   : > { %v4738_v32 = vpop.f32.mrf.mxu1  ;;  %v6928_v8 = vadd.f32 %v4644_v12, %v4643_v14 }
 0x151   : > { %v4739_v22 = vadd.f32 %v4738_v32, %v4737_v15  ;;  %3729 = vmatmul.mubr.bf16.gmra.mxu1 %v6845_v40  ;;  %v4646_v23 = vpop.f32.mrf.mxu0  ;;  %v3187_v16 = vadd.f32 %v4630_v35, %v6866_v48  ;;  %v6938_v40 = vld [vmem:[#allocation2 + $0xc4] sm:$0xf]  ;;  %v1146_v15 = vld [vmem:[#allocation2 + $0x60] sm:$0xe] }
 0x152   : > { %v4740_v53 = vpop.f32.mrf.mxu1  ;;  %3736 = vmatprep.mubr.bf16.mxu1 %v2373_v6  ;;  %v2385_v6 = vsel %vm1300_vm6, %v2380_v44, %v2384_v33  ;;  %v6949_v46 = vcombine.low %v1120_v56, %v6938_v40  ;;  %v4443_v12 = vcombine.low %v1146_v15, %v6747_v11  ;;  %v6965_v56 = vld [vmem:[#allocation2 + $0xd0] sm:$0xf] }
 0x153   : > { %v6931_v37 = vadd.f32 %v4739_v22, %v3184_v36  ;;  %v4647_v58 = vpop.f32.mrf.mxu0 }
 0x154   : > { %v4741_v50 = vpop.f32.mrf.mxu1  ;;  %v6941_v57 = vadd.f32 %v4647_v58, %v4646_v23  ;;  %v3195_v58 = vadd.f32 %v6839_v19, %v6866_v48 }
 0x155   : > { %v4742_v49 = vadd.f32 %v4741_v50, %v4740_v53  ;;  %v6957_v50 = vld [vmem:[#allocation2 + $0xc8] ss:$0 sps:$4 sm:$0x11]  }
 0x156   : > { %5086 = vmatmul.mubr.bf16.vlgmr.msra.gmra.mxu0 %v6709_v55  ;;  %v4743_v51 = vpop.f32.mrf.mxu1  ;;  %v2387_v55 = vshrl.u32 %v6922_v47, 16  ;;  %v2406_v19 = vshll.u32 %v6957_v50, 16 }
 0x157   : > { %5089 = vmatprep.mubr.bf16.mxu0 %v6730_v2  ;;  %v6943_v14 = vadd.f32 %v4742_v49, %v3187_v16  ;;  %v3192_v2 = vadd.f32 %v6829_v43, %v6866_v48  ;;  %v4649_v36 = vpop.f32.mrf.mxu0  ;;  %v2396_v16 = vrot.slane %v2394_v18, 1  ;;  %v2401_v43 = vshll.u32 %v6949_v46, 16  ;;  %v1122_v49 = vld [vmem:[#allocation2 + $0xcc] sm:$0xf] }
 0x158   : > { %v4744_v32 = vpop.f32.mrf.mxu1  ;;  %v2392_v5 = vor.u32 %v2391_v24, %v2387_v55  ;;  %v1147_v18 = vld [vmem:[#allocation2 + $0x6c] sm:$0xe]  ;;  %v2399_v24 = vshrl.u32 %v6949_v46, 16 }
 0x159   : > { %v4745_v35 = vadd.f32 %v4744_v32, %v4743_v51  ;;  %3737 = vmatmul.mubr.bf16.gmra.mxu1 %v6871_v1  ;;  %v4650_v53 = vpop.f32.mrf.mxu0  ;;  %v2504_v51 = vrot.slane %v4443_v12, 1 }
 0x15a   : > { %v4746_v22 = vpop.f32.mrf.mxu1  ;;  %3744 = vmatprep.mubr.bf16.mxu1 %v2385_v6  ;;  %v6959_v44 = vadd.f32 %v4650_v53, %v4649_v36  ;;  %v2505_v6 = vrot.slane %v6770_v9, 1  ;;  %v3200_v9 = vadd.f32 %v6879_v17, %v6866_v48  ;;  %v4444_v53 = vcombine.low %v1147_v18, %v6775_v29 }
 0x15b   : > { %v6955_v23 = vadd.f32 %v4745_v35, %v3192_v2  ;;  %v4652_v11 = vpop.f32.mrf.mxu0  ;;  %v1148_v2 = vld [vmem:[#allocation2 + $0x78] sm:$0xe]  ;;  %v2397_v35 = vsel %vm1300_vm6, %v2392_v5, %v2396_v16  ;;  %v3203_v29 = vadd.f32 %v6891_v45, %v6866_v48 }
 0x15c   : > { %v4747_v33 = vpop.f32.mrf.mxu1 }
 0x15d   : > { %v4748_v1 = vadd.f32 %v4747_v33, %v4746_v22  ;;  %v4653_v32 = vpop.f32.mrf.mxu0  ;;  %v2403_v22 = vrot.slane %v2401_v43, 1  ;;  %v2408_v43 = vrot.slane %v2406_v19, 1 }
 0x15e   : > { %5090 = vmatmul.mubr.bf16.gmra.mxu0 %v6733_v25  ;;  %v4749_v15 = vpop.f32.mrf.mxu1  ;;  %v6973_v25 = vadd.f32 %v4653_v32, %v4652_v11 }
 0x15f   : > { %5093 = vmatprep.mubr.bf16.mxu0 %v6750_v4  ;;  %v6969_v55 = vadd.f32 %v4748_v1, %v3195_v58  ;;  %v6977_v4 = vcombine.low %v1122_v49, %v6965_v56  ;;  %v2506_v58 = vsel %vm1557_vm0, %v2504_v51, %v2505_v6  ;;  %v4445_v1 = vcombine.low %v1148_v2, %v6794_v10  ;;  %v6987_v49 = vld [vmem:[#allocation2 + $0xd4] ss:$0 sps:$4 sm:$0x11]  }
 0x160   : > { %v4750_v36 = vpop.f32.mrf.mxu1  ;;  %v2404_v16 = vor.u32 %v2403_v22, %v2399_v24  ;;  %v2508_v10 = vrot.slane %v6789_v3, 1  ;;  %v2511_v2 = vrot.slane %v6814_v7, 1  ;;  %v1150_v22 = vld [vmem:[#allocation2 + $0x90] sm:$0xe]  ;;  %v3208_v3 = vadd.f32 %v6928_v8, %v6866_v48 }
 0x161   : > { %v4751_v12 = vadd.f32 %v4750_v36, %v4749_v15  ;;  %3745 = vmatmul.mubr.bf16.gmra.mxu1 %v6899_v28  ;;  %v2413_v17 = vshll.u32 %v6977_v4, 16  ;;  %v2507_v15 = vrot.slane %v4444_v53, 1  ;;  %v2510_v19 = vrot.slane %v4445_v1, 1  ;;  %v1149_v36 = vld [vmem:[#allocation2 + $0x84] sm:$0xe] }
 0x162   : > { %v4752_v33 = vpop.f32.mrf.mxu1  ;;  %3752 = vmatprep.mubr.bf16.mxu1 %v2397_v35  ;;  %v2418_v53 = vshll.u32 %v6987_v49, 16  ;;  %v4446_v1 = vcombine.low %v1149_v36, %v6817_v34  ;;  %v1151_v36 = vld [vmem:[#allocation2 + $0x9c] sm:$0xe] }
 0x163   : > { %v4655_v11 = vpop.f32.mrf.mxu0  ;;  %v6985_v32 = vadd.f32 %v4751_v12, %v3200_v9  ;;  %v2411_v9 = vshrl.u32 %v6977_v4, 16  ;;  %v2415_v12 = vrot.slane %v2413_v17, 1 }
 0x164   : > { %v4753_v5 = vpop.f32.mrf.mxu1  ;;  %v2513_v34 = vrot.slane %v4446_v1, 1 }
 0x165   : > { %v4656_v28 = vpop.f32.mrf.mxu0  ;;  %v4754_v51 = vadd.f32 %v4753_v5, %v4752_v33 }
 0x166   : > { %5094 = vmatmul.mubr.bf16.gmra.mxu0 %v6754_v42  ;;  %v6994_v6 = vadd.f32 %v4656_v28, %v4655_v11  ;;  %v4755_v18 = vpop.f32.mrf.mxu1  ;;  %v2409_v42 = vsel %vm1300_vm6, %v2404_v16, %v2408_v43  ;;  %v2509_v11 = vsel %vm1557_vm0, %v2507_v15, %v2508_v10  ;;  %v2512_v16 = vsel %vm1557_vm0, %v2510_v19, %v2511_v2 }
 0x167   : > { %5097 = vmatprep.mubr.bf16.mxu0 %v2506_v58  ;;  %v4658_v24 = vpop.f32.mrf.mxu0  ;;  %v6997_v35 = vadd.f32 %v4754_v51, %v3203_v29  ;;  %v4447_v43 = vcombine.low %v1150_v22, %v6836_v59  ;;  %v2416_v28 = vor.u32 %v2415_v12, %v2411_v9  ;;  %v2420_v51 = vrot.slane %v2418_v53, 1 }
 0x168   : > { %v4756_v45 = vpop.f32.mrf.mxu1  ;;  %v3211_v15 = vadd.f32 %v6941_v57, %v6866_v48  ;;  %v2517_v2 = vrot.slane %v6854_v20, 1  ;;  %v3216_v12 = vadd.f32 %v6959_v44, %v6866_v48  ;;  %v3219_v44 = vadd.f32 %v6973_v25, %v6866_v48 }
 0x169   : > { %v4659_v33 = vpop.f32.mrf.mxu0  ;;  %v4757_v58 = vadd.f32 %v4756_v45, %v4755_v18  ;;  %3753 = vmatmul.mubr.bf16.gmra.mxu1 %v6922_v47  ;;  %v2514_v47 = vrot.slane %v6833_v63, 1  ;;  %v2516_v59 = vrot.slane %v4447_v43, 1  ;;  %v2421_v57 = vsel %vm1300_vm6, %v2416_v28, %v2420_v51  ;;  %v1153_v51 = vld [vmem:[#allocation2 + $0xb4] sm:$0xe] }
 0x16a   : > { %v7005_v7 = vadd.f32 %v4659_v33, %v4658_v24  ;;  %v4758_v5 = vpop.f32.mrf.mxu1  ;;  %3760 = vmatprep.mubr.bf16.mxu1 %v2409_v42  ;;  %v1152_v42 = vld [vmem:[#allocation2 + $0xa8] sm:$0xe]  ;;  %v4448_v33 = vcombine.low %v1151_v36, %v6859_v61  ;;  %v2520_v61 = vrot.slane %v6885_v21, 1  ;;  %v2523_v28 = vrot.slane %v6909_v27, 1 }
 0x16b   : > { %v7011_v17 = vadd.f32 %v4757_v58, %v3208_v3  ;;  %v2515_v63 = vsel %vm1557_vm0, %v2513_v34, %v2514_v47  ;;  %v4449_v1 = vcombine.low %v1152_v42, %v6889_v38  ;;  %v1154_v38 = vld [vmem:[#allocation2 + $0xc0] sm:$0xe]  ;;  %v3224_v34 = vadd.f32 %v6994_v6, %v6866_v48 }
 0x16c   : > { %v4661_v29 = vpop.f32.mrf.mxu0  ;;  %v4759_v8 = vpop.f32.mrf.mxu1  ;;  %v3227_v6 = vadd.f32 %v7005_v7, %v6866_v48 }
 0x16d   : > { %v4760_v10 = vadd.f32 %v4759_v8, %v4758_v5  ;;  %v2522_v8 = vrot.slane %v4449_v1, 1 }
 0x16e   : > { %5098 = vmatmul.mubr.bf16.gmra.mxu0 %v2509_v11  ;;  %v4662_v18 = vpop.f32.mrf.mxu0  ;;  %v4761_v24 = vpop.f32.mrf.mxu1  ;;  %v2518_v11 = vsel %vm1557_vm0, %v2516_v59, %v2517_v2  ;;  %v4451_v2 = vcombine.low %v1154_v38, %v6938_v40  ;;  %v1155_v40 = vld [vmem:[#allocation2 + $0xcc] sm:$0xe] }
 0x16f   : > { %5101 = vmatprep.mubr.bf16.mxu0 %v2512_v16  ;;  %v7016_v19 = vadd.f32 %v4662_v18, %v4661_v29  ;;  %v7019_v22 = vadd.f32 %v4760_v10, %v3211_v15  ;;  %v2519_v29 = vrot.slane %v4448_v33, 1  ;;  %v2524_v27 = vsel %vm1557_vm0, %v2522_v8, %v2523_v28 }
 0x170   : > { %v4664_v45 = vpop.f32.mrf.mxu0  ;;  %v4762_v9 = vpop.f32.mrf.mxu1 }
 0x171   : > { %v4763_v53 = vadd.f32 %v4762_v9, %v4761_v24  ;;  %3761 = vmatmul.mubr.bf16.gmra.mxu1 %v6949_v46  ;;  %v2521_v18 = vsel %vm1557_vm0, %v2519_v29, %v2520_v61  ;;  %v4450_v24 = vcombine.low %v1153_v51, %v6913_v62  ;;  %v3232_v7 = vadd.f32 %v7016_v19, %v6866_v48 }
 0x172   : > { %v4665_v3 = vpop.f32.mrf.mxu0  ;;  %v4764_v20 = vpop.f32.mrf.mxu1  ;;  %3768 = vmatprep.mubr.bf16.mxu1 %v2421_v57 }
 0x173   : > { %v4666_v58 = vadd.f32 %v4665_v3, %v4664_v45  ;;  %v7029_v5 = vadd.f32 %v4763_v53, %v3216_v12  ;;  %v2525_v62 = vrot.slane %v4450_v24, 1  ;;  %v2529_v3 = vrot.slane %v6957_v50, 1 }
 0x174   : > { %v4765_v16 = vpop.f32.mrf.mxu1 }
 0x175   : > { %v4766_v43 = vadd.f32 %v4765_v16, %v4764_v20  ;;  %v3235_v28 = vadd.f32 %v4666_v58, %v6866_v48 }
 0x176   : > { %5102 = vmatmul.mubr.bf16.gmra.mxu0 %v2515_v63  ;;  %v4767_v46 = vpop.f32.mrf.mxu1  ;;  %v2528_v63 = vrot.slane %v4451_v2, 1 }
 0x177   : > { %5105 = vmatprep.mubr.bf16.mxu0 %v2518_v11  ;;  %v7035_v15 = vadd.f32 %v4766_v43, %v3219_v44  ;;  %v4452_v43 = vcombine.low %v1155_v40, %v6965_v56 }
 0x178   : > { %v4768_v10 = vpop.f32.mrf.mxu1  ;;  %v2530_v61 = vsel %vm1557_vm0, %v2528_v63, %v2529_v3 }
 0x179   : > { %v4769_v25 = vadd.f32 %v4768_v10, %v4767_v46  ;;  %3769 = vmatmul.mubr.bf16.gmra.mxu1 %v6977_v4  ;;  %v2526_v4 = vrot.slane %v6933_v54, 1  ;;  %v2531_v19 = vrot.slane %v4452_v43, 1  ;;  %v2532_v10 = vrot.slane %v6987_v49, 1 }
 0x17a   : > { %v4667_v47 = vpop.f32.mrf.mxu0  ;;  %v4770_v21 = vpop.f32.mrf.mxu1 }
 0x17b   : > { %v7044_v36 = vadd.f32 %v4769_v25, %v3224_v34  ;;  %v2527_v44 = vsel %vm1557_vm0, %v2525_v62, %v2526_v4 }
 0x17c   : > { %v4668_v59 = vpop.f32.mrf.mxu0  ;;  %v4771_v42 = vpop.f32.mrf.mxu1 }
 0x17d   : > { %v4669_v45 = vadd.f32 %v4668_v59, %v4667_v47  ;;  %v4772_v57 = vadd.f32 %v4771_v42, %v4770_v21  ;;  %v2533_v59 = vsel %vm1557_vm0, %v2531_v19, %v2532_v10 }
 0x17e   : > { %5106 = vmatmul.mubr.bf16.gmra.mxu0 %v2521_v18  ;;  %v4670_v9 = vpop.f32.mrf.mxu0  ;;  %v4773_v12 = vpop.f32.mrf.mxu1 }
 0x17f   : > { %5109 = vmatprep.mubr.bf16.mxu0 %v2524_v27  ;;  %v7050_v33 = vadd.f32 %v4772_v57, %v3227_v6  ;;  %v3240_v24 = vadd.f32 %v4669_v45, %v6866_v48 }
 0x180   : > { %v4671_v53 = vpop.f32.mrf.mxu0  ;;  %v4774_v11 = vpop.f32.mrf.mxu1 }
 0x181   : > { %v4672_v20 = vadd.f32 %v4671_v53, %v4670_v9  ;;  %v4775_v16 = vadd.f32 %v4774_v11, %v4773_v12 }
 0x182   : > { %v4673_v1 = vpop.f32.mrf.mxu0  ;;  %v4776_v54 = vpop.f32.mrf.mxu1 }
 0x183   : > { %v7057_v46 = vadd.f32 %v4775_v16, %v3232_v7  ;;  %v3243_v42 = vadd.f32 %v4672_v20, %v6866_v48 }
 0x184   : > { %v4674_v29 = vpop.f32.mrf.mxu0  ;;  %v4777_v8 = vpop.f32.mrf.mxu1 }
 0x185   : > { %v4675_v50 = vadd.f32 %v4674_v29, %v4673_v1  ;;  %v4778_v38 = vadd.f32 %v4777_v8, %v4776_v54 }
 0x186   : > { %5110 = vmatmul.mubr.bf16.gmra.mxu0 %v2527_v44  ;;  %v4676_v51 = vpop.f32.mrf.mxu0  ;;  %v4779_v34 = vpop.f32.mrf.mxu1 }
 0x187   : > { %5113 = vmatprep.mubr.bf16.mxu0 %v2530_v61  ;;  %v7061_v56 = vadd.f32 %v4778_v38, %v3235_v28  ;;  %v3248_v45 = vadd.f32 %v4675_v50, %v6866_v48 }
 0x188   : > { %v4677_v47 = vpop.f32.mrf.mxu0  ;;  %v4780_v18 = vpop.f32.mrf.mxu1 }
 0x189   : > { %v4678_v25 = vadd.f32 %v4677_v47, %v4676_v51  ;;  %v4781_v21 = vadd.f32 %v4780_v18, %v4779_v34 }
 0x18a   : > { %v4782_v27 = vpop.f32.mrf.mxu1 }
 0x18b   : > { %v7065_v58 = vadd.f32 %v4781_v21, %v3240_v24  ;;  %v3251_v20 = vadd.f32 %v4678_v25, %v6866_v48 }
 0x18c   : > { %v4783_v2 = vpop.f32.mrf.mxu1 }
 0x18d   : > { %v4784_v49 = vadd.f32 %v4783_v2, %v4782_v27 }
 0x18e   : > { %v4679_v6 = vpop.f32.mrf.mxu0  ;;  %5114 = vmatmul.mubr.bf16.gmra.mxu0 %v2533_v59  ;;  %v4785_v9 = vpop.f32.mrf.mxu1 }
 0x18f   : > { %v7068_v62 = vadd.f32 %v4784_v49, %v3243_v42 }
 0x190   : > { %v4680_v57 = vpop.f32.mrf.mxu0  ;;  %v4786_v12 = vpop.f32.mrf.mxu1 }
 0x191   : > { %v4681_v4 = vadd.f32 %v4680_v57, %v4679_v6  ;;  %v4787_v63 = vadd.f32 %v4786_v12, %v4785_v9  ;;  %v3264_v9 = vadd.f32 %v6698_v52, %v6866_v48 }
 0x192   : > { %v4682_v53 = vpop.f32.mrf.mxu0  ;;  %v4788_v3 = vpop.f32.mrf.mxu1 }
 0x193   : > { %v7071_v11 = vadd.f32 %v4787_v63, %v3248_v45  ;;  %v3256_v50 = vadd.f32 %v4681_v4, %v6866_v48 }
 0x194   : > { %v4683_v40 = vpop.f32.mrf.mxu0  ;;  %v4789_v1 = vpop.f32.mrf.mxu1 }
 0x195   : > { %v4684_v7 = vadd.f32 %v4683_v40, %v4682_v53  ;;  %v4790_v44 = vadd.f32 %v4789_v1, %v4788_v3  ;;  %v3267_v40 = vadd.f32 %v6716_v13, %v6866_v48 }
 0x196   : > { %v4837_v16 = vpop.f32.mrf.mxu0  ;;  %v4791_v29 = vpop.f32.mrf.mxu1 }
 0x197   : > { %v7074_v54 = vadd.f32 %v4790_v44, %v3251_v20  ;;  %v3259_v24 = vadd.f32 %v4684_v7, %v6866_v48 }
 0x198   : > { %v4838_v43 = vpop.f32.mrf.mxu0  ;;  %v4792_v28 = vpop.f32.mrf.mxu1 }
 0x199   : > { %v4839_v61 = vadd.f32 %v4838_v43, %v4837_v16  ;;  %v4793_v38 = vadd.f32 %v4792_v28, %v4791_v29  ;;  %v3272_v29 = vadd.f32 %v6761_v41, %v6866_v48 }
 0x19a   : > { %v4840_v8 = vpop.f32.mrf.mxu0  ;;  %v4794_v10 = vpop.f32.mrf.mxu1 }
 0x19b   : > { %v7078_v51 = vadd.f32 %v4839_v61, %v6883_v30  ;;  %v7080_v47 = vadd.f32 %v4793_v38, %v3256_v50 }
 0x19c   : > { %v4841_v19 = vpop.f32.mrf.mxu0  ;;  %v4795_v18 = vpop.f32.mrf.mxu1 }
 0x19d   : > { %v4842_v34 = vadd.f32 %v4841_v19, %v4840_v8  ;;  %v4796_v59 = vadd.f32 %v4795_v18, %v4794_v10  ;;  %v3275_v10 = vadd.f32 %v6773_v0, %v6866_v48 }
 0x19e   : > { %v4843_v25 = vpop.f32.mrf.mxu0  ;;  %v4797_v2 = vpop.f32.mrf.mxu1 }
 0x19f   : > { %v7084_v21 = vadd.f32 %v4842_v34, %v6893_v31  ;;  %v7086_v6 = vadd.f32 %v4796_v59, %v3259_v24 }
 0x1a0   : > { %v4844_v27 = vpop.f32.mrf.mxu0  ;;  %v4798_v49 = vpop.f32.mrf.mxu1 }
 0x1a1   : > { %v4845_v42 = vadd.f32 %v4844_v27, %v4843_v25  ;;  %v4799_v4 = vadd.f32 %v4798_v49, %v4797_v2  ;;  %v3280_v2 = vadd.f32 %v6791_v60, %v6866_v48 }
 0x1a2   : > { %v4846_v30 = vpop.f32.mrf.mxu0  ;;  %v4800_v45 = vpop.f32.mrf.mxu1 }
 0x1a3   : > { %v7091_v57 = vadd.f32 %v4845_v42, %v6907_v39  ;;  %v7093_v31 = vadd.f32 %v4799_v4, %v3264_v9 }
 0x1a4   : > { %v4847_v12 = vpop.f32.mrf.mxu0  ;;  %v4801_v3 = vpop.f32.mrf.mxu1 }
 0x1a5   : > { %v4848_v53 = vadd.f32 %v4847_v12, %v4846_v30  ;;  %v4802_v1 = vadd.f32 %v4801_v3, %v4800_v45  ;;  %v7673_v45 = vld [vmem:[#allocation6_spill] sm:$0xff] }
 0x1a6   : > { %v4849_v63 = vpop.f32.mrf.mxu0  ;;  %v4803_v52 = vpop.f32.mrf.mxu1 }
 0x1a7   : > { %v7098_v7 = vadd.f32 %v4848_v53, %v6916_v26  ;;  %v7100_v39 = vadd.f32 %v4802_v1, %v3267_v40  ;;  %v3283_v53 = vadd.f32 %v7673_v45, %v6866_v48 }
 0x1a8   : > { %v4850_v20 = vpop.f32.mrf.mxu0  ;;  %v4804_v43 = vpop.f32.mrf.mxu1 }
 0x1a9   : > { %v4851_v16 = vadd.f32 %v4850_v20, %v4849_v63  ;;  %v4805_v8 = vadd.f32 %v4804_v43, %v4803_v52 }
 0x1aa   : > { %v4852_v44 = vpop.f32.mrf.mxu0  ;;  %v4806_v13 = vpop.f32.mrf.mxu1 }
 0x1ab   : > { %v7105_v61 = vadd.f32 %v4851_v16, %v6931_v37  ;;  %v7107_v26 = vadd.f32 %v4805_v8, %v3272_v29  ;;  %v7674_v29 = vld [vmem:[#allocation7_spill] sm:$0xff] }
 0x1ac   : > { %v4853_v28 = vpop.f32.mrf.mxu0  ;;  %v4807_v19 = vpop.f32.mrf.mxu1  ;;  %v3288_v8 = vadd.f32 %v7674_v29, %v6866_v48 }
 0x1ad   : > { %v4854_v50 = vadd.f32 %v4853_v28, %v4852_v44  ;;  %v4808_v25 = vadd.f32 %v4807_v19, %v4806_v13 }
 0x1ae   : > { %v4855_v38 = vpop.f32.mrf.mxu0  ;;  %v4809_v41 = vpop.f32.mrf.mxu1 }
 0x1af   : > { %v7112_v34 = vadd.f32 %v4854_v50, %v6943_v14  ;;  %v7114_v37 = vadd.f32 %v4808_v25, %v3275_v10 }
 0x1b0   : > { %v4856_v18 = vpop.f32.mrf.mxu0  ;;  %v4810_v27 = vpop.f32.mrf.mxu1 }
 0x1b1   : > { %v4857_v24 = vadd.f32 %v4856_v18, %v4855_v38  ;;  %v4811_v30 = vadd.f32 %v4810_v27, %v4809_v41 }
 0x1b2   : > { %v4858_v59 = vpop.f32.mrf.mxu0  ;;  %v4812_v0 = vpop.f32.mrf.mxu1 }
 0x1b3   : > { %v7119_v42 = vadd.f32 %v4857_v24, %v6955_v23  ;;  %v7121_v14 = vadd.f32 %v4811_v30, %v3280_v2 }
 0x1b4   : > { %v4859_v49 = vpop.f32.mrf.mxu0  ;;  %v4813_v12 = vpop.f32.mrf.mxu1 }
 0x1b5   : > { %v4860_v9 = vadd.f32 %v4859_v49, %v4858_v59  ;;  %v4814_v3 = vadd.f32 %v4813_v12, %v4812_v0 }
 0x1b6   : > { %v4861_v4 = vpop.f32.mrf.mxu0 }
 0x1b7   : > { %v7126_v63 = vadd.f32 %v4860_v9, %v6969_v55  ;;  %v7128_v1 = vadd.f32 %v4814_v3, %v3283_v53 }
 0x1b8   : > { %v4862_v40 = vpop.f32.mrf.mxu0 }
 0x1b9   : > { %v4863_v60 = vadd.f32 %v4862_v40, %v4861_v4  ;;  %v4815_v52 = vpop.f32.mrf.mxu1 }
 0x1ba   : > { %v4864_v23 = vpop.f32.mrf.mxu0 }
 0x1bb   : > { %v7131_v20 = vadd.f32 %v4863_v60, %v6985_v32  ;;  %v4816_v43 = vpop.f32.mrf.mxu1  ;;  %v7676_v32 = vld [vmem:[#allocation8_spill] sm:$0xff] }
 0x1bc   : > { %v4865_v16 = vpop.f32.mrf.mxu0  ;;  %v4817_v13 = vadd.f32 %v4816_v43, %v4815_v52  ;;  %v3291_v18 = vadd.f32 %v7676_v32, %v6866_v48 }
 0x1bd   : > { %v4866_v44 = vadd.f32 %v4865_v16, %v4864_v23  ;;  %v4818_v50 = vpop.f32.mrf.mxu1 }
 0x1be   : > { %v4867_v28 = vpop.f32.mrf.mxu0  ;;  %v7138_v19 = vadd.f32 %v4817_v13, %v3288_v8 }
 0x1bf   : > { %v7136_v55 = vadd.f32 %v4866_v44, %v6997_v35  ;;  %v4819_v25 = vpop.f32.mrf.mxu1 }
 0x1c0   : > { %v4868_v38 = vpop.f32.mrf.mxu0  ;;  %7675 = vst [vmem:[#allocation6_spill] sm:$0xff] %v7138_v19  ;;  %v4820_v24 = vadd.f32 %v4819_v25, %v4818_v50 }
 0x1c1   : > { %v4869_v10 = vadd.f32 %v4868_v38, %v4867_v28  ;;  %v4949_v27 = vpop.f32.mrf.mxu1 }
 0x1c2   : > { %v4870_v41 = vpop.f32.mrf.mxu0  ;;  %v7145_v30 = vadd.f32 %v4820_v24, %v3291_v18 }
 0x1c3   : > { %v7143_v59 = vadd.f32 %v4869_v10, %v7011_v17  ;;  %v4950_v49 = vpop.f32.mrf.mxu1 }
 0x1c4   : > { %v4871_v2 = vpop.f32.mrf.mxu0  ;;  %7677 = vst [vmem:[#allocation7_spill] sm:$0xff] %v7145_v30  ;;  %v4951_v9 = vadd.f32 %v4950_v49, %v4949_v27 }
 0x1c5   : > { %v4872_v35 = vadd.f32 %v4871_v2, %v4870_v41  ;;  %v4952_v12 = vpop.f32.mrf.mxu1 }
 0x1c6   : > { %v4873_v0 = vpop.f32.mrf.mxu0  ;;  %v7151_v48 = vadd.f32 %v4951_v9, %v7078_v51 }
 0x1c7   : > { %v7148_v4 = vadd.f32 %v4872_v35, %v7019_v22  ;;  %v4953_v3 = vpop.f32.mrf.mxu1 }
 0x1c8   : > { %v4874_v45 = vpop.f32.mrf.mxu0  ;;  %v4954_v40 = vadd.f32 %v4953_v3, %v4952_v12 }
 0x1c9   : > { %v4875_v53 = vadd.f32 %v4874_v45, %v4873_v0  ;;  %v7156_v23 = vpop.f32.mrf.mxu1 }
 0x1ca   : > { %v4876_v17 = vpop.f32.mrf.mxu0  ;;  %v7159_v16 = vadd.f32 %v4954_v40, %v7084_v21 }
 0x1cb   : > { %v7154_v60 = vadd.f32 %v4875_v53, %v7029_v5  ;;  %v7161_v44 = vpop.f32.mrf.mxu1 }
 0x1cc   : > { %v4877_v52 = vpop.f32.mrf.mxu0 }
 0x1cd   : > { %v4878_v22 = vadd.f32 %v4877_v52, %v4876_v17  ;;  %v7166_v29 = vpop.f32.mrf.mxu1 }
 0x1ce   : > { %v4879_v43 = vpop.f32.mrf.mxu0 }
 0x1cf   : > { %v7164_v51 = vadd.f32 %v4878_v22, %v7035_v15  ;;  %v7168_v13 = vpop.f32.mrf.mxu1 }
 0x1d0   : > { %v4880_v8 = vpop.f32.mrf.mxu0 }
 0x1d1   : > { %v4881_v28 = vadd.f32 %v4880_v8, %v4879_v43  ;;  %v7173_v38 = vpop.f32.mrf.mxu1 }
 0x1d2   : > { %v4882_v5 = vpop.f32.mrf.mxu0 }
 0x1d3   : > { %v7171_v50 = vadd.f32 %v4881_v28, %v7044_v36  ;;  %v7175_v25 = vpop.f32.mrf.mxu1 }
 0x1d4   : > { %v4883_v21 = vpop.f32.mrf.mxu0 }
 0x1d5   : > { %v4884_v10 = vadd.f32 %v4883_v21, %v4882_v5  ;;  %v7180_v18 = vpop.f32.mrf.mxu1 }
 0x1d6   : > { %v4885_v32 = vpop.f32.mrf.mxu0 }
 0x1d7   : > { %v7178_v15 = vadd.f32 %v4884_v10, %v7050_v33  ;;  %v7182_v27 = vpop.f32.mrf.mxu1 }
 0x1d8   : > { %v4886_v41 = vpop.f32.mrf.mxu0 }
 0x1d9   : > { %v4887_v24 = vadd.f32 %v4886_v41, %v4885_v32  ;;  %v7187_v35 = vpop.f32.mrf.mxu1 }
 0x1da   : > { %v4888_v2 = vpop.f32.mrf.mxu0 }
 0x1db   : > { %v7185_v36 = vadd.f32 %v4887_v24, %v7057_v46  ;;  %v7189_v9 = vpop.f32.mrf.mxu1 }
 0x1dc   : > { %v4889_v49 = vpop.f32.mrf.mxu0 }
 0x1dd   : > { %v4890_v0 = vadd.f32 %v4889_v49, %v4888_v2  ;;  %v7194_v45 = vpop.f32.mrf.mxu1 }
 0x1de   : > { %v4891_v12 = vpop.f32.mrf.mxu0 }
 0x1df   : > { %v7192_v33 = vadd.f32 %v4890_v0, %v7061_v56  ;;  %v7196_v17 = vpop.f32.mrf.mxu1 }
 0x1e0   : > { %v4892_v53 = vpop.f32.mrf.mxu0 }
 0x1e1   : > { %7678 = vst [vmem:[#allocation8_spill] sm:$0xff] %v7192_v33  ;;  %v4893_v3 = vadd.f32 %v4892_v53, %v4891_v12  ;;  %v7201_v52 = vpop.f32.mrf.mxu1 }
 0x1e2   : > { %v4894_v40 = vpop.f32.mrf.mxu0 }
 0x1e3   : > { %v7199_v46 = vadd.f32 %v4893_v3, %v7065_v58  ;;  %v7203_v8 = vpop.f32.mrf.mxu1 }
 0x1e4   : > { %v4895_v22 = vpop.f32.mrf.mxu0 }
 0x1e5   : > { %7679 = vst [vmem:[#allocation9_spill] sm:$0xff] %v7199_v46  ;;  %v4896_v43 = vadd.f32 %v4895_v22, %v4894_v40  ;;  %v7208_v5 = vpop.f32.mrf.mxu1 }
 0x1e6   : > { %v4897_v28 = vpop.f32.mrf.mxu0 }
 0x1e7   : > { %v7206_v56 = vadd.f32 %v4896_v43, %v7068_v62  ;;  %v7210_v32 = vpop.f32.mrf.mxu1 }
 0x1e8   : > { %v4898_v21 = vpop.f32.mrf.mxu0 }
 0x1e9   : > { %7680 = vst [vmem:[#allocation10_spill] sm:$0xff] %v7206_v56  ;;  %v4899_v10 = vadd.f32 %v4898_v21, %v4897_v28  ;;  %v7215_v24 = vpop.f32.mrf.mxu1 }
 0x1ea   : > { %v4900_v41 = vpop.f32.mrf.mxu0 }
 0x1eb   : > { %v7213_v58 = vadd.f32 %v4899_v10, %v7071_v11  ;;  %v7217_v0 = vpop.f32.mrf.mxu1 }
 0x1ec   : > { %v4901_v2 = vpop.f32.mrf.mxu0 }
 0x1ed   : > { %7681 = vst [vmem:[#allocation11_spill] sm:$0xff] %v7213_v58  ;;  %v4902_v49 = vadd.f32 %v4901_v2, %v4900_v41  ;;  %v7222_v53 = vpop.f32.mrf.mxu1 }
 0x1ee   : > { %v4903_v12 = vpop.f32.mrf.mxu0 }
 0x1ef   : > { %v7220_v62 = vadd.f32 %v4902_v49, %v7074_v54  ;;  %v7224_v22 = vpop.f32.mrf.mxu1 }
 0x1f0   : > { %v4904_v3 = vpop.f32.mrf.mxu0 }
 0x1f1   : > { %7682 = vst [vmem:[#allocation12_spill] sm:$0xff] %v7220_v62  ;;  %v4905_v40 = vadd.f32 %v4904_v3, %v4903_v12  ;;  %v7229_v28 = vpop.f32.mrf.mxu1 }
 0x1f2   : > { %v4906_v43 = vpop.f32.mrf.mxu0 }
 0x1f3   : > { %v7227_v11 = vadd.f32 %v4905_v40, %v7080_v47  ;;  %v7231_v41 = vpop.f32.mrf.mxu1 }
 0x1f4   : > { %v4907_v21 = vpop.f32.mrf.mxu0 }
 0x1f5   : > { %7683 = vst [vmem:[#allocation13_spill] sm:$0xff] %v7227_v11  ;;  %v4908_v10 = vadd.f32 %v4907_v21, %v4906_v43  ;;  %v7236_v49 = vpop.f32.mrf.mxu1 }
 0x1f6   : > { %v4909_v2 = vpop.f32.mrf.mxu0 }
 0x1f7   : > { %v7234_v54 = vadd.f32 %v4908_v10, %v7086_v6  ;;  %v7238_v3 = vpop.f32.mrf.mxu1 }
 0x1f8   : > { %v4910_v62 = vpop.f32.mrf.mxu0 }
 0x1f9   : > { %7684 = vst [vmem:[#allocation14_spill] sm:$0xff] %v7234_v54  ;;  %v4911_v12 = vadd.f32 %v4910_v62, %v4909_v2  ;;  %v7243_v40 = vpop.f32.mrf.mxu1 }
 0x1fa   : > { %v4912_v58 = vpop.f32.mrf.mxu0 }
 0x1fb   : > { %v7241_v47 = vadd.f32 %v4911_v12, %v7093_v31  ;;  %v7245_v21 = vpop.f32.mrf.mxu1 }
 0x1fc   : > { %v4913_v11 = vpop.f32.mrf.mxu0 }
 0x1fd   : > { %7685 = vst [vmem:[#allocation15_spill] sm:$0xff] %v7241_v47  ;;  %v4914_v43 = vadd.f32 %v4913_v11, %v4912_v58  ;;  %v7250_v10 = vpop.f32.mrf.mxu1 }
 0x1fe   : > { %v4915_v56 = vpop.f32.mrf.mxu0 }
 0x1ff   : > { %v7248_v6 = vadd.f32 %v4914_v43, %v7100_v39  ;;  %v7252_v2 = vpop.f32.mrf.mxu1 }
 0x200   : > { %v4916_v54 = vpop.f32.mrf.mxu0 }
 0x201   : > { %7686 = vst [vmem:[#allocation16_spill] sm:$0xff] %v7248_v6  ;;  %v4917_v62 = vadd.f32 %v4916_v54, %v4915_v56  ;;  %v7257_v12 = vpop.f32.mrf.mxu1 }
 0x202   : > { %v4918_v30 = vpop.f32.mrf.mxu0 }
 0x203   : > { %v7255_v31 = vadd.f32 %v4917_v62, %v7107_v26  ;;  %v7259_v11 = vpop.f32.mrf.mxu1 }
 0x204   : > { %v4919_v47 = vpop.f32.mrf.mxu0 }
 0x205   : > { %7687 = vst [vmem:[#allocation17_spill] sm:$0xff] %v7255_v31  ;;  %v4920_v58 = vadd.f32 %v4919_v47, %v4918_v30  ;;  %v7264_v43 = vpop.f32.mrf.mxu1 }
 0x206   : > { %v4921_v33 = vpop.f32.mrf.mxu0 }
 0x207   : > { %v7262_v39 = vadd.f32 %v4920_v58, %v7114_v37  ;;  %v7266_v54 = vpop.f32.mrf.mxu1 }
 0x208   : > { %v4922_v6 = vpop.f32.mrf.mxu0 }
 0x209   : > { %7688 = vst [vmem:[#allocation18_spill] sm:$0xff] %v7262_v39  ;;  %v4923_v56 = vadd.f32 %v4922_v6, %v4921_v33  ;;  %v7271_v62 = vpop.f32.mrf.mxu1  ;;  %v4957_v6 = vadd.f32 %v7161_v44, %v7156_v23  ;;  %v4969_v44 = vadd.f32 %v7189_v9, %v7187_v35  ;;  %v4972_v35 = vadd.f32 %v7196_v17, %v7194_v45 }
 0x20a   : > { %v4924_v19 = vpop.f32.mrf.mxu0 }
 0x20b   : > { %v7269_v26 = vadd.f32 %v4923_v56, %v7121_v14  ;;  %v7273_v47 = vpop.f32.mrf.mxu1 }
 0x20c   : > { %v4925_v31 = vpop.f32.mrf.mxu0 }
 0x20d   : > { %7689 = vst [vmem:[#allocation19_spill] sm:$0xff] %v7269_v26  ;;  %v4926_v30 = vadd.f32 %v4925_v31, %v4924_v19  ;;  %v7280_v58 = vpop.f32.mrf.mxu1  ;;  %v4960_v31 = vadd.f32 %v7168_v13, %v7166_v29 }
 0x20e   : > { %v7275_v46 = vpop.f32.mrf.mxu0  ;;  %7691 = vst [vmem:[#allocation21_spill] sm:$0xff] %v7280_v58 }
 0x20f   : > { %v7278_v37 = vadd.f32 %v4926_v30, %v7128_v1  ;;  %v7286_v14 = vpop.f32.mrf.mxu1  ;;  %v3659_v1 = vadd.f32 %v4957_v6, %v7091_v57  ;;  %v3662_v29 = vadd.f32 %v4960_v31, %v7098_v7  ;;  %v3675_v31 = vadd.f32 %v4969_v44, %v7119_v42 }
 0x210   : > { %v7282_v33 = vpop.f32.mrf.mxu0  ;;  %7692 = vst [vmem:[#allocation22_spill] sm:$0xff] %v7286_v14  ;;  %v4981_v42 = vadd.f32 %v7217_v0, %v7215_v24  ;;  %v4984_v24 = vadd.f32 %v7224_v22, %v7222_v53 }
 0x211   : > { %7690 = vst [vmem:[#allocation20_spill] sm:$0xff] %v7278_v37  ;;  %v7290_v26 = vpop.f32.mrf.mxu1 }
 0x212   : > { %v7288_v56 = vpop.f32.mrf.mxu0  ;;  %7693 = vst [vmem:[#allocation23_spill] sm:$0xff] %v7290_v26 }
 0x213   : > { %v7297_v30 = vpop.f32.mrf.mxu1 }
 0x214   : > { %v7292_v19 = vpop.f32.mrf.mxu0 }
 0x215   : > { %v7301_v58 = vpop.f32.mrf.mxu1 }
 0x216   : > { %v5087_v37 = vpop.f32.mrf.mxu0  ;;  %7694 = vst [vmem:[#allocation24_spill] sm:$0xff] %v7301_v58 }
 0x217   : > { %v7299_v39 = vadd.f32 %v5087_v37, %v3659_v1  ;;  %v7310_v13 = vpop.f32.mrf.mxu1  ;;  %v4963_v37 = vadd.f32 %v7175_v25, %v7173_v38  ;;  %v4966_v25 = vadd.f32 %v7182_v27, %v7180_v18 }
 0x218   : > { %v3811_v23 = vpop.f32.mrf.mxu0 }
 0x219   : > { %v4528_v26 = vmul.f32 -1.442695, %v7299_v39  ;;  %v7307_v14 = vadd.f32 %v3811_v23, %v7151_v48  ;;  %v7317_v58 = vpop.f32.mrf.mxu1  ;;  %v3667_v45 = vadd.f32 %v4963_v37, %v7105_v61  ;;  %v4975_v61 = vadd.f32 %v7203_v8, %v7201_v52 }
 0x21a   : > { %v5088_v57 = vpop.f32.mrf.mxu0  ;;  %v4978_v52 = vadd.f32 %v7210_v32, %v7208_v5 }
 0x21b   : > { %5376 = vpow2.f32 %v4528_v26  ;;  %v4526_v6 = vmul.f32 -1.442695, %v7307_v14  ;;  %v7315_v1 = vadd.f32 %v5088_v57, %v3662_v29  ;;  %v7326_v38 = vpop.f32.mrf.mxu1  ;;  %v3683_v53 = vadd.f32 %v4975_v61, %v7131_v20 }
 0x21c   : > { %v3814_v48 = vpop.f32.mrf.mxu0  ;;  %v4987_v20 = vadd.f32 %v7231_v41, %v7229_v28  ;;  %v3686_v61 = vadd.f32 %v4978_v52, %v7136_v55 }
 0x21d   : > { %5378 = vpow2.f32 %v4526_v6  ;;  %v4529_v7 = vmul.f32 -1.442695, %v7315_v1  ;;  %v7323_v9 = vadd.f32 %v3814_v48, %v7159_v16  ;;  %v7334_v17 = vpop.f32.mrf.mxu1  ;;  %v3678_v16 = vadd.f32 %v4972_v35, %v7126_v63 }
 0x21e   : > { %v5091_v26 = vpop.f32.mrf.mxu0  ;;  %v3670_v48 = vadd.f32 %v4966_v25, %v7112_v34  ;;  %v3691_v34 = vadd.f32 %v4981_v42, %v7143_v59 }
 0x21f   : > { %5380 = vpow2.f32 %v4529_v7  ;;  %v4527_v23 = vmul.f32 -1.442695, %v7323_v9  ;;  %v7331_v29 = vadd.f32 %v5091_v26, %v3675_v31  ;;  %v7342_v27 = vpop.f32.mrf.mxu1 }
 0x220   : > { %v3827_v57 = vpop.f32.mrf.mxu0 }
 0x221   : > { %5382 = vpow2.f32 %v4527_v23  ;;  %v4532_v44 = vmul.f32 -1.442695, %v7331_v29  ;;  %v7340_v18 = vadd.f32 %v3827_v57, %v3667_v45  ;;  %v7350_v35 = vpop.f32.mrf.mxu1  ;;  %v4993_v57 = vadd.f32 %v7245_v21, %v7243_v40 }
 0x222   : > { %v5092_v6 = vpop.f32.mrf.mxu0 }
 0x223   : > { %5384 = vpow2.f32 %v4532_v44  ;;  %v4530_v37 = vmul.f32 -1.442695, %v7340_v18  ;;  %v7348_v63 = vadd.f32 %v5092_v6, %v3678_v16  ;;  %v7358_v25 = vpop.f32.mrf.mxu1  ;;  %v3694_v16 = vadd.f32 %v4984_v24, %v7148_v4 }
 0x224   : > { %v3830_v0 = vpop.f32.mrf.mxu0  ;;  %v3707_v41 = vadd.f32 %v4993_v57, %v7171_v50 }
 0x225   : > { %5386 = vpow2.f32 %v4530_v37  ;;  %v4533_v7 = vmul.f32 -1.442695, %v7348_v63  ;;  %v7355_v31 = vadd.f32 %v3830_v0, %v3670_v48  ;;  %v7366_v22 = vpop.f32.mrf.mxu1  ;;  %v4990_v0 = vadd.f32 %v7238_v3, %v7236_v49 }
 0x226   : > { %v5095_v8 = vpop.f32.mrf.mxu0  ;;  %v3699_v3 = vadd.f32 %v4987_v20, %v7154_v60 }
 0x227   : > { %5388 = vpow2.f32 %v4533_v7  ;;  %v4531_v26 = vmul.f32 -1.442695, %v7355_v31  ;;  %v7363_v23 = vadd.f32 %v5095_v8, %v3691_v34  ;;  %v7374_v44 = vpop.f32.mrf.mxu1  ;;  %v4996_v7 = vadd.f32 %v7252_v2, %v7250_v10 }
 0x228   : > { %v5377_v45 = vpop.eup %5376  ;;  %v3843_v59 = vpop.f32.mrf.mxu0 }
 0x229   : > { %v4036_v42 = vadd.f32 1.0, %v5377_v45  ;;  %5390 = vpow2.f32 %v4531_v26  ;;  %v4536_v5 = vmul.f32 -1.442695, %v7363_v23  ;;  %v7372_v32 = vadd.f32 %v3843_v59, %v3683_v53  ;;  %v7382_v37 = vpop.f32.mrf.mxu1 }
 0x22a   : > { %v5379_v6 = vpop.eup %5378  ;;  %v5096_v48 = vpop.f32.mrf.mxu0  ;;  %v4999_v53 = vadd.f32 %v7259_v11, %v7257_v12  ;;  %v5005_v59 = vadd.f32 %v7273_v47, %v7271_v62  ;;  %v3710_v12 = vadd.f32 %v4996_v7, %v7178_v15  ;;  %v3702_v11 = vadd.f32 %v4990_v0, %v7164_v51  ;;  %v7696_v0 = vld [vmem:[#allocation22_spill] sm:$0xff] }
 0x22b   : > { %5392 = vrcp.f32 %v4036_v42  ;;  %v4034_v40 = vadd.f32 1.0, %v5379_v6  ;;  %v4534_v21 = vmul.f32 -1.442695, %v7372_v32  ;;  %v7380_v4 = vadd.f32 %v5096_v48, %v3694_v16  ;;  %v7392_v8 = vpop.f32.mrf.mxu1 }
 0x22c   : > { %v5381_v24 = vpop.eup %5380  ;;  %5394 = vpow2.f32 %v4536_v5  ;;  %v3846_v28 = vpop.f32.mrf.mxu0  ;;  %v4929_v48 = vadd.f32 %v7282_v33, %v7275_v46  ;;  %v5002_v62 = vadd.f32 %v7266_v54, %v7264_v43  ;;  %v3715_v51 = vadd.f32 %v4999_v53, %v7185_v36  ;;  %v7695_v33 = vld [vmem:[#allocation21_spill] sm:$0xff]  ;;  %v7699_v53 = vld [vmem:[#allocation23_spill] sm:$0xff] }
 0x22d   : > { %5396 = vrcp.f32 %v4034_v40  ;;  %v4037_v55 = vadd.f32 1.0, %v5381_v24  ;;  %v4537_v34 = vmul.f32 -1.442695, %v7380_v4  ;;  %v7390_v52 = vadd.f32 %v3846_v28, %v3686_v61  ;;  %v7400_v45 = vpop.f32.mrf.mxu1  ;;  %v7697_v54 = vld [vmem:[#allocation9_spill] sm:$0xff] }
 0x22e   : > { %v5383_v26 = vpop.eup %5382  ;;  %5398 = vpow2.f32 %v4534_v21  ;;  %v5099_v49 = vpop.f32.mrf.mxu0  ;;  %v4932_v46 = vadd.f32 %v7292_v19, %v7288_v56  ;;  %v5008_v7 = vadd.f32 %v7696_v0, %v7695_v33  ;;  %v3723_v28 = vadd.f32 %v5005_v59, %v7697_v54  ;;  %v7698_v56 = vld [vmem:[#allocation6_spill] sm:$0xff] }
 0x22f   : > { %5400 = vrcp.f32 %v4037_v55  ;;  %v4035_v10 = vadd.f32 1.0, %v5383_v26  ;;  %v4535_v50 = vmul.f32 -1.442695, %v7390_v52  ;;  %v7398_v2 = vadd.f32 %v5099_v49, %v3707_v41  ;;  %v7409_v6 = vpop.f32.mrf.mxu1 }
 0x230   : > { %v5385_v57 = vpop.eup %5384  ;;  %5402 = vpow2.f32 %v4537_v34  ;;  %v3859_v16 = vpop.f32.mrf.mxu0  ;;  %v7437_v19 = vadd.f32 %v4929_v48, %v7698_v56  ;;  %v5011_v49 = vadd.f32 %v7297_v30, %v7699_v53  ;;  %v5017_v30 = vadd.f32 %v7326_v38, %v7317_v58  ;;  %v7702_v48 = vld [vmem:[#allocation10_spill] sm:$0xff]  ;;  %v7704_v38 = vld [vmem:[#allocation11_spill] sm:$0xff] }
 0x231   : > { %5404 = vrcp.f32 %v4035_v10  ;;  %v4040_v60 = vadd.f32 1.0, %v5385_v57  ;;  %v4540_v42 = vmul.f32 -1.442695, %v7398_v2  ;;  %v7407_v5 = vadd.f32 %v3859_v16, %v3699_v3  ;;  %v7420_v21 = vpop.f32.mrf.mxu1  ;;  %v7700_v10 = vld [vmem:[#allocation8_spill] sm:$0xff] }
 0x232   : > { %v5387_v20 = vpop.eup %5386  ;;  %5406 = vpow2.f32 %v4535_v50  ;;  %v5100_v15 = vpop.f32.mrf.mxu0  ;;  %v3718_v50 = vadd.f32 %v5002_v62, %v7700_v10  ;;  %v3726_v62 = vadd.f32 %v5008_v7, %v7702_v48  ;;  %v5020_v56 = vadd.f32 %v7342_v27, %v7334_v17  ;;  %v7706_v27 = vld [vmem:[#allocation12_spill] sm:$0xff] }
 0x233   : > { %5408 = vrcp.f32 %v4040_v60  ;;  %v4038_v47 = vadd.f32 1.0, %v5387_v20  ;;  %v4538_v61 = vmul.f32 -1.442695, %v7407_v5  ;;  %v7418_v40 = vadd.f32 %v5100_v15, %v3710_v12  ;;  %v7434_v34 = vpop.f32.mrf.mxu1  ;;  %v7701_v60 = vld [vmem:[#allocation7_spill] sm:$0xff] }
 0x234   : > { %v5389_v24 = vpop.eup %5388  ;;  %5410 = vpow2.f32 %v4540_v42  ;;  %v3862_v43 = vpop.f32.mrf.mxu0  ;;  %v7448_v42 = vadd.f32 %v4932_v46, %v7701_v60  ;;  %v5029_v17 = vadd.f32 %v7392_v8, %v7382_v37  ;;  %v7707_v8 = vld [vmem:[#allocation14_spill] sm:$0xff] }
 0x235   : > { %5412 = vrcp.f32 %v4038_v47  ;;  %v4041_v36 = vadd.f32 1.0, %v5389_v24  ;;  %v4541_v41 = vmul.f32 -1.442695, %v7418_v40  ;;  %v7432_v55 = vadd.f32 %v3862_v43, %v3702_v11  ;;  %v7445_v12 = vpop.f32.mrf.mxu1  ;;  %v7703_v43 = vld [vmem:[#allocation24_spill] sm:$0xff] }
 0x236   : > { %v5391_v26 = vpop.eup %5390  ;;  %5414 = vpow2.f32 %v4538_v61  ;;  %v5103_v3 = vpop.f32.mrf.mxu0  ;;  %v5014_v54 = vadd.f32 %v7310_v13, %v7703_v43 }
 0x237   : > { %5416 = vrcp.f32 %v4041_v36  ;;  %v4039_v57 = vadd.f32 1.0, %v5391_v26  ;;  %v4539_v59 = vmul.f32 -1.442695, %v7432_v55  ;;  %v7443_v16 = vadd.f32 %v5103_v3, %v3723_v28  ;;  %v7457_v33 = vpop.f32.mrf.mxu1 }
 0x238   : > { %v5393_v11 = vpop.eup %5392  ;;  %5418 = vpow2.f32 %v4541_v41  ;;  %v3875_v20 = vpop.f32.mrf.mxu0  ;;  %v3731_v28 = vadd.f32 %v5011_v49, %v7704_v38  ;;  %v7705_v49 = vld [vmem:[#allocation13_spill] sm:$0xff]  ;;  %v3734_v48 = vadd.f32 %v5014_v54, %v7706_v27  ;;  %v7710_v27 = vld [vmem:[#allocation18_spill] sm:$0xff] }
 0x239   : > { %v5395_v15 = vpop.eup %5394  ;;  %v4132_v47 = vmul.f32 %v5393_v11, %v7299_v39  ;;  %5420 = vrcp.f32 %v4039_v57  ;;  %v4544_v61 = vmul.f32 -1.442695, %v7443_v16  ;;  %v7455_v24 = vadd.f32 %v3875_v20, %v3715_v51  ;;  %v7470_v41 = vpop.f32.mrf.mxu1 }
 0x23a   : > { %v5397_v46 = vpop.eup %5396  ;;  %v4044_v0 = vadd.f32 1.0, %v5395_v15  ;;  %5422 = vpow2.f32 %v4539_v59  ;;  %v5104_v58 = vpop.f32.mrf.mxu0  ;;  %v3739_v3 = vadd.f32 %v5017_v30, %v7705_v49 }
 0x23b   : > { %v5399_v7 = vpop.eup %5398  ;;  %4164 = vst [vmem:[%s7463_s17 + $0x10] sm:$0xff] %v4132_v47  ;;  %v4130_v39 = vmul.f32 %v5397_v46, %v7307_v14  ;;  %5424 = vpow2.f32 %v4544_v61  ;;  %v4542_v51 = vmul.f32 -1.442695, %v7455_v24  ;;  %v7468_v36 = vadd.f32 %v5104_v58, %v3726_v62 }
 0x23c   : > { %v5401_v13 = vpop.eup %5400  ;;  %5426 = vrcp.f32 %v4044_v0  ;;  %v4042_v26 = vadd.f32 1.0, %v5399_v7  ;;  %v3878_v53 = vpop.f32.mrf.mxu0  ;;  %v5023_v46 = vadd.f32 %v7358_v25, %v7350_v35  ;;  %v3742_v0 = vadd.f32 %v5020_v56, %v7707_v8  ;;  %v7711_v8 = vld [vmem:[#allocation16_spill] sm:$0xff] }
 0x23d   : > { %v5403_v10 = vpop.eup %5402  ;;  %4162 = vst [vmem:[%s7463_s17] sm:$0xff] %v4130_v39  ;;  %v4133_v14 = vmul.f32 %v5401_v13, %v7315_v1  ;;  %5428 = vpow2.f32 %v4542_v51  ;;  %v4545_v57 = vmul.f32 -1.442695, %v7468_v36  ;;  %v7478_v59 = vadd.f32 %v3878_v53, %v3718_v50  ;;  %v5040_v50 = vpop.f32.mrf.mxu1  ;;  %v7708_v51 = vld [vmem:[#allocation17_spill] sm:$0xff] }
 0x23e   : > { %v5405_v11 = vpop.eup %5404  ;;  %5430 = vrcp.f32 %v4042_v26  ;;  %v4045_v60 = vadd.f32 1.0, %v5403_v10  ;;  %v5107_v20 = vpop.f32.mrf.mxu0  ;;  %v3755_v13 = vadd.f32 %v5029_v17, %v7708_v51  ;;  %v5032_v35 = vadd.f32 %v7409_v6, %v7400_v45 }
 0x23f   : > { %v5407_v30 = vpop.eup %5406  ;;  %4165 = vst [vmem:[%s7463_s17 + $0x18] sm:$0xff] %v4133_v14  ;;  %v4131_v62 = vmul.f32 %v5405_v11, %v7323_v9  ;;  %5432 = vpow2.f32 %v4545_v57  ;;  %v4543_v1 = vmul.f32 -1.442695, %v7478_v59  ;;  %v7486_v15 = vadd.f32 %v5107_v20, %v3739_v3  ;;  %v7709_v14 = vld [vmem:[#allocation15_spill] sm:$0xff] }
 0x240   : > { %v5409_v47 = vpop.eup %5408  ;;  %5434 = vrcp.f32 %v4045_v60  ;;  %v4043_v61 = vadd.f32 1.0, %v5407_v30  ;;  %v3891_v37 = vpop.f32.mrf.mxu0  ;;  %v5026_v3 = vadd.f32 %v7374_v44, %v7366_v22  ;;  %v3747_v45 = vadd.f32 %v5023_v46, %v7709_v14 }
 0x241   : > { %v5411_v43 = vpop.eup %5410  ;;  %4163 = vst [vmem:[%s7463_s17 + $0x8] sm:$0xff] %v4131_v62  ;;  %v4136_v9 = vmul.f32 %v5409_v47, %v7331_v29  ;;  %5436 = vpow2.f32 %v4543_v1  ;;  %v4548_v54 = vmul.f32 -1.442695, %v7486_v15  ;;  %v7494_v58 = vadd.f32 %v3891_v37, %v3731_v28  ;;  %v5042_v28 = vpop.f32.mrf.mxu1 }
 0x242   : > { %v5413_v38 = vpop.eup %5412  ;;  %5438 = vrcp.f32 %v4043_v61  ;;  %v4048_v7 = vadd.f32 1.0, %v5411_v43  ;;  %v5108_v39 = vpop.f32.mrf.mxu0  ;;  %v3758_v30 = vadd.f32 %v5032_v35, %v7710_v27  ;;  %v5041_v22 = vadd.f32 %v5040_v50, %v7470_v41 }
 0x243   : > { %v5415_v25 = vpop.eup %5414  ;;  %4168 = vst [vmem:[%s7463_s17 + $0x30] sm:$0xff] %v4136_v9  ;;  %v4134_v26 = vmul.f32 %v5413_v38, %v7340_v18  ;;  %5440 = vpow2.f32 %v4548_v54  ;;  %v4546_v29 = vmul.f32 -1.442695, %v7494_v58  ;;  %v7502_v56 = vadd.f32 %v5108_v39, %v3742_v0 }
 0x244   : > { %v5417_v53 = vpop.eup %5416  ;;  %5442 = vrcp.f32 %v4048_v7  ;;  %v4046_v49 = vadd.f32 1.0, %v5415_v25  ;;  %v3894_v10 = vpop.f32.mrf.mxu0  ;;  %v5035_v37 = vadd.f32 %v7434_v34, %v7420_v21  ;;  %v3750_v0 = vadd.f32 %v5026_v3, %v7711_v8 }
 0x245   : > { %v5419_v6 = vpop.eup %5418  ;;  %4166 = vst [vmem:[%s7463_s17 + $0x20] sm:$0xff] %v4134_v26  ;;  %v4137_v18 = vmul.f32 %v5417_v53, %v7348_v63  ;;  %5444 = vpow2.f32 %v4546_v29  ;;  %v4549_v57 = vmul.f32 -1.442695, %v7502_v56  ;;  %v7510_v11 = vadd.f32 %v3894_v10, %v3734_v48  ;;  %v5043_v48 = vpop.f32.mrf.mxu1  ;;  %v7712_v29 = vld [vmem:[#allocation19_spill] sm:$0xff] }
 0x246   : > { %v5421_v60 = vpop.eup %5420  ;;  %5446 = vrcp.f32 %v4046_v49  ;;  %v4049_v20 = vadd.f32 1.0, %v5419_v6  ;;  %v5111_v17 = vpop.f32.mrf.mxu0  ;;  %v3771_v7 = vadd.f32 %v5041_v22, %v7437_v19  ;;  %v5044_v39 = vadd.f32 %v5043_v48, %v5042_v28 }
 0x247   : > { %v5423_v44 = vpop.eup %5422  ;;  %4169 = vst [vmem:[%s7463_s17 + $0x38] sm:$0xff] %v4137_v18  ;;  %v4135_v62 = vmul.f32 %v5421_v60, %v7355_v31  ;;  %5448 = vpow2.f32 %v4549_v57  ;;  %v4547_v63 = vmul.f32 -1.442695, %v7510_v11  ;;  %v7517_v1 = vadd.f32 %v5111_v17, %v3755_v13  ;;  %v7713_v17 = vld [vmem:[#allocation20_spill] sm:$0xff] }
 0x248   : > { %v5425_v47 = vpop.eup %5424  ;;  %5450 = vrcp.f32 %v4049_v20  ;;  %v4047_v61 = vadd.f32 1.0, %v5423_v44  ;;  %v3907_v46 = vpop.f32.mrf.mxu0  ;;  %v3763_v19 = vadd.f32 %v5035_v37, %v7712_v29 }
 0x249   : > { %v5427_v41 = vpop.eup %5426  ;;  %4167 = vst [vmem:[%s7463_s17 + $0x28] sm:$0xff] %v4135_v62  ;;  %v4052_v50 = vadd.f32 1.0, %v5425_v47  ;;  %5452 = vpow2.f32 %v4547_v63  ;;  %v4552_v31 = vmul.f32 -1.442695, %v7517_v1  ;;  %v7524_v43 = vadd.f32 %v3907_v46, %v3747_v45 }
 0x24a   : > { %v5429_v9 = vpop.eup %5428  ;;  %v4140_v54 = vmul.f32 %v5427_v41, %v7363_v23  ;;  %5454 = vrcp.f32 %v4047_v61  ;;  %v5112_v38 = vpop.f32.mrf.mxu0  ;;  %v5038_v23 = vadd.f32 %v7457_v33, %v7445_v12  ;;  %v3774_v45 = vadd.f32 %v5044_v39, %v7448_v42 }
 0x24b   : > { %v5431_v21 = vpop.eup %5430  ;;  %5456 = vrcp.f32 %v4052_v50  ;;  %v4050_v34 = vadd.f32 1.0, %v5429_v9  ;;  %v4550_v51 = vmul.f32 -1.442695, %v7524_v43  ;;  %v7529_v13 = vadd.f32 %v5112_v38, %v3758_v30 }
 0x24c   : > { %v5433_v35 = vpop.eup %5432  ;;  %4172 = vst [vmem:[%s7463_s17 + $0x50] sm:$0xff] %v4140_v54  ;;  %v4138_v25 = vmul.f32 %v5431_v21, %v7372_v32  ;;  %5458 = vpow2.f32 %v4552_v31  ;;  %v3910_v26 = vpop.f32.mrf.mxu0 }
 0x24d   : > { %v5435_v28 = vpop.eup %5434  ;;  %5460 = vrcp.f32 %v4050_v34  ;;  %v4053_v53 = vadd.f32 1.0, %v5433_v35  ;;  %v4553_v49 = vmul.f32 -1.442695, %v7529_v13  ;;  %v7537_v3 = vadd.f32 %v3910_v26, %v3750_v0 }
 0x24e   : > { %v5437_v10 = vpop.eup %5436  ;;  %4170 = vst [vmem:[%s7463_s17 + $0x40] sm:$0xff] %v4138_v25  ;;  %v4141_v14 = vmul.f32 %v5435_v28, %v7380_v4  ;;  %5462 = vpow2.f32 %v4550_v51  ;;  %v5115_v32 = vpop.f32.mrf.mxu0  ;;  %v3766_v4 = vadd.f32 %v5038_v23, %v7713_v17 }
 0x24f   : > { %v5439_v6 = vpop.eup %5438  ;;  %5464 = vrcp.f32 %v4053_v53  ;;  %v4051_v12 = vadd.f32 1.0, %v5437_v10  ;;  %v4551_v33 = vmul.f32 -1.442695, %v7537_v3  ;;  %v7543_v18 = vadd.f32 %v5115_v32, %v3771_v7 }
 0x250   : > { %v5441_v57 = vpop.eup %5440  ;;  %4173 = vst [vmem:[%s7463_s17 + $0x58] sm:$0xff] %v4141_v14  ;;  %v4139_v60 = vmul.f32 %v5439_v6, %v7390_v52  ;;  %5466 = vpow2.f32 %v4553_v49  ;;  %v3923_v20 = vpop.f32.mrf.mxu0 }
 0x251   : > { %v5443_v27 = vpop.eup %5442  ;;  %5468 = vrcp.f32 %v4051_v12  ;;  %v4056_v42 = vadd.f32 1.0, %v5441_v57  ;;  %v7548_v30 = vadd.f32 %v3923_v20, %v3763_v19  ;;  %v4556_v22 = vmul.f32 -1.442695, %v7543_v18 }
 0x252   : > { %v5445_v44 = vpop.eup %5444  ;;  %4171 = vst [vmem:[%s7463_s17 + $0x48] sm:$0xff] %v4139_v60  ;;  %v4144_v62 = vmul.f32 %v5443_v27, %v7398_v2  ;;  %5470 = vpow2.f32 %v4551_v33  ;;  %v5116_v63 = vpop.f32.mrf.mxu0 }
 0x253   : > { %v5447_v48 = vpop.eup %5446  ;;  %5472 = vrcp.f32 %v4056_v42  ;;  %v4054_v52 = vadd.f32 1.0, %v5445_v44  ;;  %v4554_v47 = vmul.f32 -1.442695, %v7548_v30  ;;  %v7554_v61 = vadd.f32 %v5116_v63, %v3774_v45 }
 0x254   : > { %v5449_v46 = vpop.eup %5448  ;;  %4176 = vst [vmem:[%s7463_s17 + $0x70] sm:$0xff] %v4144_v62  ;;  %v4142_v37 = vmul.f32 %v5447_v48, %v7407_v5  ;;  %5474 = vpow2.f32 %v4556_v22  ;;  %v3926_v8 = vpop.f32.mrf.mxu0 }
 0x255   : > { %v5451_v0 = vpop.eup %5450  ;;  %5476 = vrcp.f32 %v4054_v52  ;;  %v4057_v2 = vadd.f32 1.0, %v5449_v46  ;;  %v7558_v41 = vadd.f32 %v3926_v8, %v3766_v4  ;;  %v4557_v50 = vmul.f32 -1.442695, %v7554_v61 }
 0x256   : > { %v5453_v31 = vpop.eup %5452  ;;  %4174 = vst [vmem:[%s7463_s17 + $0x60] sm:$0xff] %v4142_v37  ;;  %v4145_v9 = vmul.f32 %v5451_v0, %v7418_v40  ;;  %5478 = vpow2.f32 %v4554_v47 }
 0x257   : > { %v5455_v54 = vpop.eup %5454  ;;  %5480 = vrcp.f32 %v4057_v2  ;;  %v4055_v5 = vadd.f32 1.0, %v5453_v31  ;;  %v4555_v38 = vmul.f32 -1.442695, %v7558_v41 }
 0x258   : > { %v5457_v7 = vpop.eup %5456  ;;  %4177 = vst [vmem:[%s7463_s17 + $0x78] sm:$0xff] %v4145_v9  ;;  %v4143_v39 = vmul.f32 %v5455_v54, %v7432_v55  ;;  %5482 = vpow2.f32 %v4557_v50 }
 0x259   : > { %v5459_v21 = vpop.eup %5458  ;;  %v4148_v34 = vmul.f32 %v5457_v7, %v7443_v16  ;;  %5484 = vrcp.f32 %v4055_v5 }
 0x25a   : > { %v5461_v51 = vpop.eup %5460  ;;  %4175 = vst [vmem:[%s7463_s17 + $0x68] sm:$0xff] %v4143_v39  ;;  %v4060_v40 = vadd.f32 1.0, %v5459_v21  ;;  %5486 = vpow2.f32 %v4555_v38 }
 0x25b   : > { %v5463_v35 = vpop.eup %5462  ;;  %4180 = vst [vmem:[%s7463_s17 + $0x90] sm:$0xff] %v4148_v34  ;;  %v4146_v25 = vmul.f32 %v5461_v51, %v7455_v24 }
 0x25c   : > { %v5465_v26 = vpop.eup %5464  ;;  %5488 = vrcp.f32 %v4060_v40  ;;  %v4058_v23 = vadd.f32 1.0, %v5463_v35 }
 0x25d   : > { %v5467_v55 = vpop.eup %5466  ;;  %4178 = vst [vmem:[%s7463_s17 + $0x80] sm:$0xff] %v4146_v25  ;;  %v4149_v29 = vmul.f32 %v5465_v26, %v7468_v36 }
 0x25e   : > { %v5469_v19 = vpop.eup %5468  ;;  %5490 = vrcp.f32 %v4058_v23  ;;  %v4061_v16 = vadd.f32 1.0, %v5467_v55 }
 0x25f   : > { %v5471_v28 = vpop.eup %5470  ;;  %4181 = vst [vmem:[%s7463_s17 + $0x98] sm:$0xff] %v4149_v29  ;;  %v4147_v53 = vmul.f32 %v5469_v19, %v7478_v59 }
 0x260   : > { %v5473_v49 = vpop.eup %5472  ;;  %5492 = vrcp.f32 %v4061_v16  ;;  %v4059_v24 = vadd.f32 1.0, %v5471_v28 }
 0x261   : > { %v5475_v10 = vpop.eup %5474  ;;  %4179 = vst [vmem:[%s7463_s17 + $0x88] sm:$0xff] %v4147_v53  ;;  %v4152_v14 = vmul.f32 %v5473_v49, %v7486_v15 }
 0x262   : > { %v5477_v32 = vpop.eup %5476  ;;  %5494 = vrcp.f32 %v4059_v24  ;;  %v4064_v36 = vadd.f32 1.0, %v5475_v10 }
 0x263   : > { %v5479_v45 = vpop.eup %5478  ;;  %4184 = vst [vmem:[%s7463_s17 + $0xb0] sm:$0xff] %v4152_v14  ;;  %v4150_v6 = vmul.f32 %v5477_v32, %v7494_v58 }
 0x264   : > { %v5481_v12 = vpop.eup %5480  ;;  %v4062_v33 = vadd.f32 1.0, %v5479_v45  ;;  %5496 = vrcp.f32 %v4064_v36 }
 0x265   : > { %v5483_v59 = vpop.eup %5482  ;;  %4182 = vst [vmem:[%s7463_s17 + $0xa0] sm:$0xff] %v4150_v6  ;;  %v4153_v57 = vmul.f32 %v5481_v12, %v7502_v56 }
 0x266   : > { %v5485_v60 = vpop.eup %5484  ;;  %5498 = vrcp.f32 %v4062_v33  ;;  %v4065_v15 = vadd.f32 1.0, %v5483_v59 }
 0x267   : > { %v5487_v20 = vpop.eup %5486  ;;  %4185 = vst [vmem:[%s7463_s17 + $0xb8] sm:$0xff] %v4153_v57  ;;  %v4151_v17 = vmul.f32 %v5485_v60, %v7510_v11 }
 0x268   : > { %v4063_v4 = vadd.f32 1.0, %v5487_v20  ;;  %5500 = vrcp.f32 %v4065_v15 }
 0x269   : > { %v5489_v58 = vpop.eup %5488  ;;  %4183 = vst [vmem:[%s7463_s17 + $0xa8] sm:$0xff] %v4151_v17 }
 0x26a   : > { %v4156_v27 = vmul.f32 %v5489_v58, %v7517_v1  ;;  %5502 = vrcp.f32 %v4063_v4 }
 0x26b   : > { %v5491_v56 = vpop.eup %5490 }
 0x26c   : > { %4188 = vst [vmem:[%s7463_s17 + $0xd0] sm:$0xff] %v4156_v27  ;;  %v4154_v42 = vmul.f32 %v5491_v56, %v7524_v43 }
 0x26d   : > { %v5493_v22 = vpop.eup %5492 }
 0x26e   : > { %4186 = vst [vmem:[%s7463_s17 + $0xc0] sm:$0xff] %v4154_v42  ;;  %v4157_v11 = vmul.f32 %v5493_v22, %v7529_v13 }
 0x26f   : > { %v5495_v44 = vpop.eup %5494 }
 0x270   : > { %4189 = vst [vmem:[%s7463_s17 + $0xd8] sm:$0xff] %v4157_v11  ;;  %v4155_v62 = vmul.f32 %v5495_v44, %v7537_v3 }
 0x271   : > { %v5497_v63 = vpop.eup %5496 }
 0x272   : > { %4187 = vst [vmem:[%s7463_s17 + $0xc8] sm:$0xff] %v4155_v62  ;;  %v4160_v1 = vmul.f32 %v5497_v63, %v7543_v18 }
 0x273   : > { %v5499_v48 = vpop.eup %5498 }
 0x274   : > { %v4158_v52 = vmul.f32 %v5499_v48, %v7548_v30  ;;  %4192 = vst [vmem:[%s7463_s17 + $0xf0] sm:$0xff] %v4160_v1 }
 0x275   : > { %v5501_v43 = vpop.eup %5500 }
 0x276   : > { %4190 = vst [vmem:[%s7463_s17 + $0xe0] sm:$0xff] %v4158_v52  ;;  %v4161_v13 = vmul.f32 %v5501_v43, %v7554_v61 }
 0x277   : > { %v5503_v47 = vpop.eup %5502 }
 0x278   : > { %v4159_v3 = vmul.f32 %v5503_v47, %v7558_v41  ;;  %4193 = vst [vmem:[%s7463_s17 + $0xf8] sm:$0xff] %v4161_v13 }
 0x27a   : > { %4191 = vst [vmem:[%s7463_s17 + $0xe8] sm:$0xff] %v4159_v3 }
 0x27b   : > { %5527 = shalt.err (!%p5524_p3)
}
 0x27c   : > { %s5528_s4 = scalar_lea.hbm %s7601_s26, 4096  ;;  %s5532_s7 = scalar_lea.hbm %s7653_s3, 8192 }
 0x27d   : > { %p5529_p4 = scmp.ne.s32.totalorder %s7601_s26, %s5528_s4  ;;  %p5533_p9 = scmp.lt.s32.totalorder %s7601_s26, %s7653_s3 }
 0x27e   : > { %p5534_p10 = scmp.lt.s32.totalorder %s5532_s7, %s5528_s4 }
 0x27f   : > { %p5530_p7 = pnand %p5529_p4, %p5638_p5 }
 0x280   : > { %p5535_p11 = por %p5534_p10, %p5533_p9 }
 0x281   : > { %p5531_p8 = pneg %p5530_p7 }
 0x283   : > { %p5536_p12 = pnand %p5535_p11, %p5531_p8 }
 0x285   : > { %5539 = shalt.err (!%p5536_p12)
}
 0x286   : > { %s5578_s10 = smov 128   ;;  %s5579_s11 = smov 8  }
 0x287   : > { %5133 = dma.vmem_to_hbm [thread:$0]  (%p5638_p5), %s7603_s20, 4096, %s7601_s26, %s7610_s16, %s5578_s10, %s5578_s10, %s5579_s11  }
 0x288 PF: > { %p5139_p13 = scmp.ge.s32.totalorder %s5574_s15, 2  ;;  %s4223_s17 = sand.u32 1, %s5562_s12  }
 0x289   : > { %s4224_s19 = scalar_lea.sflag [#allocation4], %s4223_s17 }
 0x28a   : > { %p5136_p0 = pnand %p5139_p13, %p5642_p6 }
 0x28c   : > { %p5137_p1 = pneg %p5136_p0 }
 0x28e   : > { %5557 = dma.done.wait (%p5137_p1), %s4224_s19, 4096  }
 0x28f   : > { %5559 = vsyncadd (%p5137_p1), %s4224_s19, 4294963200  ;;  %p13_p2 = scmp.ge.s32.totalorder %s5625_s18, 4   ;;  %s7714_s12 = smov %s5566_s13 }
 0x290   : > { %s7715_s13 = smov %s5570_s14  ;;  %s7716_s14 = smov %s5636_s21 }
 0x291   : > { %s7717_s15 = smov %s5625_s18  ;;  %15 = sbr.rel (!%p13_p2) target bundleno = 3 (0x3), region = 70 }
 0x296   :  { %4229 = vsyncpa [#allocation4], 1 }
 0x297   :  { %4231 = vsyncpa [#allocation4 + $0x1], 1 }

</bundles_post_ra>
